<compile_context>
chip_gen: v7x
topology: tpu7x:2x2x1
jax: 0.10.0
libtpu: 0.0.40
codegen_flags: <defaults>
</compile_context>

<pallas_src>
import functools

import numpy as np

import jax
import jax.numpy as jnp
from jax.experimental import pallas as pl
from jax.experimental.pallas import tpu as pltpu


# Architecture constants (assumed standard conv VAE).
ENC_C1 = 16   # encoder conv1 out channels
ENC_C2 = 32   # encoder conv2 out channels
DEC_C1 = 16   # decoder conv1 out channels
FC_HID = 64   # fc hidden width


# ----------------------------------------------------------------------------
# Fused VAE forward kernel
# ----------------------------------------------------------------------------
def _vae_fused_kernel(
    x_ref, eps_ref,
    c1m_ref, c1b_ref, c2m_ref, c2b_ref,
    fcw_ref, fcb_ref, mlvw_ref, mlvb_ref,
    d1w_ref, d1b_ref, d2w_ref, d2b_ref,
    dc1m_ref, dc1b_ref, dc2m_ref, dc2b_ref,
    rec_ref, mean_ref, logvar_ref,
    se2_ref, sd1_ref, sd2_ref,
    *, B, C, H, W, nhid):
  f32 = jnp.float32
  bf16 = jnp.bfloat16
  H2, W2 = H // 2, W // 2
  H4, W4 = H // 4, W // 4

  # Zero the padded staging slabs once; untouched borders stay zero = padding.
  se2_ref[...] = jnp.zeros_like(se2_ref)
  sd1_ref[...] = jnp.zeros_like(sd1_ref)
  sd2_ref[...] = jnp.zeros_like(sd2_ref)

  # ---------------- encoder conv1: 3x3 s2 p1, C -> 16, relu -----------------
  # x_ref slab: ((H+2)*B, (W+2)*C), row = h_pad*B + b, lane = w_pad*C + c.
  m1 = [c1m_ref[i] for i in range(3)]              # each ((W+2)*C, W2*ENC_C1)
  b1 = c1b_ref[...]
  for oh in range(H2):
    acc = jnp.dot(x_ref[pl.ds((2 * oh) * B, B), :], m1[0],
                  preferred_element_type=f32)
    acc += jnp.dot(x_ref[pl.ds((2 * oh + 1) * B, B), :], m1[1],
                   preferred_element_type=f32)
    acc += jnp.dot(x_ref[pl.ds((2 * oh + 2) * B, B), :], m1[2],
                   preferred_element_type=f32)
    r = jnp.maximum(acc + b1, 0.0).astype(bf16)    # (B, W2*ENC_C1)
    se2_ref[pl.ds((oh + 1) * B, B), pl.ds(ENC_C1, W2 * ENC_C1)] = r

  # ---------------- encoder conv2: 3x3 s2 p1, 16 -> 32, relu ----------------
  m2 = [c2m_ref[i] for i in range(3)]              # each ((W2+2)*ENC_C1, W4*ENC_C2)
  b2 = c2b_ref[...]
  rows = []
  for oh in range(H4):
    acc = jnp.dot(se2_ref[pl.ds((2 * oh) * B, B), :], m2[0],
                  preferred_element_type=f32)
    acc += jnp.dot(se2_ref[pl.ds((2 * oh + 1) * B, B), :], m2[1],
                   preferred_element_type=f32)
    acc += jnp.dot(se2_ref[pl.ds((2 * oh + 2) * B, B), :], m2[2],
                   preferred_element_type=f32)
    rows.append(jnp.maximum(acc + b2, 0.0))
  h_flat = jnp.concatenate(rows, axis=1)           # (B, H4*W4*ENC_C2), NHWC order

  # --------- fc -> (mean | logvar) -> reparameterize -> dec fc1/fc2 ---------
  h = jnp.maximum(
      jnp.dot(h_flat.astype(bf16), fcw_ref[...], preferred_element_type=f32)
      + fcb_ref[...], 0.0)
  ml = jnp.dot(h.astype(bf16), mlvw_ref[...],
               preferred_element_type=f32) + mlvb_ref[...]
  mean = ml[:, :nhid]
  logvar = ml[:, nhid:]
  mean_ref[...] = mean
  logvar_ref[...] = logvar
  z = mean + eps_ref[...] * (0.5 * jnp.exp(logvar))   # sigma = 0.5*exp(logvar)
  d1 = jnp.maximum(
      jnp.dot(z.astype(bf16), d1w_ref[...], preferred_element_type=f32)
      + d1b_ref[...], 0.0)
  d2 = jnp.maximum(
      jnp.dot(d1.astype(bf16), d2w_ref[...], preferred_element_type=f32)
      + d2b_ref[...], 0.0)
  # d2: (B, H4 * 2*W4 * ENC_C2) -- 2x W-upsample already folded into dec_fc2_w.

  # --- scatter into dec-conv1 padded slab; 2x H-upsample = duplicated rows ---
  row_len = (2 * W4) * ENC_C2
  for h4 in range(H4):
    rv = d2[:, h4 * row_len:(h4 + 1) * row_len].astype(bf16)
    sd1_ref[pl.ds((2 * h4 + 1) * B, B), pl.ds(ENC_C2, row_len)] = rv
    sd1_ref[pl.ds((2 * h4 + 2) * B, B), pl.ds(ENC_C2, row_len)] = rv

  # -------- decoder conv1: 3x3 s1 p1, 32 -> 16, relu (W-upsample folded) -----
  acc = jnp.dot(sd1_ref[pl.ds(0, 2 * H4 * B), :], dc1m_ref[0],
                preferred_element_type=f32)
  acc += jnp.dot(sd1_ref[pl.ds(B, 2 * H4 * B), :], dc1m_ref[1],
                 preferred_element_type=f32)
  acc += jnp.dot(sd1_ref[pl.ds(2 * B, 2 * H4 * B), :], dc1m_ref[2],
                 preferred_element_type=f32)
  rd1 = jnp.maximum(acc + dc1b_ref[...], 0.0)      # (2*H4*B, 4*W4*DEC_C1)

  # --- scatter into dec-conv2 padded slab; 2x H-upsample = duplicated rows ---
  for oh in range(2 * H4):
    rv = rd1[oh * B:(oh + 1) * B, :].astype(bf16)
    sd2_ref[pl.ds((2 * oh + 1) * B, B), pl.ds(DEC_C1, W * DEC_C1)] = rv
    sd2_ref[pl.ds((2 * oh + 2) * B, B), pl.ds(DEC_C1, W * DEC_C1)] = rv

  # ---------------- decoder conv2: 3x3 s1 p1, 16 -> C, sigmoid ---------------
  acc = jnp.dot(sd2_ref[pl.ds(0, H * B), :], dc2m_ref[0],
                preferred_element_type=f32)
  acc += jnp.dot(sd2_ref[pl.ds(B, H * B), :], dc2m_ref[1],
                 preferred_element_type=f32)
  acc += jnp.dot(sd2_ref[pl.ds(2 * B, H * B), :], dc2m_ref[2],
                 preferred_element_type=f32)
  logits = acc + dc2b_ref[...]                     # (H*B, W*C)
  out = 1.0 / (1.0 + jnp.exp(-logits))             # exact sigmoid -> stays in [0,1]

  # Lane-dense reconstruction: (B, H*W*C) NHWC-flat (1024 lanes, unmasked DMA).
  for oh in range(H):
    rec_ref[:, pl.ds(oh * W * C, W * C)] = out[oh * B:(oh + 1) * B, :]


def vae_pallas_forward(x_slab, eps, kp, *, B, C, H, W, nhid):
  """Single fused pallas_call for the whole VAE forward."""
  H2, W2, H4, W4 = H // 2, W // 2, H // 4, W // 4
  kernel = functools.partial(_vae_fused_kernel, B=B, C=C, H=H, W=W, nhid=nhid)
  out_shape = (
      jax.ShapeDtypeStruct((B, H * W * C), jnp.float32),   # reconstruction (flat NHWC)
      jax.ShapeDtypeStruct((B, nhid), jnp.float32),         # mean
      jax.ShapeDtypeStruct((B, nhid), jnp.float32),         # logvar
  )
  scratch_shapes = [
      # padded input slab for encoder conv2  ((H2+2)*B, (W2+2)*ENC_C1)
      pltpu.VMEM(((H2 + 2) * B, (W2 + 2) * ENC_C1), jnp.bfloat16),
      # padded (upsampled) input slab for decoder conv1
      pltpu.VMEM(((2 * H4 + 2) * B, (2 * W4 + 2) * ENC_C2), jnp.bfloat16),
      # padded (upsampled) input slab for decoder conv2
      pltpu.VMEM(((H + 2) * B, (W + 2) * DEC_C1), jnp.bfloat16),
  ]
  return pl.pallas_call(
      kernel,
      out_shape=out_shape,
      scratch_shapes=scratch_shapes,
  )(x_slab, eps,
    kp["enc_c1_m"], kp["enc_c1_b"], kp["enc_c2_m"], kp["enc_c2_b"],
    kp["enc_fc_w"], kp["enc_fc_b"], kp["mlv_w"], kp["mlv_b"],
    kp["dec_fc1_w"], kp["dec_fc1_b"], kp["dec_fc2_w"], kp["dec_fc2_b"],
    kp["dec_c1_m"], kp["dec_c1_b"], kp["dec_c2_m"], kp["dec_c2_b"])


# ----------------------------------------------------------------------------
# Parameters: native (3x3) weights + one-time packing into kernel layout
# ----------------------------------------------------------------------------
def init_native_params(key, shape, nhid):
  C, H, W = shape
  flat = ENC_C2 * (H // 4) * (W // 4)
  ks = jax.random.split(key, 18)

  def w(k, *s):   # bf16-representable f32 (so kernel bf16 weights are exact)
    v = 0.05 * jax.random.normal(k, s, jnp.float32)
    return v.astype(jnp.bfloat16).astype(jnp.float32)

  def b(k, n):
    return 0.05 * jax.random.normal(k, (n,), jnp.float32)

  return {
      "enc_c1_k": w(ks[0], 3, 3, C, ENC_C1),        "enc_c1_b": b(ks[1], ENC_C1),
      "enc_c2_k": w(ks[2], 3, 3, ENC_C1, ENC_C2),   "enc_c2_b": b(ks[3], ENC_C2),
      "enc_fc_w": w(ks[4], flat, FC_HID),           "enc_fc_b": b(ks[5], FC_HID),
      "mean_w":   w(ks[6], FC_HID, nhid),           "mean_b":   b(ks[7], nhid),
      "logvar_w": w(ks[8], FC_HID, nhid),           "logvar_b": b(ks[9], nhid),
      "dec_fc1_w": w(ks[10], nhid, FC_HID),         "dec_fc1_b": b(ks[11], FC_HID),
      "dec_fc2_w": w(ks[12], FC_HID, flat),         "dec_fc2_b": b(ks[13], flat),
      "dec_c1_k": w(ks[14], 3, 3, ENC_C2, DEC_C1),  "dec_c1_b": b(ks[15], DEC_C1),
      "dec_c2_k": w(ks[16], 3, 3, DEC_C1, C),       "dec_c2_b": b(ks[17], C),
  }


def _conv_row_mats(k_np, stride, pad, w_in, upsample_w=False):
  """Per-kernel-row structured matrices for a 3x3 conv.

  k_np: (3,3,Ci,Co).  Returns (3, Wp*Ci, OW*Co) (or 2*OW*Co with W-upsample),
  so that  out_row[oh] = sum_i  in_padded_row[stride*oh + i] @ M[i],
  with input row lanes ordered (w_pad, c_in) and output lanes (w_out, c_out).
  """
  kh, kw, ci, co = k_np.shape
  wp = w_in + 2 * pad
  ow = (w_in + 2 * pad - kw) // stride + 1
  mats = np.zeros((kh, wp * ci, ow * co), np.float32)
  for i in range(kh):
    for o in range(ow):
      for j in range(kw):
        wi = stride * o + j
        mats[i, wi * ci:(wi + 1) * ci, o * co:(o + 1) * co] = k_np[i, j]
  if upsample_w:   # fold 2x nearest-neighbour W-upsample: duplicate column groups
    mats = mats.reshape(kh, wp * ci, ow, co)
    mats = np.repeat(mats, 2, axis=2).reshape(kh, wp * ci, 2 * ow * co)
  return mats


def pack_params(nat, shape, nhid):
  """One-time packing of native weights into the kernel's matmul layouts."""
  C, H, W = shape
  H4, W4 = H // 4, W // 4
  f = lambda a: np.asarray(a, np.float32)
  bf = lambda a: jnp.asarray(np.asarray(a, np.float32), jnp.bfloat16)
  brow = lambda bias, reps: jnp.asarray(np.tile(f(bias), reps)[None, :], jnp.float32)
  frow = lambda bias: jnp.asarray(f(bias)[None, :], jnp.float32)

  m1 = _conv_row_mats(f(nat["enc_c1_k"]), 2, 1, W)
  m2 = _conv_row_mats(f(nat["enc_c2_k"]), 2, 1, W // 2)
  md1 = _conv_row_mats(f(nat["dec_c1_k"]), 1, 1, 2 * W4, upsample_w=True)
  md2 = _conv_row_mats(f(nat["dec_c2_k"]), 1, 1, W)

  # dec_fc2: output order (h, w, c) NHWC; fold the 2x W-upsample (dup columns).
  wd2 = f(nat["dec_fc2_w"]).reshape(FC_HID, H4, W4, ENC_C2)
  wd2 = np.repeat(wd2, 2, axis=2).reshape(FC_HID, H4 * 2 * W4 * ENC_C2)
  bd2 = f(nat["dec_fc2_b"]).reshape(H4, W4, ENC_C2)
  bd2 = np.repeat(bd2, 2, axis=1).reshape(-1)

  return {
      "enc_c1_m": bf(m1), "enc_c1_b": brow(nat["enc_c1_b"], W // 2),
      "enc_c2_m": bf(m2), "enc_c2_b": brow(nat["enc_c2_b"], W // 4),
      "enc_fc_w": bf(nat["enc_fc_w"]), "enc_fc_b": frow(nat["enc_fc_b"]),
      "mlv_w": bf(np.concatenate([f(nat["mean_w"]), f(nat["logvar_w"])], axis=1)),
      "mlv_b": jnp.asarray(
          np.concatenate([f(nat["mean_b"]), f(nat["logvar_b"])])[None, :],
          jnp.float32),
      "dec_fc1_w": bf(nat["dec_fc1_w"]), "dec_fc1_b": frow(nat["dec_fc1_b"]),
      "dec_fc2_w": bf(wd2), "dec_fc2_b": jnp.asarray(bd2[None, :], jnp.float32),
      "dec_c1_m": bf(md1), "dec_c1_b": brow(nat["dec_c1_b"], 4 * W4),
      "dec_c2_m": bf(md2), "dec_c2_b": brow(nat["dec_c2_b"], W),
  }


# ----------------------------------------------------------------------------
# Forward (wrapper does input/output layout plumbing only)
# ----------------------------------------------------------------------------
def vae_forward(x_nchw, kp, eps, shape):
  C, H, W = shape
  B = x_nchw.shape[0]
  nhid = eps.shape[1]
  # NCHW -> zero-padded row slab ((H+2)*B, (W+2)*C), bf16.
  nhwc = jnp.transpose(x_nchw, (0, 2, 3, 1))
  xpad = jnp.pad(nhwc, ((0, 0), (1, 1), (1, 1), (0, 0)))
  x_slab = jnp.transpose(xpad, (1, 0, 2, 3)).reshape(
      (H + 2) * B, (W + 2) * C).astype(jnp.bfloat16)
  rec_flat, mean, logvar = vae_pallas_forward(
      x_slab, eps, kp, B=B, C=C, H=H, W=W, nhid=nhid)
  rec = jnp.transpose(rec_flat.reshape(B, H, W, C), (0, 3, 1, 2))
  return rec, mean, logvar


# ----------------------------------------------------------------------------
# Pure-JAX reference of the same (assumed) architecture, f32
# ----------------------------------------------------------------------------
def vae_reference(x_nchw, nat, eps, shape):
  C, H, W = shape
  B = x_nchw.shape[0]

  def conv(x, k, b, stride):
    y = jax.lax.conv_general_dilated(
        x, k, (stride, stride), ((1, 1), (1, 1)),
        dimension_numbers=("NHWC", "HWIO", "NHWC"))
    return y + b

  x = jnp.transpose(x_nchw, (0, 2, 3, 1))
  h = jax.nn.relu(conv(x, nat["enc_c1_k"], nat["enc_c1_b"], 2))
  h = jax.nn.relu(conv(h, nat["enc_c2_k"], nat["enc_c2_b"], 2))
  h = jax.nn.relu(h.reshape(B, -1) @ nat["enc_fc_w"] + nat["enc_fc_b"])
  mean = h @ nat["mean_w"] + nat["mean_b"]
  logvar = h @ nat["logvar_w"] + nat["logvar_b"]
  z = mean + eps * (0.5 * jnp.exp(logvar))
  d = jax.nn.relu(z @ nat["dec_fc1_w"] + nat["dec_fc1_b"])
  d = jax.nn.relu(d @ nat["dec_fc2_w"] + nat["dec_fc2_b"])
  d = d.reshape(B, H // 4, W // 4, ENC_C2)
  d = jnp.repeat(jnp.repeat(d, 2, axis=1), 2, axis=2)
  d = jax.nn.relu(conv(d, nat["dec_c1_k"], nat["dec_c1_b"], 1))
  d = jnp.repeat(jnp.repeat(d, 2, axis=1), 2, axis=2)
  d = jax.nn.sigmoid(conv(d, nat["dec_c2_k"], nat["dec_c2_b"], 1))
  return jnp.transpose(d, (0, 3, 1, 2)), mean, logvar


if __name__ == "__main__":
  shape = (4, 16, 16)   # (C, H, W)
  nhid = 16
  B = 2

  key = jax.random.PRNGKey(0)
  k_param, k_x, k_eps = jax.random.split(key, 3)
  nat = init_native_params(k_param, shape, nhid)
  kp = pack_params(nat, shape, nhid)

  x = jax.random.normal(k_x, (B,) + shape, dtype=jnp.float32)
  eps = jax.random.normal(k_eps, (B, nhid), dtype=jnp.float32)

  fwd = jax.jit(functools.partial(vae_forward, shape=shape))
  rec, mean, logvar = fwd(x, kp, eps)
  jax.block_until_ready((rec, mean, logvar))

  # Shape / range checks.
  assert rec.shape == (B,) + shape
  assert mean.shape == (B, nhid) and logvar.shape == (B, nhid)
  assert bool(jnp.all(jnp.isfinite(rec)))
  assert bool(jnp.all(jnp.isfinite(mean))) and bool(jnp.all(jnp.isfinite(logvar)))
  assert bool(jnp.all(rec >= 0.0)) and bool(jnp.all(rec <= 1.0))   # exact sigmoid

  # Numerical check vs. the pure-JAX f32 reference (kernel uses bf16 operands).
  rec_r, mean_r, logvar_r = vae_reference(x, nat, eps, shape)
  assert bool(jnp.allclose(mean, mean_r, atol=5e-2, rtol=5e-2)), \
      float(jnp.max(jnp.abs(mean - mean_r)))
  assert bool(jnp.allclose(logvar, logvar_r, atol=5e-2, rtol=5e-2)), \
      float(jnp.max(jnp.abs(logvar - logvar_r)))
  assert bool(jnp.allclose(rec, rec_r, atol=5e-2, rtol=5e-2)), \
      float(jnp.max(jnp.abs(rec - rec_r)))

  print("KERNEL_OK")
</pallas_src>

<mosaic_0001>
module attributes {stable_mosaic.version = 11 : i64} {
  func.func @_vae_fused_kernel(%arg0: memref<36x72xbf16, #tpu.memory_space<vmem>>, %arg1: memref<2x16xf32, #tpu.memory_space<vmem>>, %arg2: memref<3x72x128xbf16, #tpu.memory_space<vmem>>, %arg3: memref<1x128xf32, #tpu.memory_space<vmem>>, %arg4: memref<3x160x128xbf16, #tpu.memory_space<vmem>>, %arg5: memref<1x128xf32, #tpu.memory_space<vmem>>, %arg6: memref<512x64xbf16, #tpu.memory_space<vmem>>, %arg7: memref<1x64xf32, #tpu.memory_space<vmem>>, %arg8: memref<64x32xbf16, #tpu.memory_space<vmem>>, %arg9: memref<1x32xf32, #tpu.memory_space<vmem>>, %arg10: memref<16x64xbf16, #tpu.memory_space<vmem>>, %arg11: memref<1x64xf32, #tpu.memory_space<vmem>>, %arg12: memref<64x1024xbf16, #tpu.memory_space<vmem>>, %arg13: memref<1x1024xf32, #tpu.memory_space<vmem>>, %arg14: memref<3x320x256xbf16, #tpu.memory_space<vmem>>, %arg15: memref<1x256xf32, #tpu.memory_space<vmem>>, %arg16: memref<3x288x64xbf16, #tpu.memory_space<vmem>>, %arg17: memref<1x64xf32, #tpu.memory_space<vmem>>, %arg18: memref<2x1024xf32, #tpu.memory_space<vmem>>, %arg19: memref<2x16xf32, #tpu.memory_space<vmem>>, %arg20: memref<2x16xf32, #tpu.memory_space<vmem>>, %arg21: memref<20x160xbf16, #tpu.memory_space<vmem>>, %arg22: memref<20x320xbf16, #tpu.memory_space<vmem>>, %arg23: memref<36x288xbf16, #tpu.memory_space<vmem>>) attributes {dimension_semantics = [], scalar_prefetch = 0 : i64, scratch_operands = 3 : i64, tpu.core_type = #tpu.core_type<tc>} {
    %cst = arith.constant 0.000000e+00 : bf16
    %0 = vector.broadcast %cst : bf16 to vector<20x160xbf16>
    %c0 = arith.constant 0 : index
    %c0_0 = arith.constant 0 : index
    %1 = vector.load %arg21[%c0, %c0_0] : memref<20x160xbf16, #tpu.memory_space<vmem>>, vector<20x160xbf16>
    tpu.vector_store %arg21[%c0, %c0_0], %0 {strides = array<i32>} : memref<20x160xbf16, #tpu.memory_space<vmem>>, vector<20x160xbf16>,
    %cst_1 = arith.constant 0.000000e+00 : bf16
    %2 = vector.broadcast %cst_1 : bf16 to vector<20x320xbf16>
    %c0_2 = arith.constant 0 : index
    %c0_3 = arith.constant 0 : index
    %3 = vector.load %arg22[%c0_2, %c0_3] : memref<20x320xbf16, #tpu.memory_space<vmem>>, vector<20x320xbf16>
    tpu.vector_store %arg22[%c0_2, %c0_3], %2 {strides = array<i32>} : memref<20x320xbf16, #tpu.memory_space<vmem>>, vector<20x320xbf16>,
    %cst_4 = arith.constant 0.000000e+00 : bf16
    %4 = vector.broadcast %cst_4 : bf16 to vector<36x288xbf16>
    %c0_5 = arith.constant 0 : index
    %c0_6 = arith.constant 0 : index
    %5 = vector.load %arg23[%c0_5, %c0_6] : memref<36x288xbf16, #tpu.memory_space<vmem>>, vector<36x288xbf16>
    tpu.vector_store %arg23[%c0_5, %c0_6], %4 {strides = array<i32>} : memref<36x288xbf16, #tpu.memory_space<vmem>>, vector<36x288xbf16>,
    %c0_7 = arith.constant 0 : index
    %c0_8 = arith.constant 0 : index
    %c0_9 = arith.constant 0 : index
    %6 = vector.load %arg2[%c0_7, %c0_8, %c0_9] : memref<3x72x128xbf16, #tpu.memory_space<vmem>>, vector<1x72x128xbf16>
    %7 = vector.shape_cast %6 : vector<1x72x128xbf16> to vector<72x128xbf16>
    %c1 = arith.constant 1 : index
    %c0_10 = arith.constant 0 : index
    %c0_11 = arith.constant 0 : index
    %8 = vector.load %arg2[%c1, %c0_10, %c0_11] : memref<3x72x128xbf16, #tpu.memory_space<vmem>>, vector<1x72x128xbf16>
    %9 = vector.shape_cast %8 : vector<1x72x128xbf16> to vector<72x128xbf16>
    %c2 = arith.constant 2 : index
    %c0_12 = arith.constant 0 : index
    %c0_13 = arith.constant 0 : index
    %10 = vector.load %arg2[%c2, %c0_12, %c0_13] : memref<3x72x128xbf16, #tpu.memory_space<vmem>>, vector<1x72x128xbf16>
    %11 = vector.shape_cast %10 : vector<1x72x128xbf16> to vector<72x128xbf16>
    %c0_14 = arith.constant 0 : index
    %c0_15 = arith.constant 0 : index
    %12 = vector.load %arg3[%c0_14, %c0_15] : memref<1x128xf32, #tpu.memory_space<vmem>>, vector<1x128xf32>
    %c0_16 = arith.constant 0 : index
    %c0_17 = arith.constant 0 : index
    %13 = vector.load %arg0[%c0_16, %c0_17] : memref<36x72xbf16, #tpu.memory_space<vmem>>, vector<2x72xbf16>
    %cst_18 = arith.constant dense<0.000000e+00> : vector<2x128xf32>
    %14 = tpu.matmul %13, %7, %cst_18 {dimension_numbers = #tpu.dot_dimension_numbers<[1], [0], [0], [1], [0, 0, 1, 1], [], []>} : vector<2x72xbf16>, vector<72x128xbf16>, vector<2x128xf32> -> vector<2x128xf32>
    %c2_19 = arith.constant 2 : index
    %c0_20 = arith.constant 0 : index
    %15 = vector.load %arg0[%c2_19, %c0_20] : memref<36x72xbf16, #tpu.memory_space<vmem>>, vector<2x72xbf16>
    %cst_21 = arith.constant dense<0.000000e+00> : vector<2x128xf32>
    %16 = tpu.matmul %15, %9, %cst_21 {dimension_numbers = #tpu.dot_dimension_numbers<[1], [0], [0], [1], [0, 0, 1, 1], [], []>} : vector<2x72xbf16>, vector<72x128xbf16>, vector<2x128xf32> -> vector<2x128xf32>
    %17 = arith.addf %14, %16 : vector<2x128xf32>
    %c4 = arith.constant 4 : index
    %c0_22 = arith.constant 0 : index
    %18 = vector.load %arg0[%c4, %c0_22] : memref<36x72xbf16, #tpu.memory_space<vmem>>, vector<2x72xbf16>
    %cst_23 = arith.constant dense<0.000000e+00> : vector<2x128xf32>
    %19 = tpu.matmul %18, %11, %cst_23 {dimension_numbers = #tpu.dot_dimension_numbers<[1], [0], [0], [1], [0, 0, 1, 1], [], []>} : vector<2x72xbf16>, vector<72x128xbf16>, vector<2x128xf32> -> vector<2x128xf32>
    %20 = arith.addf %17, %19 : vector<2x128xf32>
    %21 = vector.broadcast %12 : vector<1x128xf32> to vector<2x128xf32>
    %22 = arith.addf %20, %21 : vector<2x128xf32>
    %cst_24 = arith.constant 0.000000e+00 : f32
    %23 = vector.broadcast %cst_24 : f32 to vector<2x128xf32>
    %24 = arith.maximumf %22, %23 : vector<2x128xf32>
    %25 = arith.truncf %24 : vector<2x128xf32> to vector<2x128xbf16>
    %c2_25 = arith.constant 2 : index
    %c16 = arith.constant 16 : index
    %26 = vector.load %arg21[%c2_25, %c16] : memref<20x160xbf16, #tpu.memory_space<vmem>>, vector<2x128xbf16>
    tpu.vector_store %arg21[%c2_25, %c16], %25 {strides = array<i32>} : memref<20x160xbf16, #tpu.memory_space<vmem>>, vector<2x128xbf16>,
    %c4_26 = arith.constant 4 : index
    %c0_27 = arith.constant 0 : index
    %27 = vector.load %arg0[%c4_26, %c0_27] : memref<36x72xbf16, #tpu.memory_space<vmem>>, vector<2x72xbf16>
    %cst_28 = arith.constant dense<0.000000e+00> : vector<2x128xf32>
    %28 = tpu.matmul %27, %7, %cst_28 {dimension_numbers = #tpu.dot_dimension_numbers<[1], [0], [0], [1], [0, 0, 1, 1], [], []>} : vector<2x72xbf16>, vector<72x128xbf16>, vector<2x128xf32> -> vector<2x128xf32>
    %c6 = arith.constant 6 : index
    %c0_29 = arith.constant 0 : index
    %29 = vector.load %arg0[%c6, %c0_29] : memref<36x72xbf16, #tpu.memory_space<vmem>>, vector<2x72xbf16>
    %cst_30 = arith.constant dense<0.000000e+00> : vector<2x128xf32>
    %30 = tpu.matmul %29, %9, %cst_30 {dimension_numbers = #tpu.dot_dimension_numbers<[1], [0], [0], [1], [0, 0, 1, 1], [], []>} : vector<2x72xbf16>, vector<72x128xbf16>, vector<2x128xf32> -> vector<2x128xf32>
    %31 = arith.addf %28, %30 : vector<2x128xf32>
    %c8 = arith.constant 8 : index
    %c0_31 = arith.constant 0 : index
    %32 = vector.load %arg0[%c8, %c0_31] : memref<36x72xbf16, #tpu.memory_space<vmem>>, vector<2x72xbf16>
    %cst_32 = arith.constant dense<0.000000e+00> : vector<2x128xf32>
    %33 = tpu.matmul %32, %11, %cst_32 {dimension_numbers = #tpu.dot_dimension_numbers<[1], [0], [0], [1], [0, 0, 1, 1], [], []>} : vector<2x72xbf16>, vector<72x128xbf16>, vector<2x128xf32> -> vector<2x128xf32>
    %34 = arith.addf %31, %33 : vector<2x128xf32>
    %35 = vector.broadcast %12 : vector<1x128xf32> to vector<2x128xf32>
    %36 = arith.addf %34, %35 : vector<2x128xf32>
    %cst_33 = arith.constant 0.000000e+00 : f32
    %37 = vector.broadcast %cst_33 : f32 to vector<2x128xf32>
    %38 = arith.maximumf %36, %37 : vector<2x128xf32>
    %39 = arith.truncf %38 : vector<2x128xf32> to vector<2x128xbf16>
    %c4_34 = arith.constant 4 : index
    %c16_35 = arith.constant 16 : index
    %40 = vector.load %arg21[%c4_34, %c16_35] : memref<20x160xbf16, #tpu.memory_space<vmem>>, vector<2x128xbf16>
    tpu.vector_store %arg21[%c4_34, %c16_35], %39 {strides = array<i32>} : memref<20x160xbf16, #tpu.memory_space<vmem>>, vector<2x128xbf16>,
    %c8_36 = arith.constant 8 : index
    %c0_37 = arith.constant 0 : index
    %41 = vector.load %arg0[%c8_36, %c0_37] : memref<36x72xbf16, #tpu.memory_space<vmem>>, vector<2x72xbf16>
    %cst_38 = arith.constant dense<0.000000e+00> : vector<2x128xf32>
    %42 = tpu.matmul %41, %7, %cst_38 {dimension_numbers = #tpu.dot_dimension_numbers<[1], [0], [0], [1], [0, 0, 1, 1], [], []>} : vector<2x72xbf16>, vector<72x128xbf16>, vector<2x128xf32> -> vector<2x128xf32>
    %c10 = arith.constant 10 : index
    %c0_39 = arith.constant 0 : index
    %43 = vector.load %arg0[%c10, %c0_39] : memref<36x72xbf16, #tpu.memory_space<vmem>>, vector<2x72xbf16>
    %cst_40 = arith.constant dense<0.000000e+00> : vector<2x128xf32>
    %44 = tpu.matmul %43, %9, %cst_40 {dimension_numbers = #tpu.dot_dimension_numbers<[1], [0], [0], [1], [0, 0, 1, 1], [], []>} : vector<2x72xbf16>, vector<72x128xbf16>, vector<2x128xf32> -> vector<2x128xf32>
    %45 = arith.addf %42, %44 : vector<2x128xf32>
    %c12 = arith.constant 12 : index
    %c0_41 = arith.constant 0 : index
    %46 = vector.load %arg0[%c12, %c0_41] : memref<36x72xbf16, #tpu.memory_space<vmem>>, vector<2x72xbf16>
    %cst_42 = arith.constant dense<0.000000e+00> : vector<2x128xf32>
    %47 = tpu.matmul %46, %11, %cst_42 {dimension_numbers = #tpu.dot_dimension_numbers<[1], [0], [0], [1], [0, 0, 1, 1], [], []>} : vector<2x72xbf16>, vector<72x128xbf16>, vector<2x128xf32> -> vector<2x128xf32>
    %48 = arith.addf %45, %47 : vector<2x128xf32>
    %49 = vector.broadcast %12 : vector<1x128xf32> to vector<2x128xf32>
    %50 = arith.addf %48, %49 : vector<2x128xf32>
    %cst_43 = arith.constant 0.000000e+00 : f32
    %51 = vector.broadcast %cst_43 : f32 to vector<2x128xf32>
    %52 = arith.maximumf %50, %51 : vector<2x128xf32>
    %53 = arith.truncf %52 : vector<2x128xf32> to vector<2x128xbf16>
    %c6_44 = arith.constant 6 : index
    %c16_45 = arith.constant 16 : index
    %54 = vector.load %arg21[%c6_44, %c16_45] : memref<20x160xbf16, #tpu.memory_space<vmem>>, vector<2x128xbf16>
    tpu.vector_store %arg21[%c6_44, %c16_45], %53 {strides = array<i32>} : memref<20x160xbf16, #tpu.memory_space<vmem>>, vector<2x128xbf16>,
    %c12_46 = arith.constant 12 : index
    %c0_47 = arith.constant 0 : index
    %55 = vector.load %arg0[%c12_46, %c0_47] : memref<36x72xbf16, #tpu.memory_space<vmem>>, vector<2x72xbf16>
    %cst_48 = arith.constant dense<0.000000e+00> : vector<2x128xf32>
    %56 = tpu.matmul %55, %7, %cst_48 {dimension_numbers = #tpu.dot_dimension_numbers<[1], [0], [0], [1], [0, 0, 1, 1], [], []>} : vector<2x72xbf16>, vector<72x128xbf16>, vector<2x128xf32> -> vector<2x128xf32>
    %c14 = arith.constant 14 : index
    %c0_49 = arith.constant 0 : index
    %57 = vector.load %arg0[%c14, %c0_49] : memref<36x72xbf16, #tpu.memory_space<vmem>>, vector<2x72xbf16>
    %cst_50 = arith.constant dense<0.000000e+00> : vector<2x128xf32>
    %58 = tpu.matmul %57, %9, %cst_50 {dimension_numbers = #tpu.dot_dimension_numbers<[1], [0], [0], [1], [0, 0, 1, 1], [], []>} : vector<2x72xbf16>, vector<72x128xbf16>, vector<2x128xf32> -> vector<2x128xf32>
    %59 = arith.addf %56, %58 : vector<2x128xf32>
    %c16_51 = arith.constant 16 : index
    %c0_52 = arith.constant 0 : index
    %60 = vector.load %arg0[%c16_51, %c0_52] : memref<36x72xbf16, #tpu.memory_space<vmem>>, vector<2x72xbf16>
    %cst_53 = arith.constant dense<0.000000e+00> : vector<2x128xf32>
    %61 = tpu.matmul %60, %11, %cst_53 {dimension_numbers = #tpu.dot_dimension_numbers<[1], [0], [0], [1], [0, 0, 1, 1], [], []>} : vector<2x72xbf16>, vector<72x128xbf16>, vector<2x128xf32> -> vector<2x128xf32>
    %62 = arith.addf %59, %61 : vector<2x128xf32>
    %63 = vector.broadcast %12 : vector<1x128xf32> to vector<2x128xf32>
    %64 = arith.addf %62, %63 : vector<2x128xf32>
    %cst_54 = arith.constant 0.000000e+00 : f32
    %65 = vector.broadcast %cst_54 : f32 to vector<2x128xf32>
    %66 = arith.maximumf %64, %65 : vector<2x128xf32>
    %67 = arith.truncf %66 : vector<2x128xf32> to vector<2x128xbf16>
    %c8_55 = arith.constant 8 : index
    %c16_56 = arith.constant 16 : index
    %68 = vector.load %arg21[%c8_55, %c16_56] : memref<20x160xbf16, #tpu.memory_space<vmem>>, vector<2x128xbf16>
    tpu.vector_store %arg21[%c8_55, %c16_56], %67 {strides = array<i32>} : memref<20x160xbf16, #tpu.memory_space<vmem>>, vector<2x128xbf16>,
    %c16_57 = arith.constant 16 : index
    %c0_58 = arith.constant 0 : index
    %69 = vector.load %arg0[%c16_57, %c0_58] : memref<36x72xbf16, #tpu.memory_space<vmem>>, vector<2x72xbf16>
    %cst_59 = arith.constant dense<0.000000e+00> : vector<2x128xf32>
    %70 = tpu.matmul %69, %7, %cst_59 {dimension_numbers = #tpu.dot_dimension_numbers<[1], [0], [0], [1], [0, 0, 1, 1], [], []>} : vector<2x72xbf16>, vector<72x128xbf16>, vector<2x128xf32> -> vector<2x128xf32>
    %c18 = arith.constant 18 : index
    %c0_60 = arith.constant 0 : index
    %71 = vector.load %arg0[%c18, %c0_60] : memref<36x72xbf16, #tpu.memory_space<vmem>>, vector<2x72xbf16>
    %cst_61 = arith.constant dense<0.000000e+00> : vector<2x128xf32>
    %72 = tpu.matmul %71, %9, %cst_61 {dimension_numbers = #tpu.dot_dimension_numbers<[1], [0], [0], [1], [0, 0, 1, 1], [], []>} : vector<2x72xbf16>, vector<72x128xbf16>, vector<2x128xf32> -> vector<2x128xf32>
    %73 = arith.addf %70, %72 : vector<2x128xf32>
    %c20 = arith.constant 20 : index
    %c0_62 = arith.constant 0 : index
    %74 = vector.load %arg0[%c20, %c0_62] : memref<36x72xbf16, #tpu.memory_space<vmem>>, vector<2x72xbf16>
    %cst_63 = arith.constant dense<0.000000e+00> : vector<2x128xf32>
    %75 = tpu.matmul %74, %11, %cst_63 {dimension_numbers = #tpu.dot_dimension_numbers<[1], [0], [0], [1], [0, 0, 1, 1], [], []>} : vector<2x72xbf16>, vector<72x128xbf16>, vector<2x128xf32> -> vector<2x128xf32>
    %76 = arith.addf %73, %75 : vector<2x128xf32>
    %77 = vector.broadcast %12 : vector<1x128xf32> to vector<2x128xf32>
    %78 = arith.addf %76, %77 : vector<2x128xf32>
    %cst_64 = arith.constant 0.000000e+00 : f32
    %79 = vector.broadcast %cst_64 : f32 to vector<2x128xf32>
    %80 = arith.maximumf %78, %79 : vector<2x128xf32>
    %81 = arith.truncf %80 : vector<2x128xf32> to vector<2x128xbf16>
    %c10_65 = arith.constant 10 : index
    %c16_66 = arith.constant 16 : index
    %82 = vector.load %arg21[%c10_65, %c16_66] : memref<20x160xbf16, #tpu.memory_space<vmem>>, vector<2x128xbf16>
    tpu.vector_store %arg21[%c10_65, %c16_66], %81 {strides = array<i32>} : memref<20x160xbf16, #tpu.memory_space<vmem>>, vector<2x128xbf16>,
    %c20_67 = arith.constant 20 : index
    %c0_68 = arith.constant 0 : index
    %83 = vector.load %arg0[%c20_67, %c0_68] : memref<36x72xbf16, #tpu.memory_space<vmem>>, vector<2x72xbf16>
    %cst_69 = arith.constant dense<0.000000e+00> : vector<2x128xf32>
    %84 = tpu.matmul %83, %7, %cst_69 {dimension_numbers = #tpu.dot_dimension_numbers<[1], [0], [0], [1], [0, 0, 1, 1], [], []>} : vector<2x72xbf16>, vector<72x128xbf16>, vector<2x128xf32> -> vector<2x128xf32>
    %c22 = arith.constant 22 : index
    %c0_70 = arith.constant 0 : index
    %85 = vector.load %arg0[%c22, %c0_70] : memref<36x72xbf16, #tpu.memory_space<vmem>>, vector<2x72xbf16>
    %cst_71 = arith.constant dense<0.000000e+00> : vector<2x128xf32>
    %86 = tpu.matmul %85, %9, %cst_71 {dimension_numbers = #tpu.dot_dimension_numbers<[1], [0], [0], [1], [0, 0, 1, 1], [], []>} : vector<2x72xbf16>, vector<72x128xbf16>, vector<2x128xf32> -> vector<2x128xf32>
    %87 = arith.addf %84, %86 : vector<2x128xf32>
    %c24 = arith.constant 24 : index
    %c0_72 = arith.constant 0 : index
    %88 = vector.load %arg0[%c24, %c0_72] : memref<36x72xbf16, #tpu.memory_space<vmem>>, vector<2x72xbf16>
    %cst_73 = arith.constant dense<0.000000e+00> : vector<2x128xf32>
    %89 = tpu.matmul %88, %11, %cst_73 {dimension_numbers = #tpu.dot_dimension_numbers<[1], [0], [0], [1], [0, 0, 1, 1], [], []>} : vector<2x72xbf16>, vector<72x128xbf16>, vector<2x128xf32> -> vector<2x128xf32>
    %90 = arith.addf %87, %89 : vector<2x128xf32>
    %91 = vector.broadcast %12 : vector<1x128xf32> to vector<2x128xf32>
    %92 = arith.addf %90, %91 : vector<2x128xf32>
    %cst_74 = arith.constant 0.000000e+00 : f32
    %93 = vector.broadcast %cst_74 : f32 to vector<2x128xf32>
    %94 = arith.maximumf %92, %93 : vector<2x128xf32>
    %95 = arith.truncf %94 : vector<2x128xf32> to vector<2x128xbf16>
    %c12_75 = arith.constant 12 : index
    %c16_76 = arith.constant 16 : index
    %96 = vector.load %arg21[%c12_75, %c16_76] : memref<20x160xbf16, #tpu.memory_space<vmem>>, vector<2x128xbf16>
    tpu.vector_store %arg21[%c12_75, %c16_76], %95 {strides = array<i32>} : memref<20x160xbf16, #tpu.memory_space<vmem>>, vector<2x128xbf16>,
    %c24_77 = arith.constant 24 : index
    %c0_78 = arith.constant 0 : index
    %97 = vector.load %arg0[%c24_77, %c0_78] : memref<36x72xbf16, #tpu.memory_space<vmem>>, vector<2x72xbf16>
    %cst_79 = arith.constant dense<0.000000e+00> : vector<2x128xf32>
    %98 = tpu.matmul %97, %7, %cst_79 {dimension_numbers = #tpu.dot_dimension_numbers<[1], [0], [0], [1], [0, 0, 1, 1], [], []>} : vector<2x72xbf16>, vector<72x128xbf16>, vector<2x128xf32> -> vector<2x128xf32>
    %c26 = arith.constant 26 : index
    %c0_80 = arith.constant 0 : index
    %99 = vector.load %arg0[%c26, %c0_80] : memref<36x72xbf16, #tpu.memory_space<vmem>>, vector<2x72xbf16>
    %cst_81 = arith.constant dense<0.000000e+00> : vector<2x128xf32>
    %100 = tpu.matmul %99, %9, %cst_81 {dimension_numbers = #tpu.dot_dimension_numbers<[1], [0], [0], [1], [0, 0, 1, 1], [], []>} : vector<2x72xbf16>, vector<72x128xbf16>, vector<2x128xf32> -> vector<2x128xf32>
    %101 = arith.addf %98, %100 : vector<2x128xf32>
    %c28 = arith.constant 28 : index
    %c0_82 = arith.constant 0 : index
    %102 = vector.load %arg0[%c28, %c0_82] : memref<36x72xbf16, #tpu.memory_space<vmem>>, vector<2x72xbf16>
    %cst_83 = arith.constant dense<0.000000e+00> : vector<2x128xf32>
    %103 = tpu.matmul %102, %11, %cst_83 {dimension_numbers = #tpu.dot_dimension_numbers<[1], [0], [0], [1], [0, 0, 1, 1], [], []>} : vector<2x72xbf16>, vector<72x128xbf16>, vector<2x128xf32> -> vector<2x128xf32>
    %104 = arith.addf %101, %103 : vector<2x128xf32>
    %105 = vector.broadcast %12 : vector<1x128xf32> to vector<2x128xf32>
    %106 = arith.addf %104, %105 : vector<2x128xf32>
    %cst_84 = arith.constant 0.000000e+00 : f32
    %107 = vector.broadcast %cst_84 : f32 to vector<2x128xf32>
    %108 = arith.maximumf %106, %107 : vector<2x128xf32>
    %109 = arith.truncf %108 : vector<2x128xf32> to vector<2x128xbf16>
    %c14_85 = arith.constant 14 : index
    %c16_86 = arith.constant 16 : index
    %110 = vector.load %arg21[%c14_85, %c16_86] : memref<20x160xbf16, #tpu.memory_space<vmem>>, vector<2x128xbf16>
    tpu.vector_store %arg21[%c14_85, %c16_86], %109 {strides = array<i32>} : memref<20x160xbf16, #tpu.memory_space<vmem>>, vector<2x128xbf16>,
    %c28_87 = arith.constant 28 : index
    %c0_88 = arith.constant 0 : index
    %111 = vector.load %arg0[%c28_87, %c0_88] : memref<36x72xbf16, #tpu.memory_space<vmem>>, vector<2x72xbf16>
    %cst_89 = arith.constant dense<0.000000e+00> : vector<2x128xf32>
    %112 = tpu.matmul %111, %7, %cst_89 {dimension_numbers = #tpu.dot_dimension_numbers<[1], [0], [0], [1], [0, 0, 1, 1], [], []>} : vector<2x72xbf16>, vector<72x128xbf16>, vector<2x128xf32> -> vector<2x128xf32>
    %c30 = arith.constant 30 : index
    %c0_90 = arith.constant 0 : index
    %113 = vector.load %arg0[%c30, %c0_90] : memref<36x72xbf16, #tpu.memory_space<vmem>>, vector<2x72xbf16>
    %cst_91 = arith.constant dense<0.000000e+00> : vector<2x128xf32>
    %114 = tpu.matmul %113, %9, %cst_91 {dimension_numbers = #tpu.dot_dimension_numbers<[1], [0], [0], [1], [0, 0, 1, 1], [], []>} : vector<2x72xbf16>, vector<72x128xbf16>, vector<2x128xf32> -> vector<2x128xf32>
    %115 = arith.addf %112, %114 : vector<2x128xf32>
    %c32 = arith.constant 32 : index
    %c0_92 = arith.constant 0 : index
    %116 = vector.load %arg0[%c32, %c0_92] : memref<36x72xbf16, #tpu.memory_space<vmem>>, vector<2x72xbf16>
    %cst_93 = arith.constant dense<0.000000e+00> : vector<2x128xf32>
    %117 = tpu.matmul %116, %11, %cst_93 {dimension_numbers = #tpu.dot_dimension_numbers<[1], [0], [0], [1], [0, 0, 1, 1], [], []>} : vector<2x72xbf16>, vector<72x128xbf16>, vector<2x128xf32> -> vector<2x128xf32>
    %118 = arith.addf %115, %117 : vector<2x128xf32>
    %119 = vector.broadcast %12 : vector<1x128xf32> to vector<2x128xf32>
    %120 = arith.addf %118, %119 : vector<2x128xf32>
    %cst_94 = arith.constant 0.000000e+00 : f32
    %121 = vector.broadcast %cst_94 : f32 to vector<2x128xf32>
    %122 = arith.maximumf %120, %121 : vector<2x128xf32>
    %123 = arith.truncf %122 : vector<2x128xf32> to vector<2x128xbf16>
    %c16_95 = arith.constant 16 : index
    %c16_96 = arith.constant 16 : index
    %124 = vector.load %arg21[%c16_95, %c16_96] : memref<20x160xbf16, #tpu.memory_space<vmem>>, vector<2x128xbf16>
    tpu.vector_store %arg21[%c16_95, %c16_96], %123 {strides = array<i32>} : memref<20x160xbf16, #tpu.memory_space<vmem>>, vector<2x128xbf16>,
    %c0_97 = arith.constant 0 : index
    %c0_98 = arith.constant 0 : index
    %c0_99 = arith.constant 0 : index
    %125 = vector.load %arg4[%c0_97, %c0_98, %c0_99] : memref<3x160x128xbf16, #tpu.memory_space<vmem>>, vector<1x160x128xbf16>
    %126 = vector.shape_cast %125 : vector<1x160x128xbf16> to vector<160x128xbf16>
    %c1_100 = arith.constant 1 : index
    %c0_101 = arith.constant 0 : index
    %c0_102 = arith.constant 0 : index
    %127 = vector.load %arg4[%c1_100, %c0_101, %c0_102] : memref<3x160x128xbf16, #tpu.memory_space<vmem>>, vector<1x160x128xbf16>
    %128 = vector.shape_cast %127 : vector<1x160x128xbf16> to vector<160x128xbf16>
    %c2_103 = arith.constant 2 : index
    %c0_104 = arith.constant 0 : index
    %c0_105 = arith.constant 0 : index
    %129 = vector.load %arg4[%c2_103, %c0_104, %c0_105] : memref<3x160x128xbf16, #tpu.memory_space<vmem>>, vector<1x160x128xbf16>
    %130 = vector.shape_cast %129 : vector<1x160x128xbf16> to vector<160x128xbf16>
    %c0_106 = arith.constant 0 : index
    %c0_107 = arith.constant 0 : index
    %131 = vector.load %arg5[%c0_106, %c0_107] : memref<1x128xf32, #tpu.memory_space<vmem>>, vector<1x128xf32>
    %c0_108 = arith.constant 0 : index
    %c0_109 = arith.constant 0 : index
    %132 = vector.load %arg21[%c0_108, %c0_109] : memref<20x160xbf16, #tpu.memory_space<vmem>>, vector<2x160xbf16>
    %cst_110 = arith.constant dense<0.000000e+00> : vector<2x128xf32>
    %133 = tpu.matmul %132, %126, %cst_110 {dimension_numbers = #tpu.dot_dimension_numbers<[1], [0], [0], [1], [0, 0, 1, 1], [], []>} : vector<2x160xbf16>, vector<160x128xbf16>, vector<2x128xf32> -> vector<2x128xf32>
    %c2_111 = arith.constant 2 : index
    %c0_112 = arith.constant 0 : index
    %134 = vector.load %arg21[%c2_111, %c0_112] : memref<20x160xbf16, #tpu.memory_space<vmem>>, vector<2x160xbf16>
    %cst_113 = arith.constant dense<0.000000e+00> : vector<2x128xf32>
    %135 = tpu.matmul %134, %128, %cst_113 {dimension_numbers = #tpu.dot_dimension_numbers<[1], [0], [0], [1], [0, 0, 1, 1], [], []>} : vector<2x160xbf16>, vector<160x128xbf16>, vector<2x128xf32> -> vector<2x128xf32>
    %136 = arith.addf %133, %135 : vector<2x128xf32>
    %c4_114 = arith.constant 4 : index
    %c0_115 = arith.constant 0 : index
    %137 = vector.load %arg21[%c4_114, %c0_115] : memref<20x160xbf16, #tpu.memory_space<vmem>>, vector<2x160xbf16>
    %cst_116 = arith.constant dense<0.000000e+00> : vector<2x128xf32>
    %138 = tpu.matmul %137, %130, %cst_116 {dimension_numbers = #tpu.dot_dimension_numbers<[1], [0], [0], [1], [0, 0, 1, 1], [], []>} : vector<2x160xbf16>, vector<160x128xbf16>, vector<2x128xf32> -> vector<2x128xf32>
    %139 = arith.addf %136, %138 : vector<2x128xf32>
    %140 = vector.broadcast %131 : vector<1x128xf32> to vector<2x128xf32>
    %141 = arith.addf %139, %140 : vector<2x128xf32>
    %cst_117 = arith.constant 0.000000e+00 : f32
    %142 = vector.broadcast %cst_117 : f32 to vector<2x128xf32>
    %143 = arith.maximumf %141, %142 : vector<2x128xf32>
    %c4_118 = arith.constant 4 : index
    %c0_119 = arith.constant 0 : index
    %144 = vector.load %arg21[%c4_118, %c0_119] : memref<20x160xbf16, #tpu.memory_space<vmem>>, vector<2x160xbf16>
    %cst_120 = arith.constant dense<0.000000e+00> : vector<2x128xf32>
    %145 = tpu.matmul %144, %126, %cst_120 {dimension_numbers = #tpu.dot_dimension_numbers<[1], [0], [0], [1], [0, 0, 1, 1], [], []>} : vector<2x160xbf16>, vector<160x128xbf16>, vector<2x128xf32> -> vector<2x128xf32>
    %c6_121 = arith.constant 6 : index
    %c0_122 = arith.constant 0 : index
    %146 = vector.load %arg21[%c6_121, %c0_122] : memref<20x160xbf16, #tpu.memory_space<vmem>>, vector<2x160xbf16>
    %cst_123 = arith.constant dense<0.000000e+00> : vector<2x128xf32>
    %147 = tpu.matmul %146, %128, %cst_123 {dimension_numbers = #tpu.dot_dimension_numbers<[1], [0], [0], [1], [0, 0, 1, 1], [], []>} : vector<2x160xbf16>, vector<160x128xbf16>, vector<2x128xf32> -> vector<2x128xf32>
    %148 = arith.addf %145, %147 : vector<2x128xf32>
    %c8_124 = arith.constant 8 : index
    %c0_125 = arith.constant 0 : index
    %149 = vector.load %arg21[%c8_124, %c0_125] : memref<20x160xbf16, #tpu.memory_space<vmem>>, vector<2x160xbf16>
    %cst_126 = arith.constant dense<0.000000e+00> : vector<2x128xf32>
    %150 = tpu.matmul %149, %130, %cst_126 {dimension_numbers = #tpu.dot_dimension_numbers<[1], [0], [0], [1], [0, 0, 1, 1], [], []>} : vector<2x160xbf16>, vector<160x128xbf16>, vector<2x128xf32> -> vector<2x128xf32>
    %151 = arith.addf %148, %150 : vector<2x128xf32>
    %152 = vector.broadcast %131 : vector<1x128xf32> to vector<2x128xf32>
    %153 = arith.addf %151, %152 : vector<2x128xf32>
    %cst_127 = arith.constant 0.000000e+00 : f32
    %154 = vector.broadcast %cst_127 : f32 to vector<2x128xf32>
    %155 = arith.maximumf %153, %154 : vector<2x128xf32>
    %c8_128 = arith.constant 8 : index
    %c0_129 = arith.constant 0 : index
    %156 = vector.load %arg21[%c8_128, %c0_129] : memref<20x160xbf16, #tpu.memory_space<vmem>>, vector<2x160xbf16>
    %cst_130 = arith.constant dense<0.000000e+00> : vector<2x128xf32>
    %157 = tpu.matmul %156, %126, %cst_130 {dimension_numbers = #tpu.dot_dimension_numbers<[1], [0], [0], [1], [0, 0, 1, 1], [], []>} : vector<2x160xbf16>, vector<160x128xbf16>, vector<2x128xf32> -> vector<2x128xf32>
    %c10_131 = arith.constant 10 : index
    %c0_132 = arith.constant 0 : index
    %158 = vector.load %arg21[%c10_131, %c0_132] : memref<20x160xbf16, #tpu.memory_space<vmem>>, vector<2x160xbf16>
    %cst_133 = arith.constant dense<0.000000e+00> : vector<2x128xf32>
    %159 = tpu.matmul %158, %128, %cst_133 {dimension_numbers = #tpu.dot_dimension_numbers<[1], [0], [0], [1], [0, 0, 1, 1], [], []>} : vector<2x160xbf16>, vector<160x128xbf16>, vector<2x128xf32> -> vector<2x128xf32>
    %160 = arith.addf %157, %159 : vector<2x128xf32>
    %c12_134 = arith.constant 12 : index
    %c0_135 = arith.constant 0 : index
    %161 = vector.load %arg21[%c12_134, %c0_135] : memref<20x160xbf16, #tpu.memory_space<vmem>>, vector<2x160xbf16>
    %cst_136 = arith.constant dense<0.000000e+00> : vector<2x128xf32>
    %162 = tpu.matmul %161, %130, %cst_136 {dimension_numbers = #tpu.dot_dimension_numbers<[1], [0], [0], [1], [0, 0, 1, 1], [], []>} : vector<2x160xbf16>, vector<160x128xbf16>, vector<2x128xf32> -> vector<2x128xf32>
    %163 = arith.addf %160, %162 : vector<2x128xf32>
    %164 = vector.broadcast %131 : vector<1x128xf32> to vector<2x128xf32>
    %165 = arith.addf %163, %164 : vector<2x128xf32>
    %cst_137 = arith.constant 0.000000e+00 : f32
    %166 = vector.broadcast %cst_137 : f32 to vector<2x128xf32>
    %167 = arith.maximumf %165, %166 : vector<2x128xf32>
    %c12_138 = arith.constant 12 : index
    %c0_139 = arith.constant 0 : index
    %168 = vector.load %arg21[%c12_138, %c0_139] : memref<20x160xbf16, #tpu.memory_space<vmem>>, vector<2x160xbf16>
    %cst_140 = arith.constant dense<0.000000e+00> : vector<2x128xf32>
    %169 = tpu.matmul %168, %126, %cst_140 {dimension_numbers = #tpu.dot_dimension_numbers<[1], [0], [0], [1], [0, 0, 1, 1], [], []>} : vector<2x160xbf16>, vector<160x128xbf16>, vector<2x128xf32> -> vector<2x128xf32>
    %c14_141 = arith.constant 14 : index
    %c0_142 = arith.constant 0 : index
    %170 = vector.load %arg21[%c14_141, %c0_142] : memref<20x160xbf16, #tpu.memory_space<vmem>>, vector<2x160xbf16>
    %cst_143 = arith.constant dense<0.000000e+00> : vector<2x128xf32>
    %171 = tpu.matmul %170, %128, %cst_143 {dimension_numbers = #tpu.dot_dimension_numbers<[1], [0], [0], [1], [0, 0, 1, 1], [], []>} : vector<2x160xbf16>, vector<160x128xbf16>, vector<2x128xf32> -> vector<2x128xf32>
    %172 = arith.addf %169, %171 : vector<2x128xf32>
    %c16_144 = arith.constant 16 : index
    %c0_145 = arith.constant 0 : index
    %173 = vector.load %arg21[%c16_144, %c0_145] : memref<20x160xbf16, #tpu.memory_space<vmem>>, vector<2x160xbf16>
    %cst_146 = arith.constant dense<0.000000e+00> : vector<2x128xf32>
    %174 = tpu.matmul %173, %130, %cst_146 {dimension_numbers = #tpu.dot_dimension_numbers<[1], [0], [0], [1], [0, 0, 1, 1], [], []>} : vector<2x160xbf16>, vector<160x128xbf16>, vector<2x128xf32> -> vector<2x128xf32>
    %175 = arith.addf %172, %174 : vector<2x128xf32>
    %176 = vector.broadcast %131 : vector<1x128xf32> to vector<2x128xf32>
    %177 = arith.addf %175, %176 : vector<2x128xf32>
    %cst_147 = arith.constant 0.000000e+00 : f32
    %178 = vector.broadcast %cst_147 : f32 to vector<2x128xf32>
    %179 = arith.maximumf %177, %178 : vector<2x128xf32>
    %180 = tpu.concatenate %143, %155, %167, %179 in 1 : vector<2x128xf32>, vector<2x128xf32>, vector<2x128xf32>, vector<2x128xf32> -> vector<2x512xf32>
    %181 = arith.truncf %180 : vector<2x512xf32> to vector<2x512xbf16>
    %c0_148 = arith.constant 0 : index
    %c0_149 = arith.constant 0 : index
    %182 = vector.load %arg6[%c0_148, %c0_149] : memref<512x64xbf16, #tpu.memory_space<vmem>>, vector<512x64xbf16>
    %cst_150 = arith.constant dense<0.000000e+00> : vector<2x64xf32>
    %183 = tpu.matmul %181, %182, %cst_150 {dimension_numbers = #tpu.dot_dimension_numbers<[1], [0], [0], [1], [0, 0, 1, 1], [], []>} : vector<2x512xbf16>, vector<512x64xbf16>, vector<2x64xf32> -> vector<2x64xf32>
    %c0_151 = arith.constant 0 : index
    %c0_152 = arith.constant 0 : index
    %184 = vector.load %arg7[%c0_151, %c0_152] : memref<1x64xf32, #tpu.memory_space<vmem>>, vector<1x64xf32>
    %185 = vector.broadcast %184 : vector<1x64xf32> to vector<2x64xf32>
    %186 = arith.addf %183, %185 : vector<2x64xf32>
    %cst_153 = arith.constant 0.000000e+00 : f32
    %187 = vector.broadcast %cst_153 : f32 to vector<2x64xf32>
    %188 = arith.maximumf %186, %187 : vector<2x64xf32>
    %189 = arith.truncf %188 : vector<2x64xf32> to vector<2x64xbf16>
    %c0_154 = arith.constant 0 : index
    %c0_155 = arith.constant 0 : index
    %190 = vector.load %arg8[%c0_154, %c0_155] : memref<64x32xbf16, #tpu.memory_space<vmem>>, vector<64x32xbf16>
    %cst_156 = arith.constant dense<0.000000e+00> : vector<2x32xf32>
    %191 = tpu.matmul %189, %190, %cst_156 {dimension_numbers = #tpu.dot_dimension_numbers<[1], [0], [0], [1], [0, 0, 1, 1], [], []>} : vector<2x64xbf16>, vector<64x32xbf16>, vector<2x32xf32> -> vector<2x32xf32>
    %c0_157 = arith.constant 0 : index
    %c0_158 = arith.constant 0 : index
    %192 = vector.load %arg9[%c0_157, %c0_158] : memref<1x32xf32, #tpu.memory_space<vmem>>, vector<1x32xf32>
    %193 = vector.broadcast %192 : vector<1x32xf32> to vector<2x32xf32>
    %194 = arith.addf %191, %193 : vector<2x32xf32>
    %195 = vector.extract_strided_slice %194 {offsets = [0, 0], sizes = [2, 16], strides = [1, 1]} : vector<2x32xf32> to vector<2x16xf32>
    %196 = vector.extract_strided_slice %194 {offsets = [0, 16], sizes = [2, 16], strides = [1, 1]} : vector<2x32xf32> to vector<2x16xf32>
    %c0_159 = arith.constant 0 : index
    %c0_160 = arith.constant 0 : index
    %197 = vector.load %arg19[%c0_159, %c0_160] : memref<2x16xf32, #tpu.memory_space<vmem>>, vector<2x16xf32>
    tpu.vector_store %arg19[%c0_159, %c0_160], %195 {strides = array<i32>} : memref<2x16xf32, #tpu.memory_space<vmem>>, vector<2x16xf32>,
    %c0_161 = arith.constant 0 : index
    %c0_162 = arith.constant 0 : index
    %198 = vector.load %arg20[%c0_161, %c0_162] : memref<2x16xf32, #tpu.memory_space<vmem>>, vector<2x16xf32>
    tpu.vector_store %arg20[%c0_161, %c0_162], %196 {strides = array<i32>} : memref<2x16xf32, #tpu.memory_space<vmem>>, vector<2x16xf32>,
    %c0_163 = arith.constant 0 : index
    %c0_164 = arith.constant 0 : index
    %199 = vector.load %arg1[%c0_163, %c0_164] : memref<2x16xf32, #tpu.memory_space<vmem>>, vector<2x16xf32>
    %200 = math.exp %196 : vector<2x16xf32>
    %cst_165 = arith.constant 5.000000e-01 : f32
    %201 = vector.broadcast %cst_165 : f32 to vector<2x16xf32>
    %202 = arith.mulf %201, %200 : vector<2x16xf32>
    %203 = arith.mulf %199, %202 : vector<2x16xf32>
    %204 = arith.addf %195, %203 : vector<2x16xf32>
    %205 = arith.truncf %204 : vector<2x16xf32> to vector<2x16xbf16>
    %c0_166 = arith.constant 0 : index
    %c0_167 = arith.constant 0 : index
    %206 = vector.load %arg10[%c0_166, %c0_167] : memref<16x64xbf16, #tpu.memory_space<vmem>>, vector<16x64xbf16>
    %cst_168 = arith.constant dense<0.000000e+00> : vector<2x64xf32>
    %207 = tpu.matmul %205, %206, %cst_168 {dimension_numbers = #tpu.dot_dimension_numbers<[1], [0], [0], [1], [0, 0, 1, 1], [], []>} : vector<2x16xbf16>, vector<16x64xbf16>, vector<2x64xf32> -> vector<2x64xf32>
    %c0_169 = arith.constant 0 : index
    %c0_170 = arith.constant 0 : index
    %208 = vector.load %arg11[%c0_169, %c0_170] : memref<1x64xf32, #tpu.memory_space<vmem>>, vector<1x64xf32>
    %209 = vector.broadcast %208 : vector<1x64xf32> to vector<2x64xf32>
    %210 = arith.addf %207, %209 : vector<2x64xf32>
    %cst_171 = arith.constant 0.000000e+00 : f32
    %211 = vector.broadcast %cst_171 : f32 to vector<2x64xf32>
    %212 = arith.maximumf %210, %211 : vector<2x64xf32>
    %213 = arith.truncf %212 : vector<2x64xf32> to vector<2x64xbf16>
    %c0_172 = arith.constant 0 : index
    %c0_173 = arith.constant 0 : index
    %214 = vector.load %arg12[%c0_172, %c0_173] : memref<64x1024xbf16, #tpu.memory_space<vmem>>, vector<64x1024xbf16>
    %cst_174 = arith.constant dense<0.000000e+00> : vector<2x1024xf32>
    %215 = tpu.matmul %213, %214, %cst_174 {dimension_numbers = #tpu.dot_dimension_numbers<[1], [0], [0], [1], [0, 0, 1, 1], [], []>} : vector<2x64xbf16>, vector<64x1024xbf16>, vector<2x1024xf32> -> vector<2x1024xf32>
    %c0_175 = arith.constant 0 : index
    %c0_176 = arith.constant 0 : index
    %216 = vector.load %arg13[%c0_175, %c0_176] : memref<1x1024xf32, #tpu.memory_space<vmem>>, vector<1x1024xf32>
    %217 = vector.broadcast %216 : vector<1x1024xf32> to vector<2x1024xf32>
    %218 = arith.addf %215, %217 : vector<2x1024xf32>
    %cst_177 = arith.constant 0.000000e+00 : f32
    %219 = vector.broadcast %cst_177 : f32 to vector<2x1024xf32>
    %220 = arith.maximumf %218, %219 : vector<2x1024xf32>
    %221 = vector.extract_strided_slice %220 {offsets = [0, 0], sizes = [2, 256], strides = [1, 1]} : vector<2x1024xf32> to vector<2x256xf32>
    %222 = arith.truncf %221 : vector<2x256xf32> to vector<2x256xbf16>
    %c2_178 = arith.constant 2 : index
    %c32_179 = arith.constant 32 : index
    %223 = vector.load %arg22[%c2_178, %c32_179] : memref<20x320xbf16, #tpu.memory_space<vmem>>, vector<2x256xbf16>
    tpu.vector_store %arg22[%c2_178, %c32_179], %222 {strides = array<i32>} : memref<20x320xbf16, #tpu.memory_space<vmem>>, vector<2x256xbf16>,
    %c4_180 = arith.constant 4 : index
    %c32_181 = arith.constant 32 : index
    %224 = vector.load %arg22[%c4_180, %c32_181] : memref<20x320xbf16, #tpu.memory_space<vmem>>, vector<2x256xbf16>
    tpu.vector_store %arg22[%c4_180, %c32_181], %222 {strides = array<i32>} : memref<20x320xbf16, #tpu.memory_space<vmem>>, vector<2x256xbf16>,
    %225 = vector.extract_strided_slice %220 {offsets = [0, 256], sizes = [2, 256], strides = [1, 1]} : vector<2x1024xf32> to vector<2x256xf32>
    %226 = arith.truncf %225 : vector<2x256xf32> to vector<2x256xbf16>
    %c6_182 = arith.constant 6 : index
    %c32_183 = arith.constant 32 : index
    %227 = vector.load %arg22[%c6_182, %c32_183] : memref<20x320xbf16, #tpu.memory_space<vmem>>, vector<2x256xbf16>
    tpu.vector_store %arg22[%c6_182, %c32_183], %226 {strides = array<i32>} : memref<20x320xbf16, #tpu.memory_space<vmem>>, vector<2x256xbf16>,
    %c8_184 = arith.constant 8 : index
    %c32_185 = arith.constant 32 : index
    %228 = vector.load %arg22[%c8_184, %c32_185] : memref<20x320xbf16, #tpu.memory_space<vmem>>, vector<2x256xbf16>
    tpu.vector_store %arg22[%c8_184, %c32_185], %226 {strides = array<i32>} : memref<20x320xbf16, #tpu.memory_space<vmem>>, vector<2x256xbf16>,
    %229 = vector.extract_strided_slice %220 {offsets = [0, 512], sizes = [2, 256], strides = [1, 1]} : vector<2x1024xf32> to vector<2x256xf32>
    %230 = arith.truncf %229 : vector<2x256xf32> to vector<2x256xbf16>
    %c10_186 = arith.constant 10 : index
    %c32_187 = arith.constant 32 : index
    %231 = vector.load %arg22[%c10_186, %c32_187] : memref<20x320xbf16, #tpu.memory_space<vmem>>, vector<2x256xbf16>
    tpu.vector_store %arg22[%c10_186, %c32_187], %230 {strides = array<i32>} : memref<20x320xbf16, #tpu.memory_space<vmem>>, vector<2x256xbf16>,
    %c12_188 = arith.constant 12 : index
    %c32_189 = arith.constant 32 : index
    %232 = vector.load %arg22[%c12_188, %c32_189] : memref<20x320xbf16, #tpu.memory_space<vmem>>, vector<2x256xbf16>
    tpu.vector_store %arg22[%c12_188, %c32_189], %230 {strides = array<i32>} : memref<20x320xbf16, #tpu.memory_space<vmem>>, vector<2x256xbf16>,
    %233 = vector.extract_strided_slice %220 {offsets = [0, 768], sizes = [2, 256], strides = [1, 1]} : vector<2x1024xf32> to vector<2x256xf32>
    %234 = arith.truncf %233 : vector<2x256xf32> to vector<2x256xbf16>
    %c14_190 = arith.constant 14 : index
    %c32_191 = arith.constant 32 : index
    %235 = vector.load %arg22[%c14_190, %c32_191] : memref<20x320xbf16, #tpu.memory_space<vmem>>, vector<2x256xbf16>
    tpu.vector_store %arg22[%c14_190, %c32_191], %234 {strides = array<i32>} : memref<20x320xbf16, #tpu.memory_space<vmem>>, vector<2x256xbf16>,
    %c16_192 = arith.constant 16 : index
    %c32_193 = arith.constant 32 : index
    %236 = vector.load %arg22[%c16_192, %c32_193] : memref<20x320xbf16, #tpu.memory_space<vmem>>, vector<2x256xbf16>
    tpu.vector_store %arg22[%c16_192, %c32_193], %234 {strides = array<i32>} : memref<20x320xbf16, #tpu.memory_space<vmem>>, vector<2x256xbf16>,
    %c0_194 = arith.constant 0 : index
    %c0_195 = arith.constant 0 : index
    %237 = vector.load %arg22[%c0_194, %c0_195] : memref<20x320xbf16, #tpu.memory_space<vmem>>, vector<16x320xbf16>
    %c0_196 = arith.constant 0 : index
    %c0_197 = arith.constant 0 : index
    %c0_198 = arith.constant 0 : index
    %238 = vector.load %arg14[%c0_196, %c0_197, %c0_198] : memref<3x320x256xbf16, #tpu.memory_space<vmem>>, vector<1x320x256xbf16>
    %239 = vector.shape_cast %238 : vector<1x320x256xbf16> to vector<320x256xbf16>
    %cst_199 = arith.constant dense<0.000000e+00> : vector<16x256xf32>
    %240 = tpu.matmul %237, %239, %cst_199 {dimension_numbers = #tpu.dot_dimension_numbers<[1], [0], [0], [1], [0, 0, 1, 1], [], []>} : vector<16x320xbf16>, vector<320x256xbf16>, vector<16x256xf32> -> vector<16x256xf32>
    %c2_200 = arith.constant 2 : index
    %c0_201 = arith.constant 0 : index
    %241 = vector.load %arg22[%c2_200, %c0_201] : memref<20x320xbf16, #tpu.memory_space<vmem>>, vector<16x320xbf16>
    %c1_202 = arith.constant 1 : index
    %c0_203 = arith.constant 0 : index
    %c0_204 = arith.constant 0 : index
    %242 = vector.load %arg14[%c1_202, %c0_203, %c0_204] : memref<3x320x256xbf16, #tpu.memory_space<vmem>>, vector<1x320x256xbf16>
    %243 = vector.shape_cast %242 : vector<1x320x256xbf16> to vector<320x256xbf16>
    %cst_205 = arith.constant dense<0.000000e+00> : vector<16x256xf32>
    %244 = tpu.matmul %241, %243, %cst_205 {dimension_numbers = #tpu.dot_dimension_numbers<[1], [0], [0], [1], [0, 0, 1, 1], [], []>} : vector<16x320xbf16>, vector<320x256xbf16>, vector<16x256xf32> -> vector<16x256xf32>
    %245 = arith.addf %240, %244 : vector<16x256xf32>
    %c4_206 = arith.constant 4 : index
    %c0_207 = arith.constant 0 : index
    %246 = vector.load %arg22[%c4_206, %c0_207] : memref<20x320xbf16, #tpu.memory_space<vmem>>, vector<16x320xbf16>
    %c2_208 = arith.constant 2 : index
    %c0_209 = arith.constant 0 : index
    %c0_210 = arith.constant 0 : index
    %247 = vector.load %arg14[%c2_208, %c0_209, %c0_210] : memref<3x320x256xbf16, #tpu.memory_space<vmem>>, vector<1x320x256xbf16>
    %248 = vector.shape_cast %247 : vector<1x320x256xbf16> to vector<320x256xbf16>
    %cst_211 = arith.constant dense<0.000000e+00> : vector<16x256xf32>
    %249 = tpu.matmul %246, %248, %cst_211 {dimension_numbers = #tpu.dot_dimension_numbers<[1], [0], [0], [1], [0, 0, 1, 1], [], []>} : vector<16x320xbf16>, vector<320x256xbf16>, vector<16x256xf32> -> vector<16x256xf32>
    %250 = arith.addf %245, %249 : vector<16x256xf32>
    %c0_212 = arith.constant 0 : index
    %c0_213 = arith.constant 0 : index
    %251 = vector.load %arg15[%c0_212, %c0_213] : memref<1x256xf32, #tpu.memory_space<vmem>>, vector<1x256xf32>
    %252 = vector.broadcast %251 : vector<1x256xf32> to vector<16x256xf32>
    %253 = arith.addf %250, %252 : vector<16x256xf32>
    %cst_214 = arith.constant 0.000000e+00 : f32
    %254 = vector.broadcast %cst_214 : f32 to vector<16x256xf32>
    %255 = arith.maximumf %253, %254 : vector<16x256xf32>
    %256 = vector.extract_strided_slice %255 {offsets = [0, 0], sizes = [2, 256], strides = [1, 1]} : vector<16x256xf32> to vector<2x256xf32>
    %257 = arith.truncf %256 : vector<2x256xf32> to vector<2x256xbf16>
    %c2_215 = arith.constant 2 : index
    %c16_216 = arith.constant 16 : index
    %258 = vector.load %arg23[%c2_215, %c16_216] : memref<36x288xbf16, #tpu.memory_space<vmem>>, vector<2x256xbf16>
    tpu.vector_store %arg23[%c2_215, %c16_216], %257 {strides = array<i32>} : memref<36x288xbf16, #tpu.memory_space<vmem>>, vector<2x256xbf16>,
    %c4_217 = arith.constant 4 : index
    %c16_218 = arith.constant 16 : index
    %259 = vector.load %arg23[%c4_217, %c16_218] : memref<36x288xbf16, #tpu.memory_space<vmem>>, vector<2x256xbf16>
    tpu.vector_store %arg23[%c4_217, %c16_218], %257 {strides = array<i32>} : memref<36x288xbf16, #tpu.memory_space<vmem>>, vector<2x256xbf16>,
    %260 = vector.extract_strided_slice %255 {offsets = [2, 0], sizes = [2, 256], strides = [1, 1]} : vector<16x256xf32> to vector<2x256xf32>
    %261 = arith.truncf %260 : vector<2x256xf32> to vector<2x256xbf16>
    %c6_219 = arith.constant 6 : index
    %c16_220 = arith.constant 16 : index
    %262 = vector.load %arg23[%c6_219, %c16_220] : memref<36x288xbf16, #tpu.memory_space<vmem>>, vector<2x256xbf16>
    tpu.vector_store %arg23[%c6_219, %c16_220], %261 {strides = array<i32>} : memref<36x288xbf16, #tpu.memory_space<vmem>>, vector<2x256xbf16>,
    %c8_221 = arith.constant 8 : index
    %c16_222 = arith.constant 16 : index
    %263 = vector.load %arg23[%c8_221, %c16_222] : memref<36x288xbf16, #tpu.memory_space<vmem>>, vector<2x256xbf16>
    tpu.vector_store %arg23[%c8_221, %c16_222], %261 {strides = array<i32>} : memref<36x288xbf16, #tpu.memory_space<vmem>>, vector<2x256xbf16>,
    %264 = vector.extract_strided_slice %255 {offsets = [4, 0], sizes = [2, 256], strides = [1, 1]} : vector<16x256xf32> to vector<2x256xf32>
    %265 = arith.truncf %264 : vector<2x256xf32> to vector<2x256xbf16>
    %c10_223 = arith.constant 10 : index
    %c16_224 = arith.constant 16 : index
    %266 = vector.load %arg23[%c10_223, %c16_224] : memref<36x288xbf16, #tpu.memory_space<vmem>>, vector<2x256xbf16>
    tpu.vector_store %arg23[%c10_223, %c16_224], %265 {strides = array<i32>} : memref<36x288xbf16, #tpu.memory_space<vmem>>, vector<2x256xbf16>,
    %c12_225 = arith.constant 12 : index
    %c16_226 = arith.constant 16 : index
    %267 = vector.load %arg23[%c12_225, %c16_226] : memref<36x288xbf16, #tpu.memory_space<vmem>>, vector<2x256xbf16>
    tpu.vector_store %arg23[%c12_225, %c16_226], %265 {strides = array<i32>} : memref<36x288xbf16, #tpu.memory_space<vmem>>, vector<2x256xbf16>,
    %268 = vector.extract_strided_slice %255 {offsets = [6, 0], sizes = [2, 256], strides = [1, 1]} : vector<16x256xf32> to vector<2x256xf32>
    %269 = arith.truncf %268 : vector<2x256xf32> to vector<2x256xbf16>
    %c14_227 = arith.constant 14 : index
    %c16_228 = arith.constant 16 : index
    %270 = vector.load %arg23[%c14_227, %c16_228] : memref<36x288xbf16, #tpu.memory_space<vmem>>, vector<2x256xbf16>
    tpu.vector_store %arg23[%c14_227, %c16_228], %269 {strides = array<i32>} : memref<36x288xbf16, #tpu.memory_space<vmem>>, vector<2x256xbf16>,
    %c16_229 = arith.constant 16 : index
    %c16_230 = arith.constant 16 : index
    %271 = vector.load %arg23[%c16_229, %c16_230] : memref<36x288xbf16, #tpu.memory_space<vmem>>, vector<2x256xbf16>
    tpu.vector_store %arg23[%c16_229, %c16_230], %269 {strides = array<i32>} : memref<36x288xbf16, #tpu.memory_space<vmem>>, vector<2x256xbf16>,
    %272 = vector.extract_strided_slice %255 {offsets = [8, 0], sizes = [2, 256], strides = [1, 1]} : vector<16x256xf32> to vector<2x256xf32>
    %273 = arith.truncf %272 : vector<2x256xf32> to vector<2x256xbf16>
    %c18_231 = arith.constant 18 : index
    %c16_232 = arith.constant 16 : index
    %274 = vector.load %arg23[%c18_231, %c16_232] : memref<36x288xbf16, #tpu.memory_space<vmem>>, vector<2x256xbf16>
    tpu.vector_store %arg23[%c18_231, %c16_232], %273 {strides = array<i32>} : memref<36x288xbf16, #tpu.memory_space<vmem>>, vector<2x256xbf16>,
    %c20_233 = arith.constant 20 : index
    %c16_234 = arith.constant 16 : index
    %275 = vector.load %arg23[%c20_233, %c16_234] : memref<36x288xbf16, #tpu.memory_space<vmem>>, vector<2x256xbf16>
    tpu.vector_store %arg23[%c20_233, %c16_234], %273 {strides = array<i32>} : memref<36x288xbf16, #tpu.memory_space<vmem>>, vector<2x256xbf16>,
    %276 = vector.extract_strided_slice %255 {offsets = [10, 0], sizes = [2, 256], strides = [1, 1]} : vector<16x256xf32> to vector<2x256xf32>
    %277 = arith.truncf %276 : vector<2x256xf32> to vector<2x256xbf16>
    %c22_235 = arith.constant 22 : index
    %c16_236 = arith.constant 16 : index
    %278 = vector.load %arg23[%c22_235, %c16_236] : memref<36x288xbf16, #tpu.memory_space<vmem>>, vector<2x256xbf16>
    tpu.vector_store %arg23[%c22_235, %c16_236], %277 {strides = array<i32>} : memref<36x288xbf16, #tpu.memory_space<vmem>>, vector<2x256xbf16>,
    %c24_237 = arith.constant 24 : index
    %c16_238 = arith.constant 16 : index
    %279 = vector.load %arg23[%c24_237, %c16_238] : memref<36x288xbf16, #tpu.memory_space<vmem>>, vector<2x256xbf16>
    tpu.vector_store %arg23[%c24_237, %c16_238], %277 {strides = array<i32>} : memref<36x288xbf16, #tpu.memory_space<vmem>>, vector<2x256xbf16>,
    %280 = vector.extract_strided_slice %255 {offsets = [12, 0], sizes = [2, 256], strides = [1, 1]} : vector<16x256xf32> to vector<2x256xf32>
    %281 = arith.truncf %280 : vector<2x256xf32> to vector<2x256xbf16>
    %c26_239 = arith.constant 26 : index
    %c16_240 = arith.constant 16 : index
    %282 = vector.load %arg23[%c26_239, %c16_240] : memref<36x288xbf16, #tpu.memory_space<vmem>>, vector<2x256xbf16>
    tpu.vector_store %arg23[%c26_239, %c16_240], %281 {strides = array<i32>} : memref<36x288xbf16, #tpu.memory_space<vmem>>, vector<2x256xbf16>,
    %c28_241 = arith.constant 28 : index
    %c16_242 = arith.constant 16 : index
    %283 = vector.load %arg23[%c28_241, %c16_242] : memref<36x288xbf16, #tpu.memory_space<vmem>>, vector<2x256xbf16>
    tpu.vector_store %arg23[%c28_241, %c16_242], %281 {strides = array<i32>} : memref<36x288xbf16, #tpu.memory_space<vmem>>, vector<2x256xbf16>,
    %284 = vector.extract_strided_slice %255 {offsets = [14, 0], sizes = [2, 256], strides = [1, 1]} : vector<16x256xf32> to vector<2x256xf32>
    %285 = arith.truncf %284 : vector<2x256xf32> to vector<2x256xbf16>
    %c30_243 = arith.constant 30 : index
    %c16_244 = arith.constant 16 : index
    %286 = vector.load %arg23[%c30_243, %c16_244] : memref<36x288xbf16, #tpu.memory_space<vmem>>, vector<2x256xbf16>
    tpu.vector_store %arg23[%c30_243, %c16_244], %285 {strides = array<i32>} : memref<36x288xbf16, #tpu.memory_space<vmem>>, vector<2x256xbf16>,
    %c32_245 = arith.constant 32 : index
    %c16_246 = arith.constant 16 : index
    %287 = vector.load %arg23[%c32_245, %c16_246] : memref<36x288xbf16, #tpu.memory_space<vmem>>, vector<2x256xbf16>
    tpu.vector_store %arg23[%c32_245, %c16_246], %285 {strides = array<i32>} : memref<36x288xbf16, #tpu.memory_space<vmem>>, vector<2x256xbf16>,
    %c0_247 = arith.constant 0 : index
    %c0_248 = arith.constant 0 : index
    %288 = vector.load %arg23[%c0_247, %c0_248] : memref<36x288xbf16, #tpu.memory_space<vmem>>, vector<32x288xbf16>
    %c0_249 = arith.constant 0 : index
    %c0_250 = arith.constant 0 : index
    %c0_251 = arith.constant 0 : index
    %289 = vector.load %arg16[%c0_249, %c0_250, %c0_251] : memref<3x288x64xbf16, #tpu.memory_space<vmem>>, vector<1x288x64xbf16>
    %290 = vector.shape_cast %289 : vector<1x288x64xbf16> to vector<288x64xbf16>
    %cst_252 = arith.constant dense<0.000000e+00> : vector<32x64xf32>
    %291 = tpu.matmul %288, %290, %cst_252 {dimension_numbers = #tpu.dot_dimension_numbers<[1], [0], [0], [1], [0, 0, 1, 1], [], []>} : vector<32x288xbf16>, vector<288x64xbf16>, vector<32x64xf32> -> vector<32x64xf32>
    %c2_253 = arith.constant 2 : index
    %c0_254 = arith.constant 0 : index
    %292 = vector.load %arg23[%c2_253, %c0_254] : memref<36x288xbf16, #tpu.memory_space<vmem>>, vector<32x288xbf16>
    %c1_255 = arith.constant 1 : index
    %c0_256 = arith.constant 0 : index
    %c0_257 = arith.constant 0 : index
    %293 = vector.load %arg16[%c1_255, %c0_256, %c0_257] : memref<3x288x64xbf16, #tpu.memory_space<vmem>>, vector<1x288x64xbf16>
    %294 = vector.shape_cast %293 : vector<1x288x64xbf16> to vector<288x64xbf16>
    %cst_258 = arith.constant dense<0.000000e+00> : vector<32x64xf32>
    %295 = tpu.matmul %292, %294, %cst_258 {dimension_numbers = #tpu.dot_dimension_numbers<[1], [0], [0], [1], [0, 0, 1, 1], [], []>} : vector<32x288xbf16>, vector<288x64xbf16>, vector<32x64xf32> -> vector<32x64xf32>
    %296 = arith.addf %291, %295 : vector<32x64xf32>
    %c4_259 = arith.constant 4 : index
    %c0_260 = arith.constant 0 : index
    %297 = vector.load %arg23[%c4_259, %c0_260] : memref<36x288xbf16, #tpu.memory_space<vmem>>, vector<32x288xbf16>
    %c2_261 = arith.constant 2 : index
    %c0_262 = arith.constant 0 : index
    %c0_263 = arith.constant 0 : index
    %298 = vector.load %arg16[%c2_261, %c0_262, %c0_263] : memref<3x288x64xbf16, #tpu.memory_space<vmem>>, vector<1x288x64xbf16>
    %299 = vector.shape_cast %298 : vector<1x288x64xbf16> to vector<288x64xbf16>
    %cst_264 = arith.constant dense<0.000000e+00> : vector<32x64xf32>
    %300 = tpu.matmul %297, %299, %cst_264 {dimension_numbers = #tpu.dot_dimension_numbers<[1], [0], [0], [1], [0, 0, 1, 1], [], []>} : vector<32x288xbf16>, vector<288x64xbf16>, vector<32x64xf32> -> vector<32x64xf32>
    %301 = arith.addf %296, %300 : vector<32x64xf32>
    %c0_265 = arith.constant 0 : index
    %c0_266 = arith.constant 0 : index
    %302 = vector.load %arg17[%c0_265, %c0_266] : memref<1x64xf32, #tpu.memory_space<vmem>>, vector<1x64xf32>
    %303 = vector.broadcast %302 : vector<1x64xf32> to vector<32x64xf32>
    %304 = arith.addf %301, %303 : vector<32x64xf32>
    %cst_267 = arith.constant 0.000000e+00 : f32
    %305 = vector.broadcast %cst_267 : f32 to vector<32x64xf32>
    %306 = arith.subf %305, %304 : vector<32x64xf32>
    %307 = math.exp %306 : vector<32x64xf32>
    %cst_268 = arith.constant 1.000000e+00 : f32
    %308 = vector.broadcast %cst_268 : f32 to vector<32x64xf32>
    %309 = arith.addf %308, %307 : vector<32x64xf32>
    %cst_269 = arith.constant 1.000000e+00 : f32
    %310 = vector.broadcast %cst_269 : f32 to vector<32x64xf32>
    %311 = arith.divf %310, %309 : vector<32x64xf32>
    %312 = vector.extract_strided_slice %311 {offsets = [0, 0], sizes = [2, 64], strides = [1, 1]} : vector<32x64xf32> to vector<2x64xf32>
    %c0_270 = arith.constant 0 : index
    %c0_271 = arith.constant 0 : index
    %313 = vector.load %arg18[%c0_270, %c0_271] : memref<2x1024xf32, #tpu.memory_space<vmem>>, vector<2x64xf32>
    tpu.vector_store %arg18[%c0_270, %c0_271], %312 {strides = array<i32>} : memref<2x1024xf32, #tpu.memory_space<vmem>>, vector<2x64xf32>,
    %314 = vector.extract_strided_slice %311 {offsets = [2, 0], sizes = [2, 64], strides = [1, 1]} : vector<32x64xf32> to vector<2x64xf32>
    %c0_272 = arith.constant 0 : index
    %c64 = arith.constant 64 : index
    %315 = vector.load %arg18[%c0_272, %c64] : memref<2x1024xf32, #tpu.memory_space<vmem>>, vector<2x64xf32>
    tpu.vector_store %arg18[%c0_272, %c64], %314 {strides = array<i32>} : memref<2x1024xf32, #tpu.memory_space<vmem>>, vector<2x64xf32>,
    %316 = vector.extract_strided_slice %311 {offsets = [4, 0], sizes = [2, 64], strides = [1, 1]} : vector<32x64xf32> to vector<2x64xf32>
    %c0_273 = arith.constant 0 : index
    %c128 = arith.constant 128 : index
    %317 = vector.load %arg18[%c0_273, %c128] : memref<2x1024xf32, #tpu.memory_space<vmem>>, vector<2x64xf32>
    tpu.vector_store %arg18[%c0_273, %c128], %316 {strides = array<i32>} : memref<2x1024xf32, #tpu.memory_space<vmem>>, vector<2x64xf32>,
    %318 = vector.extract_strided_slice %311 {offsets = [6, 0], sizes = [2, 64], strides = [1, 1]} : vector<32x64xf32> to vector<2x64xf32>
    %c0_274 = arith.constant 0 : index
    %c192 = arith.constant 192 : index
    %319 = vector.load %arg18[%c0_274, %c192] : memref<2x1024xf32, #tpu.memory_space<vmem>>, vector<2x64xf32>
    tpu.vector_store %arg18[%c0_274, %c192], %318 {strides = array<i32>} : memref<2x1024xf32, #tpu.memory_space<vmem>>, vector<2x64xf32>,
    %320 = vector.extract_strided_slice %311 {offsets = [8, 0], sizes = [2, 64], strides = [1, 1]} : vector<32x64xf32> to vector<2x64xf32>
    %c0_275 = arith.constant 0 : index
    %c256 = arith.constant 256 : index
    %321 = vector.load %arg18[%c0_275, %c256] : memref<2x1024xf32, #tpu.memory_space<vmem>>, vector<2x64xf32>
    tpu.vector_store %arg18[%c0_275, %c256], %320 {strides = array<i32>} : memref<2x1024xf32, #tpu.memory_space<vmem>>, vector<2x64xf32>,
    %322 = vector.extract_strided_slice %311 {offsets = [10, 0], sizes = [2, 64], strides = [1, 1]} : vector<32x64xf32> to vector<2x64xf32>
    %c0_276 = arith.constant 0 : index
    %c320 = arith.constant 320 : index
    %323 = vector.load %arg18[%c0_276, %c320] : memref<2x1024xf32, #tpu.memory_space<vmem>>, vector<2x64xf32>
    tpu.vector_store %arg18[%c0_276, %c320], %322 {strides = array<i32>} : memref<2x1024xf32, #tpu.memory_space<vmem>>, vector<2x64xf32>,
    %324 = vector.extract_strided_slice %311 {offsets = [12, 0], sizes = [2, 64], strides = [1, 1]} : vector<32x64xf32> to vector<2x64xf32>
    %c0_277 = arith.constant 0 : index
    %c384 = arith.constant 384 : index
    %325 = vector.load %arg18[%c0_277, %c384] : memref<2x1024xf32, #tpu.memory_space<vmem>>, vector<2x64xf32>
    tpu.vector_store %arg18[%c0_277, %c384], %324 {strides = array<i32>} : memref<2x1024xf32, #tpu.memory_space<vmem>>, vector<2x64xf32>,
    %326 = vector.extract_strided_slice %311 {offsets = [14, 0], sizes = [2, 64], strides = [1, 1]} : vector<32x64xf32> to vector<2x64xf32>
    %c0_278 = arith.constant 0 : index
    %c448 = arith.constant 448 : index
    %327 = vector.load %arg18[%c0_278, %c448] : memref<2x1024xf32, #tpu.memory_space<vmem>>, vector<2x64xf32>
    tpu.vector_store %arg18[%c0_278, %c448], %326 {strides = array<i32>} : memref<2x1024xf32, #tpu.memory_space<vmem>>, vector<2x64xf32>,
    %328 = vector.extract_strided_slice %311 {offsets = [16, 0], sizes = [2, 64], strides = [1, 1]} : vector<32x64xf32> to vector<2x64xf32>
    %c0_279 = arith.constant 0 : index
    %c512 = arith.constant 512 : index
    %329 = vector.load %arg18[%c0_279, %c512] : memref<2x1024xf32, #tpu.memory_space<vmem>>, vector<2x64xf32>
    tpu.vector_store %arg18[%c0_279, %c512], %328 {strides = array<i32>} : memref<2x1024xf32, #tpu.memory_space<vmem>>, vector<2x64xf32>,
    %330 = vector.extract_strided_slice %311 {offsets = [18, 0], sizes = [2, 64], strides = [1, 1]} : vector<32x64xf32> to vector<2x64xf32>
    %c0_280 = arith.constant 0 : index
    %c576 = arith.constant 576 : index
    %331 = vector.load %arg18[%c0_280, %c576] : memref<2x1024xf32, #tpu.memory_space<vmem>>, vector<2x64xf32>
    tpu.vector_store %arg18[%c0_280, %c576], %330 {strides = array<i32>} : memref<2x1024xf32, #tpu.memory_space<vmem>>, vector<2x64xf32>,
    %332 = vector.extract_strided_slice %311 {offsets = [20, 0], sizes = [2, 64], strides = [1, 1]} : vector<32x64xf32> to vector<2x64xf32>
    %c0_281 = arith.constant 0 : index
    %c640 = arith.constant 640 : index
    %333 = vector.load %arg18[%c0_281, %c640] : memref<2x1024xf32, #tpu.memory_space<vmem>>, vector<2x64xf32>
    tpu.vector_store %arg18[%c0_281, %c640], %332 {strides = array<i32>} : memref<2x1024xf32, #tpu.memory_space<vmem>>, vector<2x64xf32>,
    %334 = vector.extract_strided_slice %311 {offsets = [22, 0], sizes = [2, 64], strides = [1, 1]} : vector<32x64xf32> to vector<2x64xf32>
    %c0_282 = arith.constant 0 : index
    %c704 = arith.constant 704 : index
    %335 = vector.load %arg18[%c0_282, %c704] : memref<2x1024xf32, #tpu.memory_space<vmem>>, vector<2x64xf32>
    tpu.vector_store %arg18[%c0_282, %c704], %334 {strides = array<i32>} : memref<2x1024xf32, #tpu.memory_space<vmem>>, vector<2x64xf32>,
    %336 = vector.extract_strided_slice %311 {offsets = [24, 0], sizes = [2, 64], strides = [1, 1]} : vector<32x64xf32> to vector<2x64xf32>
    %c0_283 = arith.constant 0 : index
    %c768 = arith.constant 768 : index
    %337 = vector.load %arg18[%c0_283, %c768] : memref<2x1024xf32, #tpu.memory_space<vmem>>, vector<2x64xf32>
    tpu.vector_store %arg18[%c0_283, %c768], %336 {strides = array<i32>} : memref<2x1024xf32, #tpu.memory_space<vmem>>, vector<2x64xf32>,
    %338 = vector.extract_strided_slice %311 {offsets = [26, 0], sizes = [2, 64], strides = [1, 1]} : vector<32x64xf32> to vector<2x64xf32>
    %c0_284 = arith.constant 0 : index
    %c832 = arith.constant 832 : index
    %339 = vector.load %arg18[%c0_284, %c832] : memref<2x1024xf32, #tpu.memory_space<vmem>>, vector<2x64xf32>
    tpu.vector_store %arg18[%c0_284, %c832], %338 {strides = array<i32>} : memref<2x1024xf32, #tpu.memory_space<vmem>>, vector<2x64xf32>,
    %340 = vector.extract_strided_slice %311 {offsets = [28, 0], sizes = [2, 64], strides = [1, 1]} : vector<32x64xf32> to vector<2x64xf32>
    %c0_285 = arith.constant 0 : index
    %c896 = arith.constant 896 : index
    %341 = vector.load %arg18[%c0_285, %c896] : memref<2x1024xf32, #tpu.memory_space<vmem>>, vector<2x64xf32>
    tpu.vector_store %arg18[%c0_285, %c896], %340 {strides = array<i32>} : memref<2x1024xf32, #tpu.memory_space<vmem>>, vector<2x64xf32>,
    %342 = vector.extract_strided_slice %311 {offsets = [30, 0], sizes = [2, 64], strides = [1, 1]} : vector<32x64xf32> to vector<2x64xf32>
    %c0_286 = arith.constant 0 : index
    %c960 = arith.constant 960 : index
    %343 = vector.load %arg18[%c0_286, %c960] : memref<2x1024xf32, #tpu.memory_space<vmem>>, vector<2x64xf32>
    tpu.vector_store %arg18[%c0_286, %c960], %342 {strides = array<i32>} : memref<2x1024xf32, #tpu.memory_space<vmem>>, vector<2x64xf32>,
    return
  }
}

</mosaic_0001>

<bundles_post_ra>
// kernel: vae_forward.1
= control target key start
LH: loop header
LB: loop body
LE: loop exit
PB: predicated region body
PF: predicated region fallthrough
CT: control target
= control target key end

     0   :  { %s9762_s0 = inlined_call_operand.vmem [shape: bf16[36,72], index: 0, kind: input, shape index: {}]   ;;  %s9763_s1 = inlined_call_operand.vmem [shape: f32[2,16], index: 1, kind: input, shape index: {}]   ;;  %s9764_s2 = inlined_call_operand.vmem [shape: bf16[3,72,128], index: 2, kind: input, shape index: {}]   ;;  %s9765_s3 = inlined_call_operand.vmem [shape: f32[1,128], index: 3, kind: input, shape index: {}]   ;;  %s9766_s4 = inlined_call_operand.vmem [shape: bf16[3,160,128], index: 4, kind: input, shape index: {}]   ;;  %s9767_s5 = inlined_call_operand.vmem [shape: f32[1,128], index: 5, kind: input, shape index: {}]   ;;  %s9768_s6 = inlined_call_operand.vmem [shape: bf16[512,64], index: 6, kind: input, shape index: {}]   ;;  %s9769_s7 = inlined_call_operand.vmem [shape: f32[1,64], index: 7, kind: input, shape index: {}]   ;;  %s9770_s8 = inlined_call_operand.vmem [shape: bf16[64,32], index: 8, kind: input, shape index: {}]   ;;  %s9771_s9 = inlined_call_operand.vmem [shape: f32[1,32], index: 9, kind: input, shape index: {}]   ;;  %s9772_s10 = inlined_call_operand.vmem [shape: bf16[16,64], index: 10, kind: input, shape index: {}]   ;;  %s9773_s11 = inlined_call_operand.vmem [shape: f32[1,64], index: 11, kind: input, shape index: {}]   ;;  %s9774_s12 = inlined_call_operand.vmem [shape: bf16[64,1024], index: 12, kind: input, shape index: {}]   ;;  %s9775_s13 = inlined_call_operand.vmem [shape: f32[1,1024], index: 13, kind: input, shape index: {}]   ;;  %s9776_s14 = inlined_call_operand.vmem [shape: bf16[3,320,256], index: 14, kind: input, shape index: {}]   ;;  %s9777_s15 = inlined_call_operand.vmem [shape: f32[1,256], index: 15, kind: input, shape index: {}]   ;;  %s9778_s16 = inlined_call_operand.vmem [shape: bf16[3,288,64], index: 16, kind: input, shape index: {}]   ;;  %s9779_s17 = inlined_call_operand.vmem [shape: f32[1,64], index: 17, kind: input, shape index: {}]   ;;  %s9780_s18 = inlined_call_operand.vmem [shape: f32[2,1024], index: 18, kind: output, shape index: {0}]   ;;  %s9781_s19 = inlined_call_operand.hbm [shape: f32[2,16], index: 19, kind: output, shape index: {1}]   ;;  %s9782_s20 = inlined_call_operand.hbm [shape: f32[2,16], index: 20, kind: output, shape index: {2}]  }
   0x1   :  { %9793 = sst [smem:[#allocation11_spill]] %s9762_s0 }
   0x2   :  { %9794 = sst [smem:[#allocation12_spill]] %s9763_s1 }
   0x3   :  { %9795 = sst [smem:[#allocation13_spill]] %s9764_s2 }
   0x4   :  { %9796 = sst [smem:[#allocation14_spill]] %s9765_s3 }
   0x5   :  { %9797 = sst [smem:[#allocation15_spill]] %s9766_s4 }
   0x6   :  { %26 = vsyncpa [#allocation6], 0  ;;  %s9798_s23 = sld [smem:[#allocation13_spill]]  ;;  %v7445_v1 = vmov 0.0   ;;  %vm7446_vm0 = vmmov 0   ;;  %vm65_vm1 = vcmask 1043456  }
   0x7   :  { %6556 = vmatprep.subr.bf16.mxu0 %v7445_v1  ;;  %6570 = vmatprep.subr.bf16.mxu1 %v7445_v1  ;;  %s9799_s26 = sld [smem:[#allocation11_spill]]  ;;  %vm157_vm2 = vcmask 588800  }
   0x8   :  { %6566 = vmatprep.mubr.msk.bf16.mxu0 %vm7446_vm0, %v7445_v1  ;;  %6580 = vmatprep.mubr.msk.bf16.mxu1 %vm7446_vm0, %v7445_v1 }
   0xc   :  { %v7563_v0 = vld [vmem:[%s9798_s23 + $0x24] sm:$0xff]   ;;  %v7576_v3 = vld [vmem:[%s9798_s23 + $0x2c] sm:$0xff]   ;;  %v7594_v5 = vld [vmem:[%s9798_s23 + $0x34] sm:$0xff]  }
   0xd   :  { %v7570_v2 = vld [vmem:[%s9798_s23] sm:$0xff]   ;;  %6557 = vmatpush3.bf16.msra.mxu0 %v7563_v0  ;;  %v7583_v4 = vld [vmem:[%s9798_s23 + $0x8] sm:$0xff]   ;;  %v7601_v6 = vld [vmem:[%s9798_s23 + $0x10] sm:$0xff]  }
   0xe   :  { %6571 = vmatpush3.bf16.msra.mxu1 %v7570_v2  ;;  %6558 = vmatprep.subr.bf16.mxu0 %v7445_v1  ;;  %v7608_v7 = vld [vmem:[%s9798_s23 + $0x3c] sm:$0xff]   ;;  %v6992_v9 = vld [vmem:[%s9798_s23 + $0x44] ss:$0 sps:$4 sm:$0xff]   ;;  %v7641_v15 = vld [vmem:[%s9798_s23 + $0x48] sm:$0xff]  }
   0xf   :  { %6572 = vmatprep.subr.bf16.mxu1 %v7445_v1  ;;  %v7613_v8 = vld [vmem:[%s9798_s23 + $0x18] sm:$0xff]   ;;  %v6994_v10 = vld [vmem:[%s9799_s26] ss:$0 sps:$4 sm:$0x22]   ;;  %v7631_v12 = vsel %vm65_vm1, %v6992_v9, 0  ;;  %v7655_v17 = vld [vmem:[%s9798_s23 + $0x50] sm:$0xff]  }
  0x10   :  { %v6993_v11 = vld [vmem:[%s9798_s23 + $0x20] ss:$0 sps:$4 sm:$0xff]   ;;  %v129_v14 = vrot.slane %v6994_v10, 1  ;;  %v7663_v18 = vld [vmem:[%s9798_s23 + $0x58] sm:$0xff]   ;;  %v6999_v19 = vld [vmem:[%s9798_s23 + $0x68] ss:$0 sps:$4 sm:$0xff]  }
  0x11   :  { %6559 = vmatpush3.bf16.msra.mxu0 %v7576_v3  ;;  %v7635_v13 = vsel %vm65_vm1, %v6993_v11, 0  ;;  %v124_v16 = vld [vmem:[%s9799_s26] sm:$0x1]  ;;  %v7689_v23 = vsel %vm65_vm1, %v6999_v19, 0  ;;  %v475_v28 = vld [vmem:[%s9799_s26 + $0x4] sm:$0x1] }
  0x12   :  { %6573 = vmatpush3.bf16.msra.mxu1 %v7583_v4  ;;  %6560 = vmatprep.subr.bf16.mxu0 %v7445_v1  ;;  %v7000_v20 = vld [vmem:[%s9799_s26] ss:$0 sps:$4 sm:$0x44]   ;;  %v7003_v29 = vld [vmem:[%s9799_s26 + $0x4] ss:$0 sps:$4 sm:$0x22]  }
  0x13   :  { %6574 = vmatprep.subr.bf16.mxu1 %v7445_v1  ;;  %v7001_v21 = vld [vmem:[%s9799_s26] ss:$0 sps:$4 sm:$0x88]   ;;  %v281_v24 = vrot.slane %v7000_v20, 2  ;;  %v541_v30 = vrot.slane %v7003_v29, 1  ;;  %v7843_v39 = vld [vmem:[%s9798_s23 + $0x2c] sm:$0xff]  }
  0x14   :  { %v7686_v22 = vld [vmem:[%s9798_s23 + $0x60] sm:$0xff]   ;;  %v384_v25 = vrot.slane %v7001_v21, 3  ;;  %v789_v38 = vld [vmem:[%s9799_s26 + $0x8] sm:$0x1]  ;;  %v7860_v42 = vld [vmem:[%s9798_s23 + $0x34] sm:$0xff]  }
  0x15   :  { %6561 = vmatpush3.bf16.msra.mxu0 %v7594_v5  ;;  %v7002_v26 = vld [vmem:[%s9799_s26] ss:$0 sps:$4 sm:$0x44]   ;;  %v536_v31 = vld [vmem:[%s9799_s26 + $0x4] sm:$0x1]  ;;  %v7850_v40 = vld [vmem:[%s9798_s23 + $0x8] sm:$0xff]  }
  0x16   :  { %6575 = vmatpush3.bf16.msra.mxu1 %v7601_v6  ;;  %6562 = vmatprep.subr.bf16.mxu0 %v7445_v1  ;;  %v431_v27 = vrot.slane %v7002_v26, 2  ;;  %v7004_v32 = vld [vmem:[%s9799_s26 + $0x4] ss:$0 sps:$4 sm:$0x44]   ;;  %v7867_v43 = vld [vmem:[%s9798_s23 + $0x10] sm:$0xff]   ;;  %v7874_v44 = vld [vmem:[%s9798_s23 + $0x3c] sm:$0xff]  }
  0x17   :  { %6576 = vmatprep.subr.bf16.mxu1 %v7445_v1  ;;  %v7005_v33 = vld [vmem:[%s9799_s26 + $0x4] ss:$0 sps:$4 sm:$0x88]   ;;  %v632_v34 = vrot.slane %v7004_v32, 2  ;;  %v7881_v46 = vld [vmem:[%s9798_s23 + $0x18] sm:$0xff]   ;;  %v7896_v48 = vld [vmem:[%s9798_s23 + $0x48] sm:$0xff]  }
  0x18   :  { %v698_v35 = vrot.slane %v7005_v33, 3  ;;  %v7006_v36 = vld [vmem:[%s9799_s26 + $0x4] ss:$0 sps:$4 sm:$0x44]   ;;  %v849_v47 = vld [vmem:[%s9799_s26 + $0x8] sm:$0x1] }
  0x19   :  { %6563 = vmatpush3.bf16.msra.mxu0 %v7608_v7  ;;  %v745_v37 = vrot.slane %v7006_v36, 2  ;;  %v7007_v41 = vld [vmem:[%s9799_s26 + $0x8] ss:$0 sps:$4 sm:$0x22]   ;;  %v7915_v50 = vld [vmem:[%s9798_s23 + $0x50] sm:$0xff]   ;;  %v7924_v51 = vld [vmem:[%s9798_s23 + $0x58] sm:$0xff]  }
  0x1a   :  { %6577 = vmatpush3.bf16.msra.mxu1 %v7613_v8  ;;  %6564 = vmatprep.subr.bf16.mxu0 %v7445_v1  ;;  %v854_v45 = vrot.slane %v7007_v41, 1  ;;  %v7906_v49 = vld [vmem:[%s9798_s23 + $0x24] sm:$0xff]  }
  0x1b   :  { %6578 = vmatprep.subr.bf16.mxu1 %v7445_v1 }
  0x1d   :  { %6565 = vmatpush3.bf16.msra.mxu0 %v7631_v12 }
  0x1e   :  { %6579 = vmatpush3.bf16.msra.mxu1 %v7635_v13  ;;  %6584 = vmatprep.subr.bf16.mxu0 %v7445_v1 }
  0x1f   :  { %6598 = vmatprep.subr.bf16.mxu1 %v7445_v1 }
  0x20   :  { %6567 = vmatmul.mubr.msk.bf16.vlgmr.msra.gmra.mrb[0].mxu0 %vm157_vm2, %v129_v14 }
  0x21   :  { %6581 = vmatmul.mubr.msk.bf16.vlgmr.msra.gmra.mrb[0].mxu1 %vm157_vm2, %v124_v16  ;;  %6585 = vmatpush3.bf16.msra.mxu0 %v7641_v15 }
  0x22   :  { %6586 = vmatprep.subr.bf16.mxu0 %v7445_v1  ;;  %6594 = vmatprep.mubr.msk.bf16.mxu0 %vm7446_vm0, %v7445_v1 }
  0x23   :  { %6599 = vmatpush3.bf16.msra.mxu1 %v7563_v0  ;;  %6608 = vmatprep.mubr.msk.bf16.mxu1 %vm7446_vm0, %v7445_v1 }
  0x24   :  { %6600 = vmatprep.subr.bf16.mxu1 %v7445_v1 }
  0x25   :  { %6587 = vmatpush3.bf16.msra.mxu0 %v7655_v17 }
  0x26   :  { %6588 = vmatprep.subr.bf16.mxu0 %v7445_v1 }
  0x27   :  { %6601 = vmatpush3.bf16.msra.mxu1 %v7576_v3 }
  0x28   :  { %6602 = vmatprep.subr.bf16.mxu1 %v7445_v1 }
  0x29   :  { %6589 = vmatpush3.bf16.msra.mxu0 %v7663_v18 }
  0x2a   :  { %6590 = vmatprep.subr.bf16.mxu0 %v7445_v1 }
  0x2b   :  { %6603 = vmatpush3.bf16.msra.mxu1 %v7594_v5 }
  0x2c   :  { %6604 = vmatprep.subr.bf16.mxu1 %v7445_v1 }
  0x2d   :  { %6591 = vmatpush3.bf16.msra.mxu0 %v7686_v22 }
  0x2e   :  { %6592 = vmatprep.subr.bf16.mxu0 %v7445_v1 }
  0x2f   :  { %6605 = vmatpush3.bf16.msra.mxu1 %v7608_v7 }
  0x30   :  { %6606 = vmatprep.subr.bf16.mxu1 %v7445_v1 }
  0x31   :  { %6593 = vmatpush3.bf16.msra.mxu0 %v7689_v23 }
  0x32   :  { %6612 = vmatprep.subr.bf16.mxu0 %v7445_v1 }
  0x33   :  { %6607 = vmatpush3.bf16.msra.mxu1 %v7631_v12 }
  0x34   :  { %6595 = vmatmul.mubr.msk.bf16.vlgmr.msra.gmra.mrb[4].mxu0 %vm157_vm2, %v281_v24  ;;  %6626 = vmatprep.subr.bf16.mxu1 %v7445_v1 }
  0x35   :  { %6613 = vmatpush3.bf16.msra.mxu0 %v7570_v2  ;;  %6622 = vmatprep.mubr.msk.bf16.mxu0 %vm7446_vm0, %v7445_v1 }
  0x36   :  { %6614 = vmatprep.subr.bf16.mxu0 %v7445_v1  ;;  %6609 = vmatmul.mubr.msk.bf16.vlgmr.msra.gmra.mrb[4].mxu1 %vm157_vm2, %v384_v25 }
  0x37   :  { %6627 = vmatpush3.bf16.msra.mxu1 %v7641_v15  ;;  %6636 = vmatprep.mubr.msk.bf16.mxu1 %vm7446_vm0, %v7445_v1 }
  0x38   :  { %6628 = vmatprep.subr.bf16.mxu1 %v7445_v1 }
  0x39   :  { %6615 = vmatpush3.bf16.msra.mxu0 %v7583_v4 }
  0x3a   :  { %6616 = vmatprep.subr.bf16.mxu0 %v7445_v1 }
  0x3b   :  { %6629 = vmatpush3.bf16.msra.mxu1 %v7655_v17 }
  0x3c   :  { %6630 = vmatprep.subr.bf16.mxu1 %v7445_v1 }
  0x3d   :  { %6617 = vmatpush3.bf16.msra.mxu0 %v7601_v6 }
  0x3e   :  { %6618 = vmatprep.subr.bf16.mxu0 %v7445_v1 }
  0x3f   :  { %6631 = vmatpush3.bf16.msra.mxu1 %v7663_v18 }
  0x40   :  { %6632 = vmatprep.subr.bf16.mxu1 %v7445_v1 }
  0x41   :  { %6619 = vmatpush3.bf16.msra.mxu0 %v7613_v8 }
  0x42   :  { %6620 = vmatprep.subr.bf16.mxu0 %v7445_v1 }
  0x43   :  { %6633 = vmatpush3.bf16.msra.mxu1 %v7686_v22 }
  0x44   :  { %6634 = vmatprep.subr.bf16.mxu1 %v7445_v1 }
  0x45   :  { %6621 = vmatpush3.bf16.msra.mxu0 %v7635_v13 }
  0x46   :  { %6640 = vmatprep.subr.bf16.mxu0 %v7445_v1 }
  0x47   :  { %6635 = vmatpush3.bf16.msra.mxu1 %v7689_v23 }
  0x48   :  { %6623 = vmatmul.mubr.msk.bf16.vlgmr.msra.gmra.mrb[8].mxu0 %vm157_vm2, %v431_v27  ;;  %6654 = vmatprep.subr.bf16.mxu1 %v7445_v1 }
  0x49   :  { %6641 = vmatpush3.bf16.msra.mxu0 %v7563_v0  ;;  %6650 = vmatprep.mubr.msk.bf16.mxu0 %vm7446_vm0, %v7445_v1 }
  0x4a   :  { %6642 = vmatprep.subr.bf16.mxu0 %v7445_v1  ;;  %6637 = vmatmul.mubr.msk.bf16.vlgmr.msra.gmra.mrb[8].mxu1 %vm157_vm2, %v475_v28 }
  0x4b   :  { %6655 = vmatpush3.bf16.msra.mxu1 %v7570_v2  ;;  %6664 = vmatprep.mubr.msk.bf16.mxu1 %vm7446_vm0, %v7445_v1 }
  0x4c   :  { %6656 = vmatprep.subr.bf16.mxu1 %v7445_v1 }
  0x4d   :  { %6643 = vmatpush3.bf16.msra.mxu0 %v7576_v3 }
  0x4e   :  { %6644 = vmatprep.subr.bf16.mxu0 %v7445_v1 }
  0x4f   :  { %6657 = vmatpush3.bf16.msra.mxu1 %v7583_v4 }
  0x50   :  { %6658 = vmatprep.subr.bf16.mxu1 %v7445_v1 }
  0x51   :  { %6645 = vmatpush3.bf16.msra.mxu0 %v7594_v5 }
  0x52   :  { %6646 = vmatprep.subr.bf16.mxu0 %v7445_v1 }
  0x53   :  { %6659 = vmatpush3.bf16.msra.mxu1 %v7601_v6 }
  0x54   :  { %6660 = vmatprep.subr.bf16.mxu1 %v7445_v1 }
  0x55   :  { %6647 = vmatpush3.bf16.msra.mxu0 %v7608_v7 }
  0x56   :  { %6648 = vmatprep.subr.bf16.mxu0 %v7445_v1 }
  0x57   :  { %6661 = vmatpush3.bf16.msra.mxu1 %v7613_v8 }
  0x58   :  { %6662 = vmatprep.subr.bf16.mxu1 %v7445_v1 }
  0x59   :  { %6649 = vmatpush3.bf16.msra.mxu0 %v7631_v12 }
  0x5a   :  { %6668 = vmatprep.subr.bf16.mxu0 %v7445_v1 }
  0x5b   :  { %6663 = vmatpush3.bf16.msra.mxu1 %v7635_v13 }
  0x5c   :  { %6651 = vmatmul.mubr.msk.bf16.vlgmr.msra.gmra.mrb[12].mxu0 %vm157_vm2, %v541_v30  ;;  %6682 = vmatprep.subr.bf16.mxu1 %v7445_v1 }
  0x5d   :  { %6669 = vmatpush3.bf16.msra.mxu0 %v7641_v15  ;;  %6678 = vmatprep.mubr.msk.bf16.mxu0 %vm7446_vm0, %v7445_v1 }
  0x5e   :  { %6670 = vmatprep.subr.bf16.mxu0 %v7445_v1  ;;  %6665 = vmatmul.mubr.msk.bf16.vlgmr.msra.gmra.mrb[12].mxu1 %vm157_vm2, %v536_v31 }
  0x5f   :  { %6683 = vmatpush3.bf16.msra.mxu1 %v7563_v0  ;;  %6692 = vmatprep.mubr.msk.bf16.mxu1 %vm7446_vm0, %v7445_v1 }
  0x60   :  { %6684 = vmatprep.subr.bf16.mxu1 %v7445_v1 }
  0x61   :  { %6671 = vmatpush3.bf16.msra.mxu0 %v7655_v17 }
  0x62   :  { %6672 = vmatprep.subr.bf16.mxu0 %v7445_v1 }
  0x63   :  { %6685 = vmatpush3.bf16.msra.mxu1 %v7576_v3 }
  0x64   :  { %6686 = vmatprep.subr.bf16.mxu1 %v7445_v1 }
  0x65   :  { %6673 = vmatpush3.bf16.msra.mxu0 %v7663_v18 }
  0x66   :  { %6674 = vmatprep.subr.bf16.mxu0 %v7445_v1 }
  0x67   :  { %6687 = vmatpush3.bf16.msra.mxu1 %v7594_v5 }
  0x68   :  { %6688 = vmatprep.subr.bf16.mxu1 %v7445_v1 }
  0x69   :  { %6675 = vmatpush3.bf16.msra.mxu0 %v7686_v22 }
  0x6a   :  { %6676 = vmatprep.subr.bf16.mxu0 %v7445_v1 }
  0x6b   :  { %6689 = vmatpush3.bf16.msra.mxu1 %v7608_v7 }
  0x6c   :  { %6690 = vmatprep.subr.bf16.mxu1 %v7445_v1 }
  0x6d   :  { %6677 = vmatpush3.bf16.msra.mxu0 %v7689_v23 }
  0x6e   :  { %6696 = vmatprep.subr.bf16.mxu0 %v7445_v1 }
  0x6f   :  { %6691 = vmatpush3.bf16.msra.mxu1 %v7631_v12 }
  0x70   :  { %6679 = vmatmul.mubr.msk.bf16.vlgmr.msra.gmra.mrb[16].mxu0 %vm157_vm2, %v632_v34  ;;  %6710 = vmatprep.subr.bf16.mxu1 %v7445_v1 }
  0x71   :  { %6697 = vmatpush3.bf16.msra.mxu0 %v7570_v2  ;;  %6706 = vmatprep.mubr.msk.bf16.mxu0 %vm7446_vm0, %v7445_v1 }
  0x72   :  { %6698 = vmatprep.subr.bf16.mxu0 %v7445_v1  ;;  %6693 = vmatmul.mubr.msk.bf16.vlgmr.msra.gmra.mrb[16].mxu1 %vm157_vm2, %v698_v35 }
  0x73   :  { %6711 = vmatpush3.bf16.msra.mxu1 %v7641_v15  ;;  %6720 = vmatprep.mubr.msk.bf16.mxu1 %vm7446_vm0, %v7445_v1 }
  0x74   :  { %6712 = vmatprep.subr.bf16.mxu1 %v7445_v1 }
  0x75   :  { %6699 = vmatpush3.bf16.msra.mxu0 %v7583_v4 }
  0x76   :  { %6700 = vmatprep.subr.bf16.mxu0 %v7445_v1 }
  0x77   :  { %6713 = vmatpush3.bf16.msra.mxu1 %v7655_v17 }
  0x78   :  { %6714 = vmatprep.subr.bf16.mxu1 %v7445_v1 }
  0x79   :  { %6701 = vmatpush3.bf16.msra.mxu0 %v7601_v6 }
  0x7a   :  { %6702 = vmatprep.subr.bf16.mxu0 %v7445_v1 }
  0x7b   :  { %6715 = vmatpush3.bf16.msra.mxu1 %v7663_v18 }
  0x7c   :  { %6716 = vmatprep.subr.bf16.mxu1 %v7445_v1 }
  0x7d   :  { %6703 = vmatpush3.bf16.msra.mxu0 %v7613_v8 }
  0x7e   :  { %6704 = vmatprep.subr.bf16.mxu0 %v7445_v1 }
  0x7f   :  { %6717 = vmatpush3.bf16.msra.mxu1 %v7686_v22 }
  0x80   :  { %6718 = vmatprep.subr.bf16.mxu1 %v7445_v1 }
  0x81   :  { %6705 = vmatpush3.bf16.msra.mxu0 %v7635_v13 }
  0x82   :  { %6724 = vmatprep.subr.bf16.mxu0 %v7445_v1 }
  0x83   :  { %6719 = vmatpush3.bf16.msra.mxu1 %v7689_v23 }
  0x84   :  { %6707 = vmatmul.mubr.msk.bf16.vlgmr.msra.gmra.mrb[20].mxu0 %vm157_vm2, %v745_v37  ;;  %6738 = vmatprep.subr.bf16.mxu1 %v7445_v1 }
  0x85   :  { %6725 = vmatpush3.bf16.msra.mxu0 %v7563_v0  ;;  %6734 = vmatprep.mubr.msk.bf16.mxu0 %vm7446_vm0, %v7445_v1 }
  0x86   :  { %6726 = vmatprep.subr.bf16.mxu0 %v7445_v1  ;;  %6721 = vmatmul.mubr.msk.bf16.vlgmr.msra.gmra.mrb[20].mxu1 %vm157_vm2, %v789_v38 }
  0x87   :  { %6739 = vmatpush3.bf16.msra.mxu1 %v7570_v2  ;;  %6748 = vmatprep.mubr.msk.bf16.mxu1 %vm7446_vm0, %v7445_v1 }
  0x88   :  { %6740 = vmatprep.subr.bf16.mxu1 %v7445_v1 }
  0x89   :  { %6727 = vmatpush3.bf16.msra.mxu0 %v7843_v39 }
  0x8a   :  { %6728 = vmatprep.subr.bf16.mxu0 %v7445_v1 }
  0x8b   :  { %6741 = vmatpush3.bf16.msra.mxu1 %v7850_v40 }
  0x8c   :  { %6742 = vmatprep.subr.bf16.mxu1 %v7445_v1 }
  0x8d   :  { %6729 = vmatpush3.bf16.msra.mxu0 %v7860_v42 }
  0x8e   :  { %6730 = vmatprep.subr.bf16.mxu0 %v7445_v1 }
  0x8f   :  { %6743 = vmatpush3.bf16.msra.mxu1 %v7867_v43 }
  0x90   :  { %6744 = vmatprep.subr.bf16.mxu1 %v7445_v1 }
  0x91   :  { %6731 = vmatpush3.bf16.msra.mxu0 %v7874_v44 }
  0x92   :  { %6732 = vmatprep.subr.bf16.mxu0 %v7445_v1 }
  0x93   :  { %6745 = vmatpush3.bf16.msra.mxu1 %v7881_v46 }
  0x94   :  { %6746 = vmatprep.subr.bf16.mxu1 %v7445_v1 }
  0x95   :  { %6733 = vmatpush3.bf16.msra.mxu0 %v7631_v12 }
  0x96   :  { %6752 = vmatprep.subr.bf16.mxu0 %v7445_v1 }
  0x97   :  { %6747 = vmatpush3.bf16.msra.mxu1 %v7635_v13 }
  0x98   :  { %6735 = vmatmul.mubr.msk.bf16.vlgmr.msra.gmra.mrb[24].mxu0 %vm157_vm2, %v854_v45  ;;  %6766 = vmatprep.subr.bf16.mxu1 %v7445_v1 }
  0x99   :  { %6753 = vmatpush3.bf16.msra.mxu0 %v7896_v48  ;;  %6762 = vmatprep.mubr.msk.bf16.mxu0 %vm7446_vm0, %v7445_v1 }
  0x9a   :  { %6754 = vmatprep.subr.bf16.mxu0 %v7445_v1  ;;  %6749 = vmatmul.mubr.msk.bf16.vlgmr.msra.gmra.mrb[24].mxu1 %vm157_vm2, %v849_v47 }
  0x9b   :  { %6767 = vmatpush3.bf16.msra.mxu1 %v7906_v49  ;;  %6776 = vmatprep.mubr.msk.bf16.mxu1 %vm7446_vm0, %v7445_v1 }
  0x9c   :  { %6768 = vmatprep.subr.bf16.mxu1 %v7445_v1 }
  0x9d   :  { %6755 = vmatpush3.bf16.msra.mxu0 %v7915_v50 }
  0x9e   :  { %6756 = vmatprep.subr.bf16.mxu0 %v7445_v1 }
  0x9f   :  { %6769 = vmatpush3.bf16.msra.mxu1 %v7843_v39 }
  0xa0   :  { %6770 = vmatprep.subr.bf16.mxu1 %v7445_v1 }
  0xa1   :  { %6757 = vmatpush3.bf16.msra.mxu0 %v7924_v51 }
  0xa2   :  { %6758 = vmatprep.subr.bf16.mxu0 %v7445_v1 }
  0xa3   :  { %6771 = vmatpush3.bf16.msra.mxu1 %v7860_v42 }
  0xa4   :  { %27 = vsyncpa [#allocation8], 0  ;;  %v7008_v52 = vld [vmem:[%s9799_s26 + $0x8] ss:$0 sps:$4 sm:$0x44]   ;;  %6772 = vmatprep.subr.bf16.mxu1 %v7445_v1  ;;  %v7936_v53 = vld [vmem:[%s9798_s23 + $0x60] sm:$0xff]  }
  0xa5   :  { %6759 = vmatpush3.bf16.msra.mxu0 %v7936_v53  ;;  %v7009_v54 = vld [vmem:[%s9799_s26 + $0x8] ss:$0 sps:$4 sm:$0x88]   ;;  %v945_v55 = vrot.slane %v7008_v52, 2  ;;  %v7953_v57 = vld [vmem:[%s9798_s23] sm:$0xff]   ;;  %v7447_v2 = vmov 0  }
  0xa6   :  { %6760 = vmatprep.subr.bf16.mxu0 %v7445_v1  ;;  %v1008_v56 = vrot.slane %v7009_v54, 3  ;;  %v7010_v58 = vld [vmem:[%s9799_s26 + $0x8] ss:$0 sps:$4 sm:$0x44]   ;;  %v1099_v60 = vld [vmem:[%s9799_s26 + $0xc] sm:$0x1] }
  0xa7   :  { %6773 = vmatpush3.bf16.msra.mxu1 %v7874_v44  ;;  %v1055_v59 = vrot.slane %v7010_v58, 2  ;;  %v7011_v61 = vld [vmem:[%s9799_s26 + $0xc] ss:$0 sps:$4 sm:$0x22]   ;;  %74 = vst [vmem:[#allocation3] sm:$0xff] %v7447_v2  ;;  %77 = vst [vmem:[#allocation3 + $0xc] sm:$0xff] %v7447_v2 }
  0xa8   :  { %6774 = vmatprep.subr.bf16.mxu1 %v7445_v1  ;;  %v1162_v62 = vrot.slane %v7011_v61, 1  ;;  %v1157_v63 = vld [vmem:[%s9799_s26 + $0xc] sm:$0x1]  ;;  %79 = vst [vmem:[#allocation3 + $0x18] sm:$0x33] %v7447_v2  ;;  %82 = vst [vmem:[#allocation4] sm:$0xff] %v7447_v2 }
  0xa9   :  { %6761 = vmatpush3.bf16.msra.mxu0 %v7689_v23  ;;  %v7012_v0 = vld [vmem:[%s9799_s26 + $0xc] ss:$0 sps:$4 sm:$0x44]   ;;  %85 = vst [vmem:[#allocation4 + $0xc] sm:$0xff] %v7447_v2  ;;  %87 = vst [vmem:[#allocation4 + $0x18] sm:$0xff] %v7447_v2  ;;  %s9800_s4 = sld [smem:[#allocation15_spill]] }
  0xaa   :  { %6780 = vmatprep.subr.bf16.mxu0 %v7445_v1  ;;  %89 = vst [vmem:[#allocation4 + $0x24] sm:$0xff] %v7447_v2  ;;  %91 = vst [vmem:[#allocation4 + $0x30] sm:$0x33] %v7447_v2  ;;  %v7013_v3 = vld [vmem:[%s9799_s26 + $0xc] ss:$0 sps:$4 sm:$0x88]  }
  0xab   :  { %6775 = vmatpush3.bf16.msra.mxu1 %v7631_v12  ;;  %v1253_v4 = vrot.slane %v7012_v0, 2  ;;  %v1316_v5 = vrot.slane %v7013_v3, 3  ;;  %v7014_v9 = vld [vmem:[%s9799_s26 + $0xc] ss:$0 sps:$4 sm:$0x44]   ;;  %vm66_vm3 = vcmask 261124  }
  0xac   :  { %6763 = vmatmul.mubr.msk.bf16.vlgmr.msra.gmra.mrb[28].mxu0 %vm157_vm2, %v945_v55  ;;  %6794 = vmatprep.subr.bf16.mxu1 %v7445_v1  ;;  %v1363_v17 = vrot.slane %v7014_v9, 2  ;;  %v1407_v19 = vld [vmem:[%s9799_s26 + $0x10] sm:$0x1]  ;;  %vm67_vm4 = vmor %vm66_vm3, %vm65_vm1  ;;  %s9801_s3 = sld [smem:[#allocation14_spill]]  ;;  %s7448_s21 = smov 16   ;;  %vm9790_vm5 = vcmask 1041537  }
  0xad   :  { %6781 = vmatpush3.bf16.msra.mxu0 %v7953_v57  ;;  %6790 = vmatprep.mubr.msk.bf16.mxu0 %vm7446_vm0, %v7445_v1  ;;  %68 = vst.msk [vmem:[#allocation2] sm:$0xff] %vm67_vm4, %v7447_v2  ;;  %69 = vst.msk [vmem:[#allocation2 + $0x8] sm:$0xff] %vm67_vm4, %v7447_v2  ;;  %vm376_vm6 = vcmask 128005   ;;  %vm9791_vm7 = vcmask 130048   ;;  %vm1597_vm9 = vcmask 261120   ;;  %vm532_vm10 = vcmask 1042562  }
  0xae   :  { %6782 = vmatprep.subr.bf16.mxu0 %v7445_v1  ;;  %6777 = vmatmul.mubr.msk.bf16.vlgmr.msra.gmra.mrb[28].mxu1 %vm157_vm2, %v1008_v56  ;;  %vm8200_vm8 = vmor %vm376_vm6, %vm9790_vm5  ;;  %vm533_vm11 = vcmask 129030   ;;  %vm689_vm13 = vcmask 1043587   ;;  %vm690_vm14 = vcmask 130055   ;;  %vm9788_vm1 = vcmask 1040512   ;;  %s9810_s30 = sld [smem:[#allocation12_spill]]  ;;  %s7450_s27 = smov 32  }
  0xaf   :  { %6795 = vmatpush3.bf16.msra.mxu1 %v7896_v48  ;;  %6804 = vmatprep.mubr.msk.bf16.mxu1 %vm7446_vm0, %v7445_v1  ;;  %v8087_v18 = vld [vmem:[%s9800_s4 + $0x50] sm:$0xff]   ;;  %v8110_v20 = vld [vmem:[%s9800_s4 + $0x60] sm:$0xff]   ;;  %v8119_v21 = vld [vmem:[%s9800_s4 + $0x68] sm:$0xff]   ;;  %vm70_vm4 = vcmask 1041408   ;;  %vm71_vm6 = vcmask 259076   ;;  %vm3277_vm5 = vcmask 1047559  }
  0xb0   :  { %6796 = vmatprep.subr.bf16.mxu1 %v7445_v1  ;;  %v8136_v28 = vld [vmem:[%s9800_s4 + $0x70] sm:$0xff]   ;;  %v8146_v35 = vld [vmem:[%s9800_s4 + $0x78] sm:$0xff]   ;;  %v8155_v38 = vld [vmem:[%s9800_s4 + $0x80] sm:$0xff]   ;;  %s7452_s1 = smov 64   ;;  %s7453_s25 = smov [#allocation5]  }
  0xb1   :  { %6783 = vmatpush3.bf16.msra.mxu0 %v7850_v40  ;;  %vm8235_vm12 = vmor %vm533_vm11, %vm532_vm10 }
  0xb2   :  { %6784 = vmatprep.subr.bf16.mxu0 %v7445_v1  ;;  %v8126_v22 = vld [vmem:[%s9801_s3] ss:$0 sm:$0xff]  ;;  %vm8318_vm15 = vmor %vm690_vm14, %vm689_vm13  ;;  %vm9786_vm14 = vcmask 517120   ;;  %s7454_s3 = smov [#allocation7]  }
  0xb3   :  { %6797 = vmatpush3.bf16.msra.mxu1 %v7915_v50  ;;  %vm72_vm11 = vmor %vm71_vm6, %vm70_vm4  ;;  %vm3243_vm4 = vcmask 1041665   ;;  %vm9792_vm6 = vcmask 1045509  }
  0xb4   :  { %6798 = vmatprep.subr.bf16.mxu1 %v7445_v1  ;;  %73 = vst.msk [vmem:[#allocation2 + $0x10] sm:$0x33] %vm72_vm11, %v7447_v2 }
  0xb5   :  { %6785 = vmatpush3.bf16.msra.mxu0 %v7867_v43 }
  0xb6   :  { %6786 = vmatprep.subr.bf16.mxu0 %v7445_v1 }
  0xb7   :  { %6799 = vmatpush3.bf16.msra.mxu1 %v7924_v51 }
  0xb8   :  { %6800 = vmatprep.subr.bf16.mxu1 %v7445_v1 }
  0xb9   :  { %6787 = vmatpush3.bf16.msra.mxu0 %v7881_v46 }
  0xba   :  { %6788 = vmatprep.subr.bf16.mxu0 %v7445_v1 }
  0xbb   :  { %6801 = vmatpush3.bf16.msra.mxu1 %v7936_v53 }
  0xbc   :  { %6802 = vmatprep.subr.bf16.mxu1 %v7445_v1 }
  0xbd   :  { %6789 = vmatpush3.bf16.msra.mxu0 %v7635_v13 }
  0xbe   :  { %6808 = vmatprep.subr.bf16.mxu0 %v7445_v1 }
  0xbf   :  { %6803 = vmatpush3.bf16.msra.mxu1 %v7689_v23 }
  0xc0   :  { %6791 = vmatmul.mubr.msk.bf16.vlgmr.msra.gmra.mrb[32].mxu0 %vm157_vm2, %v1055_v59  ;;  %6822 = vmatprep.subr.bf16.mxu1 %v7445_v1 }
  0xc1   :  { %6809 = vmatpush3.bf16.msra.mxu0 %v7906_v49  ;;  %6818 = vmatprep.mubr.msk.bf16.mxu0 %vm7446_vm0, %v7445_v1 }
  0xc2   :  { %6810 = vmatprep.subr.bf16.mxu0 %v7445_v1  ;;  %6805 = vmatmul.mubr.msk.bf16.vlgmr.msra.gmra.mrb[32].mxu1 %vm157_vm2, %v1099_v60 }
  0xc3   :  { %6823 = vmatpush3.bf16.msra.mxu1 %v7953_v57  ;;  %6832 = vmatprep.mubr.msk.bf16.mxu1 %vm7446_vm0, %v7445_v1 }
  0xc4   :  { %6824 = vmatprep.subr.bf16.mxu1 %v7445_v1 }
  0xc5   :  { %6811 = vmatpush3.bf16.msra.mxu0 %v7843_v39 }
  0xc6   :  { %6812 = vmatprep.subr.bf16.mxu0 %v7445_v1 }
  0xc7   :  { %6825 = vmatpush3.bf16.msra.mxu1 %v7850_v40 }
  0xc8   :  { %6826 = vmatprep.subr.bf16.mxu1 %v7445_v1 }
  0xc9   :  { %6813 = vmatpush3.bf16.msra.mxu0 %v7860_v42 }
  0xca   :  { %6814 = vmatprep.subr.bf16.mxu0 %v7445_v1 }
  0xcb   :  { %6827 = vmatpush3.bf16.msra.mxu1 %v7867_v43 }
  0xcc   :  { %6828 = vmatprep.subr.bf16.mxu1 %v7445_v1 }
  0xcd   :  { %6815 = vmatpush3.bf16.msra.mxu0 %v7874_v44 }
  0xce   :  { %6816 = vmatprep.subr.bf16.mxu0 %v7445_v1 }
  0xcf   :  { %6829 = vmatpush3.bf16.msra.mxu1 %v7881_v46 }
  0xd0   :  { %6830 = vmatprep.subr.bf16.mxu1 %v7445_v1 }
  0xd1   :  { %6817 = vmatpush3.bf16.msra.mxu0 %v7631_v12 }
  0xd2   :  { %6836 = vmatprep.subr.bf16.mxu0 %v7445_v1 }
  0xd3   :  { %6831 = vmatpush3.bf16.msra.mxu1 %v7635_v13 }
  0xd4   :  { %6819 = vmatmul.mubr.msk.bf16.vlgmr.msra.gmra.mrb[36].mxu0 %vm157_vm2, %v1162_v62  ;;  %6850 = vmatprep.subr.bf16.mxu1 %v7445_v1 }
  0xd5   :  { %6837 = vmatpush3.bf16.msra.mxu0 %v7896_v48  ;;  %6846 = vmatprep.mubr.msk.bf16.mxu0 %vm7446_vm0, %v7445_v1 }
  0xd6   :  { %6838 = vmatprep.subr.bf16.mxu0 %v7445_v1  ;;  %6833 = vmatmul.mubr.msk.bf16.vlgmr.msra.gmra.mrb[36].mxu1 %vm157_vm2, %v1157_v63 }
  0xd7   :  { %6851 = vmatpush3.bf16.msra.mxu1 %v7906_v49  ;;  %6860 = vmatprep.mubr.msk.bf16.mxu1 %vm7446_vm0, %v7445_v1 }
  0xd8   :  { %6852 = vmatprep.subr.bf16.mxu1 %v7445_v1 }
  0xd9   :  { %6839 = vmatpush3.bf16.msra.mxu0 %v7915_v50 }
  0xda   :  { %6840 = vmatprep.subr.bf16.mxu0 %v7445_v1 }
  0xdb   :  { %6853 = vmatpush3.bf16.msra.mxu1 %v7843_v39  ;;  %v8165_v39 = vld [vmem:[%s9800_s4 + $0x88] sm:$0xff]  }
  0xdc   :  { %6854 = vmatprep.subr.bf16.mxu1 %v7445_v1 }
  0xdd   :  { %6841 = vmatpush3.bf16.msra.mxu0 %v7924_v51 }
  0xde   :  { %6842 = vmatprep.subr.bf16.mxu0 %v7445_v1 }
  0xdf   :  { %6855 = vmatpush3.bf16.msra.mxu1 %v7860_v42 }
  0xe0   :  { %6856 = vmatprep.subr.bf16.mxu1 %v7445_v1 }
  0xe1   :  { %6843 = vmatpush3.bf16.msra.mxu0 %v7936_v53 }
  0xe2   :  { %6844 = vmatprep.subr.bf16.mxu0 %v7445_v1 }
  0xe3   :  { %6857 = vmatpush3.bf16.msra.mxu1 %v7874_v44 }
  0xe4   :  { %6858 = vmatprep.subr.bf16.mxu1 %v7445_v1 }
  0xe5   :  { %6845 = vmatpush3.bf16.msra.mxu0 %v7689_v23 }
  0xe6   :  { %6864 = vmatprep.subr.bf16.mxu0 %v7445_v1 }
  0xe7   :  { %6859 = vmatpush3.bf16.msra.mxu1 %v7631_v12 }
  0xe8   :  { %6847 = vmatmul.mubr.msk.bf16.vlgmr.msra.gmra.mrb[40].mxu0 %vm157_vm2, %v1253_v4  ;;  %6878 = vmatprep.subr.bf16.mxu1 %v7445_v1 }
  0xe9   :  { %6865 = vmatpush3.bf16.msra.mxu0 %v7953_v57  ;;  %6874 = vmatprep.mubr.msk.bf16.mxu0 %vm7446_vm0, %v7445_v1 }
  0xea   :  { %6861 = vmatmul.mubr.msk.bf16.vlgmr.msra.gmra.mrb[40].mxu1 %vm157_vm2, %v1316_v5  ;;  %6866 = vmatprep.subr.bf16.mxu0 %v7445_v1 }
  0xeb   :  { %6879 = vmatpush3.bf16.msra.mxu1 %v7896_v48  ;;  %6888 = vmatprep.mubr.msk.bf16.mxu1 %vm7446_vm0, %v7445_v1 }
  0xec   :  { %6880 = vmatprep.subr.bf16.mxu1 %v7445_v1 }
  0xed   :  { %6867 = vmatpush3.bf16.msra.mxu0 %v7850_v40  ;;  %v8174_v40 = vld [vmem:[%s9800_s4 + $0x90] sm:$0xff]  }
  0xee   :  { %6868 = vmatprep.subr.bf16.mxu0 %v7445_v1 }
  0xef   :  { %6881 = vmatpush3.bf16.msra.mxu1 %v7915_v50 }
  0xf0   :  { %6882 = vmatprep.subr.bf16.mxu1 %v7445_v1 }
  0xf1   :  { %6869 = vmatpush3.bf16.msra.mxu0 %v7867_v43 }
  0xf2   :  { %6870 = vmatprep.subr.bf16.mxu0 %v7445_v1 }
  0xf3   :  { %v198_v6 = vpop.f32.mrb[0].mxu0  ;;  %6883 = vmatpush3.bf16.msra.mxu1 %v7924_v51 }
  0xf4   :  { %v6568_v7 = vpop.f32.mrb[1].mxu0  ;;  %v271_v8 = vpop.f32.mrb[0].mxu1  ;;  %6884 = vmatprep.subr.bf16.mxu1 %v7445_v1 }
  0xf5   :  { %v272_v10 = vadd.f32 %v271_v8, %v198_v6  ;;  %v201_v11 = vpop.f32.mrb[2].mxu0  ;;  %v6582_v12 = vpop.f32.mrb[1].mxu1  ;;  %6871 = vmatpush3.bf16.msra.mxu0 %v7881_v46  ;;  %v8183_v46 = vld [vmem:[%s9800_s4 + $0x98] sm:$0xff]  }
  0xf6   :  { %v6569_v14 = vpop.f32.mrb[3].mxu0  ;;  %v274_v15 = vpop.f32.mrb[2].mxu1  ;;  %6872 = vmatprep.subr.bf16.mxu0 %v7445_v1 }
  0xf7   :  { %v6583_v16 = vpop.f32.mrb[3].mxu1  ;;  %6885 = vmatpush3.bf16.msra.mxu1 %v7936_v53 }
  0xf8   :  { %6886 = vmatprep.subr.bf16.mxu1 %v7445_v1 }
  0xf9   :  { %6873 = vmatpush3.bf16.msra.mxu0 %v7635_v13  ;;  %v8100_v13 = vld [vmem:[%s9800_s4 + $0x58] sm:$0xff]  }
  0xfa   :  { %1601 = vmatprep.subr.bf16.mxu0 %v7447_v2 }
  0xfb   :  { %6887 = vmatpush3.bf16.msra.mxu1 %v7689_v23 }
  0xfc   :  { %6875 = vmatmul.mubr.msk.bf16.vlgmr.msra.gmra.mrb[44].mxu0 %vm157_vm2, %v1363_v17  ;;  %1883 = vmatprep.subr.bf16.mxu1 %v7447_v2 }
  0xfd   :  { %1602 = vmatpush1.bf16.msra.mxu0 %v8087_v18 }
  0xfe   :  { %6889 = vmatmul.mubr.msk.bf16.vlgmr.msra.gmra.mrb[44].mxu1 %vm157_vm2, %v1407_v19  ;;  %1603 = vmatprep.subr.bf16.mxu0 %v7447_v2  ;;  %vm846_vm2 = vcmask 126980  }
  0xff   :  { %1884 = vmatpush1.bf16.msra.mxu1 %v8087_v18  ;;  %vm8366_vm3 = vmor %vm846_vm2, %vm9788_vm1  ;;  %vm9789_vm2 = vcmask 1044484  }
 0x100   :  { %1885 = vmatprep.subr.bf16.mxu1 %v7447_v2  ;;  %vm8973_vm1 = vmor %vm9792_vm6, %vm3243_vm4  ;;  %vm3280_vm4 = vcmask 257027  }
 0x101   :  { %1604 = vmatpush1.bf16.msra.mxu0 %v8100_v13 }
 0x102   :  { %1605 = vmatprep.subr.bf16.mxu0 %v7447_v2 }
 0x103   :  { %1886 = vmatpush1.bf16.msra.mxu1 %v8100_v13 }
 0x104   :  { %1887 = vmatprep.subr.bf16.mxu1 %v7447_v2 }
 0x105   :  { %1606 = vmatpush1.bf16.msra.mxu0 %v8110_v20 }
 0x106   :  { %1607 = vmatprep.subr.bf16.mxu0 %v7447_v2 }
 0x107   :  { %v349_v23 = vpop.f32.mrb[4].mxu0  ;;  %1888 = vmatpush1.bf16.msra.mxu1 %v8110_v20 }
 0x108   :  { %v355_v24 = vadd.f32 %v349_v23, %v272_v10  ;;  %v6596_v25 = vpop.f32.mrb[5].mxu0  ;;  %1889 = vmatprep.subr.bf16.mxu1 %v7447_v2 }
 0x109   :  { %v352_v26 = vpop.f32.mrb[6].mxu0  ;;  %v422_v27 = vpop.f32.mrb[4].mxu1  ;;  %1608 = vmatpush1.bf16.msra.mxu0 %v8119_v21 }
 0x10a   :  { %v362_v29 = vadd.f32 %v8126_v22, %v355_v24  ;;  %v6597_v30 = vpop.f32.mrb[7].mxu0  ;;  %v6610_v31 = vpop.f32.mrb[5].mxu1  ;;  %1609 = vmatprep.subr.bf16.mxu0 %v7447_v2 }
 0x10b   :  { %v425_v32 = vpop.f32.mrb[6].mxu1  ;;  %1890 = vmatpush1.bf16.msra.mxu1 %v8119_v21 }
 0x10c   :  { %v363_v33 = vmax.f32 %v362_v29, 0.0  ;;  %v6611_v34 = vpop.f32.mrb[7].mxu1  ;;  %1891 = vmatprep.subr.bf16.mxu1 %v7447_v2 }
 0x10d   :  { %1610 = vmatpush1.bf16.msra.mxu0 %v8136_v28 }
 0x10e   :  { %v6251_v36 = vpack.c.bf16 %v363_v33, %v363_v33  ;;  %1611 = vmatprep.subr.bf16.mxu0 %v7447_v2 }
 0x10f   :  { %1892 = vmatpush1.bf16.msra.mxu1 %v8136_v28 }
 0x110   :  { %v368_v37 = vrot.slane %v6251_v36, 7  ;;  %1893 = vmatprep.subr.bf16.mxu1 %v7447_v2 }
 0x111   :  { %1612 = vmatpush1.bf16.msra.mxu0 %v8146_v35 }
 0x112   :  { %369 = vrot.lane.b32.xlu0 %v368_v37, %s7448_s21  ;;  %1613 = vmatprep.subr.bf16.mxu0 %v7447_v2 }
 0x113   :  { %1894 = vmatpush1.bf16.msra.mxu1 %v8146_v35 }
 0x114   :  { %1895 = vmatprep.subr.bf16.mxu1 %v7447_v2 }
 0x115   :  { %1614 = vmatpush1.bf16.msra.mxu0 %v8155_v38 }
 0x116   :  { %1615 = vmatprep.subr.bf16.mxu0 %v7447_v2 }
 0x117   :  { %1896 = vmatpush1.bf16.msra.mxu1 %v8155_v38 }
 0x118   :  { %1897 = vmatprep.subr.bf16.mxu1 %v7447_v2 }
 0x119   :  { %1616 = vmatpush1.bf16.msra.mxu0 %v8165_v39 }
 0x11a   :  { %1617 = vmatprep.subr.bf16.mxu0 %v7447_v2 }
 0x11b   :  { %v469_v41 = vpop.f32.mrb[8].mxu0  ;;  %1898 = vmatpush1.bf16.msra.mxu1 %v8165_v39 }
 0x11c   :  { %v470_v42 = vadd.f32 %v469_v41, %v422_v27  ;;  %v6624_v43 = vpop.f32.mrb[9].mxu0  ;;  %1899 = vmatprep.subr.bf16.mxu1 %v7447_v2 }
 0x11d   :  { %v513_v44 = vpop.f32.mrb[8].mxu1  ;;  %v472_v45 = vpop.f32.mrb[10].mxu0  ;;  %1618 = vmatpush1.bf16.msra.mxu0 %v8174_v40 }
 0x11e   :  { %v519_v47 = vadd.f32 %v513_v44, %v470_v42  ;;  %v6625_v48 = vpop.f32.mrb[11].mxu0  ;;  %v6638_v49 = vpop.f32.mrb[9].mxu1  ;;  %1619 = vmatprep.subr.bf16.mxu0 %v7447_v2 }
 0x11f   :  { %v516_v50 = vpop.f32.mrb[10].mxu1  ;;  %1900 = vmatpush1.bf16.msra.mxu1 %v8174_v40 }
 0x120   :  { %v520_v51 = vadd.f32 %v8126_v22, %v519_v47  ;;  %v6639_v52 = vpop.f32.mrb[11].mxu1  ;;  %1901 = vmatprep.subr.bf16.mxu1 %v7447_v2 }
 0x121   :  { %1620 = vmatpush1.bf16.msra.mxu0 %v8183_v46 }
 0x122   :  { %v521_v53 = vmax.f32 %v520_v51, 0.0  ;;  %1710 = vmatprep.subr.bf16.mxu0 %v7447_v2 }
 0x123   :  { %1902 = vmatpush1.bf16.msra.mxu1 %v8183_v46 }
 0x124   :  { %v6252_v54 = vpack.c.bf16 %v521_v53, %v521_v53  ;;  %1973 = vmatprep.subr.bf16.mxu1 %v7447_v2 }
 0x126   :  { %v526_v55 = vrot.slane %v6252_v54, 6 }
 0x128   :  { %527 = vrot.lane.b32.xlu0 %v526_v55, %s7448_s21 }
 0x12f   :  { %v579_v56 = vpop.f32.mrb[12].mxu0 }
 0x130   :  { %v6652_v57 = vpop.f32.mrb[13].mxu0 }
 0x131   :  { %v582_v58 = vpop.f32.mrb[14].mxu0  ;;  %v622_v59 = vpop.f32.mrb[12].mxu1 }
 0x132   :  { %v623_v60 = vadd.f32 %v622_v59, %v579_v56  ;;  %v6653_v61 = vpop.f32.mrb[15].mxu0  ;;  %v6666_v62 = vpop.f32.mrb[13].mxu1 }
 0x133   :  { %v625_v63 = vpop.f32.mrb[14].mxu1 }
 0x134   :  { %v6667_v0 = vpop.f32.mrb[15].mxu1 }
 0x143   :  { %v670_v3 = vpop.f32.mrb[16].mxu0 }
 0x144   :  { %v676_v4 = vadd.f32 %v670_v3, %v623_v60  ;;  %v6680_v5 = vpop.f32.mrb[17].mxu0 }
 0x145   :  { %v673_v6 = vpop.f32.mrb[18].mxu0  ;;  %v736_v7 = vpop.f32.mrb[16].mxu1  ;;  %v8208_v5 = vld [vmem:[#allocation2] sm:$0x11] }
 0x146   :  { %v677_v8 = vadd.f32 %v8126_v22, %v676_v4  ;;  %v6681_v9 = vpop.f32.mrb[19].mxu0  ;;  %v6694_v10 = vpop.f32.mrb[17].mxu1 }
 0x147   :  { %v739_v11 = vpop.f32.mrb[18].mxu1  ;;  %v8213_v10 = vld [vmem:[%s9800_s4] sm:$0xff]  }
 0x148   :  { %v678_v12 = vmax.f32 %v677_v8, 0.0  ;;  %v6695_v14 = vpop.f32.mrb[19].mxu1  ;;  %v5749_v11 = vcombine.high %v8208_v5, %v8208_v5 }
 0x14a   :  { %v6253_v15 = vpack.c.bf16 %v678_v12, %v678_v12 }
 0x14c   :  { %v683_v16 = vrot.slane %v6253_v15, 5 }
 0x14e   :  { %684 = vrot.lane.b32.xlu1 %v683_v16, %s7448_s21 }
 0x157   :  { %v783_v17 = vpop.f32.mrb[20].mxu0 }
 0x158   :  { %v784_v19 = vadd.f32 %v783_v17, %v736_v7  ;;  %v6708_v23 = vpop.f32.mrb[21].mxu0 }
 0x159   :  { %v827_v24 = vpop.f32.mrb[20].mxu1  ;;  %v786_v25 = vpop.f32.mrb[22].mxu0 }
 0x15a   :  { %v833_v26 = vadd.f32 %v827_v24, %v784_v19  ;;  %v6709_v27 = vpop.f32.mrb[23].mxu0  ;;  %v6722_v29 = vpop.f32.mrb[21].mxu1  ;;  %v8222_v19 = vld [vmem:[%s9800_s4 + $0x8] sm:$0xff]  }
 0x15b   :  { %v830_v30 = vpop.f32.mrb[22].mxu1 }
 0x15c   :  { %v834_v31 = vadd.f32 %v8126_v22, %v833_v26  ;;  %v6723_v32 = vpop.f32.mrb[23].mxu1  ;;  %v8231_v30 = vld [vmem:[%s9800_s4 + $0x10] sm:$0xff]  }
 0x15e   :  { %v835_v33 = vmax.f32 %v834_v31, 0.0 }
 0x160   :  { %v6254_v34 = vpack.c.bf16 %v835_v33, %v835_v33 }
 0x162   :  { %840 = vrot.lane.b32.xlu1 %v6254_v34, %s7448_s21 }
 0x16b   :  { %v892_v36 = vpop.f32.mrb[24].mxu0 }
 0x16c   :  { %v6736_v37 = vpop.f32.mrb[25].mxu0 }
 0x16d   :  { %v895_v41 = vpop.f32.mrb[26].mxu0  ;;  %v935_v42 = vpop.f32.mrb[24].mxu1 }
 0x16e   :  { %v936_v43 = vadd.f32 %v935_v42, %v892_v36  ;;  %v6737_v44 = vpop.f32.mrb[27].mxu0  ;;  %v6750_v45 = vpop.f32.mrb[25].mxu1  ;;  %v8244_v41 = vld [vmem:[%s9800_s4 + $0x18] sm:$0xff]  }
 0x16f   :  { %v938_v47 = vpop.f32.mrb[26].mxu1  ;;  %v8261_v44 = vld [vmem:[%s9800_s4 + $0x28] sm:$0xff]  }
 0x170   :  { %v6751_v48 = vpop.f32.mrb[27].mxu1 }
 0x17f   :  { %v983_v49 = vpop.f32.mrb[28].mxu0 }
 0x180   :  { %v989_v50 = vadd.f32 %v983_v49, %v936_v43  ;;  %v6764_v51 = vpop.f32.mrb[29].mxu0  ;;  %v8254_v43 = vld [vmem:[%s9800_s4 + $0x20] sm:$0xff]  }
 0x181   :  { %v986_v52 = vpop.f32.mrb[30].mxu0  ;;  %v1046_v53 = vpop.f32.mrb[28].mxu1 }
 0x182   :  { %v990_v54 = vadd.f32 %v8126_v22, %v989_v50  ;;  %v6765_v55 = vpop.f32.mrb[31].mxu0  ;;  %v6778_v56 = vpop.f32.mrb[29].mxu1  ;;  %v8268_v50 = vld [vmem:[%s9800_s4 + $0x30] sm:$0xff]  }
 0x183   :  { %v1049_v57 = vpop.f32.mrb[30].mxu1  ;;  %v8275_v56 = vld [vmem:[%s9800_s4 + $0x38] sm:$0xff]  }
 0x184   :  { %v991_v58 = vmax.f32 %v990_v54, 0.0  ;;  %v370_v59 = vpop.permute.xlu0 %369  ;;  %v6779_v60 = vpop.f32.mrb[31].mxu1  ;;  %v8282_v57 = vld [vmem:[%s9800_s4 + $0x40] sm:$0xff]  }
 0x185   :  { %v371_v62 = vrot.slane %v370_v59, 4 }
 0x186   :  { %v6255_v63 = vpack.c.bf16 %v991_v58, %v991_v58 }
 0x187   :  { %v373_v0 = vsel %vm9791_vm7, %v371_v62, %v370_v59  ;;  %v8291_v59 = vld [vmem:[%s9800_s4 + $0x48] sm:$0xff]   ;;  %v5748_v62 = vcombine.low %v8208_v5, %v8208_v5 }
 0x188   :  { %378 = vst.msk [vmem:[#allocation2] sm:$0x22] %vm8200_vm8, %v373_v0  ;;  %v996_v3 = vrot.slane %v6255_v63, 7  ;;  %v8302_v63 = vld [vmem:[%s9800_s4 + $0xa0] sm:$0xff]   ;;  %v8314_v5 = vld [vmem:[%s9800_s4 + $0xa8] sm:$0xff]  }
 0x18a   :  { %997 = vrot.lane.b32.xlu0 %v996_v3, %s7448_s21 }
 0x18f   :  { %v1528_v4 = vld [vmem:[#allocation2] sm:$0x22] }
 0x190   :  { %v5736_v6 = vcombine.high %v1528_v4, %v1528_v4  ;;  %v5735_v7 = vcombine.low %v1528_v4, %v1528_v4 }
 0x192   :  { %v1535_v8 = vrot.slane %v5736_v6, 1  ;;  %v1534_v9 = vrot.slane %v5735_v7, 1 }
 0x193   :  { %v1093_v12 = vpop.f32.mrb[32].mxu0 }
 0x194   :  { %5747 = vmatprep.mubr.msk.bf16.mxu0 %vm1597_vm9, %v1535_v8  ;;  %v1094_v14 = vadd.f32 %v1093_v12, %v1046_v53  ;;  %v6792_v15 = vpop.f32.mrb[33].mxu0 }
 0x195   :  { %1634 = vmatmul.mubr.bf16.vlgmr.msra.gmra.mrb[48].mxu0 %v1534_v9  ;;  %v1137_v16 = vpop.f32.mrb[32].mxu1  ;;  %v1096_v17 = vpop.f32.mrb[34].mxu0 }
 0x196   :  { %1711 = vmatpush1.bf16.msra.mxu0 %v8213_v10  ;;  %v1143_v23 = vadd.f32 %v1137_v16, %v1094_v14  ;;  %v6793_v24 = vpop.f32.mrb[35].mxu0  ;;  %v6806_v25 = vpop.f32.mrb[33].mxu1  ;;  %5760 = vmatprep.mubr.msk.bf16.mxu0 %vm1597_vm9, %v5749_v11 }
 0x197   :  { %1712 = vmatprep.subr.bf16.mxu0 %v7447_v2  ;;  %v1140_v26 = vpop.f32.mrb[34].mxu1 }
 0x198   :  { %v1144_v27 = vadd.f32 %v8126_v22, %v1143_v23  ;;  %v6807_v29 = vpop.f32.mrb[35].mxu1  ;;  %v8326_v26 = vld [vmem:[%s9800_s4 + $0xb0] sm:$0xff]  }
 0x19a   :  { %1713 = vmatpush1.bf16.msra.mxu0 %v8222_v19  ;;  %v1145_v31 = vmax.f32 %v1144_v27, 0.0  ;;  %v528_v32 = vpop.permute.xlu0 %527 }
 0x19b   :  { %1714 = vmatprep.subr.bf16.mxu0 %v7447_v2  ;;  %v529_v34 = vrot.slane %v528_v32, 4 }
 0x19c   :  { %v6256_v36 = vpack.c.bf16 %v1145_v31, %v1145_v31  ;;  %v8337_v31 = vld [vmem:[%s9800_s4 + $0xb8] sm:$0xff]  }
 0x19d   :  { %v530_v37 = vsel %vm9791_vm7, %v529_v34, %v528_v32  ;;  %v8344_v32 = vld [vmem:[%s9800_s4 + $0xc0] sm:$0xff]  }
 0x19e   :  { %1715 = vmatpush1.bf16.msra.mxu0 %v8231_v30  ;;  %535 = vst.msk [vmem:[#allocation2] sm:$0x44] %vm8235_vm12, %v530_v37  ;;  %v1150_v42 = vrot.slane %v6256_v36, 6 }
 0x19f   :  { %1716 = vmatprep.subr.bf16.mxu0 %v7447_v2 }
 0x1a0   :  { %1151 = vrot.lane.b32.xlu1 %v1150_v42, %s7448_s21 }
 0x1a2   :  { %1717 = vmatpush1.bf16.msra.mxu0 %v8244_v41 }
 0x1a3   :  { %1718 = vmatprep.subr.bf16.mxu0 %v7447_v2 }
 0x1a5   :  { %v8285_v58 = vld [vmem:[#allocation2] sm:$0x44] }
 0x1a6   :  { %1719 = vmatpush1.bf16.msra.mxu0 %v8254_v43  ;;  %v5762_v60 = vcombine.high %v8285_v58, %v8285_v58 }
 0x1a7   :  { %1720 = vmatprep.subr.bf16.mxu0 %v7447_v2  ;;  %v1200_v45 = vpop.f32.mrb[36].mxu0 }
 0x1a8   :  { %v6820_v47 = vpop.f32.mrb[37].mxu0  ;;  %v8304_v0 = vrot.slane %v5762_v60, 2 }
 0x1a9   :  { %v1203_v48 = vpop.f32.mrb[38].mxu0  ;;  %v1243_v49 = vpop.f32.mrb[36].mxu1 }
 0x1aa   :  { %1721 = vmatpush1.bf16.msra.mxu0 %v8261_v44  ;;  %v1244_v51 = vadd.f32 %v1243_v49, %v1200_v45  ;;  %v6821_v52 = vpop.f32.mrb[39].mxu0  ;;  %v6834_v53 = vpop.f32.mrb[37].mxu1  ;;  %v8351_v45 = vld [vmem:[%s9800_s4 + $0xc8] sm:$0xff]  }
 0x1ab   :  { %1722 = vmatprep.subr.bf16.mxu0 %v7447_v2  ;;  %v1246_v54 = vpop.f32.mrb[38].mxu1 }
 0x1ac   :  { %v6835_v55 = vpop.f32.mrb[39].mxu1  ;;  %v8360_v54 = vld [vmem:[%s9800_s4 + $0xd0] sm:$0xff]  }
 0x1ae   :  { %1723 = vmatpush1.bf16.msra.mxu0 %v8268_v50 }
 0x1af   :  { %1724 = vmatprep.subr.bf16.mxu0 %v7447_v2 }
 0x1b2   :  { %1725 = vmatpush1.bf16.msra.mxu0 %v8275_v56 }
 0x1b3   :  { %1726 = vmatprep.subr.bf16.mxu0 %v7447_v2 }
 0x1b6   :  { %1727 = vmatpush1.bf16.msra.mxu0 %v8282_v57 }
 0x1b7   :  { %1728 = vmatprep.subr.bf16.mxu0 %v7447_v2 }
 0x1ba   :  { %1729 = vmatpush1.bf16.msra.mxu0 %v8291_v59 }
 0x1bb   :  { %v1291_v3 = vpop.f32.mrb[40].mxu0  ;;  %1822 = vmatprep.subr.bf16.mxu0 %v7447_v2 }
 0x1bc   :  { %v1297_v4 = vadd.f32 %v1291_v3, %v1244_v51  ;;  %v6848_v6 = vpop.f32.mrb[41].mxu0 }
 0x1bd   :  { %1743 = vmatmul.mubr.bf16.vlgmr.msra.gmra.mrb[52].mxu0 %v5748_v62  ;;  %v1294_v7 = vpop.f32.mrb[42].mxu0  ;;  %v1354_v8 = vpop.f32.mrb[40].mxu1 }
 0x1be   :  { %v1298_v9 = vadd.f32 %v8126_v22, %v1297_v4  ;;  %1823 = vmatpush1.bf16.msra.mxu0 %v8302_v63  ;;  %5773 = vmatprep.mubr.msk.bf16.mxu0 %vm1597_vm9, %v8304_v0  ;;  %v6849_v11 = vpop.f32.mrb[43].mxu0  ;;  %v6862_v12 = vpop.f32.mrb[41].mxu1 }
 0x1bf   :  { %1824 = vmatprep.subr.bf16.mxu0 %v7447_v2  ;;  %v1357_v14 = vpop.f32.mrb[42].mxu1  ;;  %v8375_v11 = vld [vmem:[%s9800_s4 + $0xd8] sm:$0xff]  }
 0x1c0   :  { %v1299_v15 = vmax.f32 %v1298_v9, 0.0  ;;  %v685_v16 = vpop.permute.xlu1 %684  ;;  %v6863_v17 = vpop.f32.mrb[43].mxu1 }
 0x1c1   :  { %v686_v24 = vrot.slane %v685_v16, 4  ;;  %v5761_v17 = vcombine.low %v8285_v58, %v8285_v58 }
 0x1c2   :  { %v6257_v25 = vpack.c.bf16 %v1299_v15, %v1299_v15  ;;  %1825 = vmatpush1.bf16.msra.mxu0 %v8314_v5  ;;  %v8387_v15 = vld [vmem:[%s9800_s4 + $0xe0] sm:$0xff]  }
 0x1c3   :  { %v687_v27 = vsel %vm9791_vm7, %v686_v24, %v685_v16  ;;  %1826 = vmatprep.subr.bf16.mxu0 %v7447_v2  ;;  %v8397_v16 = vld [vmem:[%s9800_s4 + $0xe8] sm:$0xff]   ;;  %s5599_s4 = sshll.u32 %s7454_s3, 4  ;;  %s5600_s4 = int_to_ptr.vmem [resolvable:$true] %s5599_s4 }
 0x1c4   :  { %692 = vst.msk [vmem:[#allocation2] sm:$0x88] %vm8318_vm15, %v687_v27  ;;  %v1304_v29 = vrot.slane %v6257_v25, 5  ;;  %v1756_v27 = vrot.slane %v5761_v17, 2 }
 0x1c6   :  { %1827 = vmatpush1.bf16.msra.mxu0 %v8326_v26  ;;  %1305 = vrot.lane.b32.xlu0 %v1304_v29, %s7448_s21 }
 0x1c7   :  { %1828 = vmatprep.subr.bf16.mxu0 %v7447_v2 }
 0x1ca   :  { %1829 = vmatpush1.bf16.msra.mxu0 %v8337_v31 }
 0x1cb   :  { %1830 = vmatprep.subr.bf16.mxu0 %v7447_v2  ;;  %v1871_v34 = vld [vmem:[#allocation2] sm:$0x88] }
 0x1cc   :  { %v5776_v36 = vcombine.high %v1871_v34, %v1871_v34  ;;  %v5775_v37 = vcombine.low %v1871_v34, %v1871_v34 }
 0x1ce   :  { %1831 = vmatpush1.bf16.msra.mxu0 %v8344_v32  ;;  %v1878_v42 = vrot.slane %v5776_v36, 3  ;;  %v1877_v47 = vrot.slane %v5775_v37, 3 }
 0x1cf   :  { %1832 = vmatprep.subr.bf16.mxu0 %v7447_v2  ;;  %v1401_v48 = vpop.f32.mrb[44].mxu0 }
 0x1d0   :  { %5777 = vmatprep.mubr.msk.bf16.mxu1 %vm1597_vm9, %v1878_v42  ;;  %v1402_v49 = vadd.f32 %v1401_v48, %v1354_v8  ;;  %v6876_v51 = vpop.f32.mrb[45].mxu0  ;;  %v7070_v8 = vld [vmem:[%s9768_s6 + $0x68] sm:$0xff]  }
 0x1d1   :  { %1916 = vmatmul.mubr.bf16.vlgmr.msra.gmra.mrb[48].mxu1 %v1877_v47  ;;  %v1445_v52 = vpop.f32.mrb[44].mxu1  ;;  %v1404_v53 = vpop.f32.mrb[46].mxu0 }
 0x1d2   :  { %1833 = vmatpush1.bf16.msra.mxu0 %v8351_v45  ;;  %1974 = vmatpush1.bf16.msra.mxu1 %v8302_v63  ;;  %v1451_v55 = vadd.f32 %v1445_v52, %v1402_v49  ;;  %v6877_v60 = vpop.f32.mrb[47].mxu0  ;;  %v6890_v62 = vpop.f32.mrb[45].mxu1 }
 0x1d3   :  { %1834 = vmatprep.subr.bf16.mxu0 %v7447_v2  ;;  %1975 = vmatprep.subr.bf16.mxu1 %v7447_v2  ;;  %v1448_v3 = vpop.f32.mrb[46].mxu1 }
 0x1d4   :  { %v1452_v4 = vadd.f32 %v8126_v22, %v1451_v55  ;;  %v841_v6 = vpop.permute.xlu1 %840  ;;  %v6891_v7 = vpop.f32.mrb[47].mxu1 }
 0x1d5   :  { %v842_v9 = vrot.slane %v841_v6, 4 }
 0x1d6   :  { %1835 = vmatpush1.bf16.msra.mxu0 %v8360_v54  ;;  %1976 = vmatpush1.bf16.msra.mxu1 %v8314_v5  ;;  %v1453_v12 = vmax.f32 %v1452_v4, 0.0 }
 0x1d7   :  { %1836 = vmatprep.subr.bf16.mxu0 %v7447_v2  ;;  %1977 = vmatprep.subr.bf16.mxu1 %v7447_v2  ;;  %v843_v22 = vsel %vm9791_vm7, %v842_v9, %v841_v6  ;;  %v7069_v6 = vld [vmem:[%s9768_s6 + $0x20] sm:$0xff]   ;;  %v7071_v9 = vld [vmem:[%s9768_s6 + $0x28] sm:$0xff]  }
 0x1d8   :  { %v6258_v14 = vpack.c.bf16 %v1453_v12, %v1453_v12  ;;  %848 = vst.msk [vmem:[#allocation2 + $0x8] sm:$0x11] %vm8366_vm3, %v843_v22  ;;  %v7073_v12 = vld [vmem:[%s9768_s6 + $0x30] sm:$0xff]   ;;  %v7074_v22 = vld [vmem:[%s9768_s6 + $0x78] sm:$0xff]  }
 0x1da   :  { %1837 = vmatpush1.bf16.msra.mxu0 %v8375_v11  ;;  %1978 = vmatpush1.bf16.msra.mxu1 %v8326_v26 }
 0x1db   :  { %1838 = vmatprep.subr.bf16.mxu0 %v7447_v2  ;;  %1979 = vmatprep.subr.bf16.mxu1 %v7447_v2 }
 0x1dc   :  { %1458 = vrot.lane.b32.xlu1 %v6258_v14, %s7448_s21  ;;  %v7075_v14 = vld [vmem:[%s9768_s6 + $0x38] sm:$0xff]  }
 0x1de   :  { %1839 = vmatpush1.bf16.msra.mxu0 %v8387_v15  ;;  %1980 = vmatpush1.bf16.msra.mxu1 %v8337_v31 }
 0x1df   :  { %1840 = vmatprep.subr.bf16.mxu0 %v7447_v2  ;;  %1981 = vmatprep.subr.bf16.mxu1 %v7447_v2  ;;  %v1963_v24 = vld [vmem:[#allocation2 + $0x8] sm:$0x11] }
 0x1e0   :  { %v5780_v25 = vcombine.high %v1963_v24, %v1963_v24  ;;  %v5779_v58 = vcombine.low %v1963_v24, %v1963_v24 }
 0x1e2   :  { %1841 = vmatpush1.bf16.msra.mxu0 %v8397_v16  ;;  %1982 = vmatpush1.bf16.msra.mxu1 %v8344_v32 }
 0x1e3   :  { %1923 = vmatprep.subr.bf16.mxu0 %v7447_v2  ;;  %1983 = vmatprep.subr.bf16.mxu1 %v7447_v2 }
 0x1e4   :  { %5781 = vmatprep.mubr.msk.bf16.mxu1 %vm1597_vm9, %v5780_v25 }
 0x1e5   :  { %1855 = vmatmul.mubr.bf16.vlgmr.msra.gmra.mrb[56].mxu0 %v1756_v27 }
 0x1e6   :  { %1924 = vmatpush1.bf16.msra.mxu0 %v8213_v10  ;;  %5778 = vmatprep.mubr.msk.bf16.mxu0 %vm1597_vm9, %v8304_v0 }
 0x1e7   :  { %1984 = vmatpush1.bf16.msra.mxu1 %v8351_v45  ;;  %1925 = vmatprep.subr.bf16.mxu0 %v7447_v2 }
 0x1e8   :  { %1985 = vmatprep.subr.bf16.mxu1 %v7447_v2 }
 0x1ea   :  { %1926 = vmatpush1.bf16.msra.mxu0 %v8222_v19 }
 0x1eb   :  { %1986 = vmatpush1.bf16.msra.mxu1 %v8360_v54  ;;  %1927 = vmatprep.subr.bf16.mxu0 %v7447_v2 }
 0x1ec   :  { %1987 = vmatprep.subr.bf16.mxu1 %v7447_v2 }
 0x1ee   :  { %1928 = vmatpush1.bf16.msra.mxu0 %v8231_v30 }
 0x1ef   :  { %1988 = vmatpush1.bf16.msra.mxu1 %v8375_v11  ;;  %1929 = vmatprep.subr.bf16.mxu0 %v7447_v2 }
 0x1f0   :  { %1989 = vmatprep.subr.bf16.mxu1 %v7447_v2 }
 0x1f2   :  { %1930 = vmatpush1.bf16.msra.mxu0 %v8244_v41 }
 0x1f3   :  { %1990 = vmatpush1.bf16.msra.mxu1 %v8387_v15  ;;  %1931 = vmatprep.subr.bf16.mxu0 %v7447_v2 }
 0x1f4   :  { %1991 = vmatprep.subr.bf16.mxu1 %v7447_v2 }
 0x1f6   :  { %1932 = vmatpush1.bf16.msra.mxu0 %v8254_v43 }
 0x1f7   :  { %1992 = vmatpush1.bf16.msra.mxu1 %v8397_v16  ;;  %1933 = vmatprep.subr.bf16.mxu0 %v7447_v2 }
 0x1f8   :  { %2068 = vmatprep.subr.bf16.mxu1 %v7447_v2 }
 0x1fa   :  { %2006 = vmatmul.mubr.bf16.vlgmr.msra.gmra.mrb[52].mxu1 %v5779_v58  ;;  %1934 = vmatpush1.bf16.msra.mxu0 %v8261_v44 }
 0x1fb   :  { %2069 = vmatpush1.bf16.msra.mxu1 %v8213_v10  ;;  %5785 = vmatprep.mubr.msk.bf16.mxu1 %vm1597_vm9, %v5780_v25 }
 0x1fc   :  { %1935 = vmatprep.subr.bf16.mxu0 %v7447_v2  ;;  %2070 = vmatprep.subr.bf16.mxu1 %v7447_v2  ;;  %v998_v0 = vpop.permute.xlu0 %997 }
 0x1fd   :  { %v999_v29 = vrot.slane %v998_v0, 4 }
 0x1fe   :  { %1936 = vmatpush1.bf16.msra.mxu0 %v8268_v50 }
 0x1ff   :  { %2071 = vmatpush1.bf16.msra.mxu1 %v8222_v19  ;;  %v1000_v34 = vsel %vm9791_vm7, %v999_v29, %v998_v0  ;;  %1937 = vmatprep.subr.bf16.mxu0 %v7447_v2 }
 0x200   :  { %1002 = vst.msk [vmem:[#allocation2 + $0x8] sm:$0x22] %vm8200_vm8, %v1000_v34  ;;  %2072 = vmatprep.subr.bf16.mxu1 %v7447_v2  ;;  %v7076_v34 = vld [vmem:[%s9768_s6 + $0xc0] sm:$0xff]   ;;  %vm9787_vm8 = vcmask 123904  }
 0x202   :  { %1938 = vmatpush1.bf16.msra.mxu0 %v8275_v56 }
 0x203   :  { %2073 = vmatpush1.bf16.msra.mxu1 %v8231_v30  ;;  %1939 = vmatprep.subr.bf16.mxu0 %v7447_v2 }
 0x204   :  { %2074 = vmatprep.subr.bf16.mxu1 %v7447_v2 }
 0x206   :  { %1940 = vmatpush1.bf16.msra.mxu0 %v8282_v57 }
 0x207   :  { %2075 = vmatpush1.bf16.msra.mxu1 %v8244_v41  ;;  %1941 = vmatprep.subr.bf16.mxu0 %v7447_v2  ;;  %v2016_v36 = vld [vmem:[#allocation2 + $0x8] sm:$0x22] }
 0x208   :  { %2076 = vmatprep.subr.bf16.mxu1 %v7447_v2  ;;  %v5783_v61 = vcombine.high %v2016_v36, %v2016_v36 }
 0x20a   :  { %1942 = vmatpush1.bf16.msra.mxu0 %v8291_v59  ;;  %v2023_v37 = vrot.slane %v5783_v61, 1  ;;  %v7078_v61 = vld [vmem:[%s9768_s6 + $0xc8] sm:$0xff]  }
 0x20b   :  { %2077 = vmatpush1.bf16.msra.mxu1 %v8254_v43  ;;  %2028 = vmatprep.subr.bf16.mxu0 %v7447_v2 }
 0x20c   :  { %2078 = vmatprep.subr.bf16.mxu1 %v7447_v2 }
 0x20d   :  { %1956 = vmatmul.mubr.bf16.vlgmr.msra.gmra.mrb[60].mxu0 %v1756_v27 }
 0x20e   :  { %2029 = vmatpush1.bf16.msra.mxu0 %v8087_v18  ;;  %5784 = vmatprep.mubr.msk.bf16.mxu0 %vm1597_vm9, %v2023_v37  ;;  %v7079_v37 = vld [vmem:[%s9768_s6 + $0x88] sm:$0xff]  }
 0x20f   :  { %2079 = vmatpush1.bf16.msra.mxu1 %v8261_v44  ;;  %2030 = vmatprep.subr.bf16.mxu0 %v7447_v2 }
 0x210   :  { %2080 = vmatprep.subr.bf16.mxu1 %v7447_v2 }
 0x212   :  { %2031 = vmatpush1.bf16.msra.mxu0 %v8100_v13  ;;  %v1152_v42 = vpop.permute.xlu1 %1151 }
 0x213   :  { %2081 = vmatpush1.bf16.msra.mxu1 %v8268_v50  ;;  %2032 = vmatprep.subr.bf16.mxu0 %v7447_v2  ;;  %v1153_v47 = vrot.slane %v1152_v42, 4 }
 0x214   :  { %2082 = vmatprep.subr.bf16.mxu1 %v7447_v2 }
 0x215   :  { %v1154_v48 = vsel %vm9791_vm7, %v1153_v47, %v1152_v42  ;;  %v7080_v42 = vld [vmem:[%s9768_s6 + $0xd0] sm:$0xff]  }
 0x216   :  { %2033 = vmatpush1.bf16.msra.mxu0 %v8110_v20  ;;  %1156 = vst.msk [vmem:[#allocation2 + $0x8] sm:$0x44] %vm8235_vm12, %v1154_v48  ;;  %v7081_v47 = vld [vmem:[%s9768_s6 + $0x90] sm:$0xff]   ;;  %v7082_v48 = vld [vmem:[%s9768_s6 + $0xd8] sm:$0xff]   ;;  %vm75_vm12 = vcmask 519168  }
 0x217   :  { %2083 = vmatpush1.bf16.msra.mxu1 %v8275_v56  ;;  %2034 = vmatprep.subr.bf16.mxu0 %v7447_v2 }
 0x218   :  { %2084 = vmatprep.subr.bf16.mxu1 %v7447_v2 }
 0x21a   :  { %2035 = vmatpush1.bf16.msra.mxu0 %v8119_v21 }
 0x21b   :  { %2085 = vmatpush1.bf16.msra.mxu1 %v8282_v57  ;;  %2036 = vmatprep.subr.bf16.mxu0 %v7447_v2 }
 0x21c   :  { %2086 = vmatprep.subr.bf16.mxu1 %v7447_v2 }
 0x21d   :  { %v8490_v33 = vld [vmem:[#allocation2 + $0x8] sm:$0x44] }
 0x21e   :  { %2037 = vmatpush1.bf16.msra.mxu0 %v8136_v28 }
 0x21f   :  { %2087 = vmatpush1.bf16.msra.mxu1 %v8291_v59  ;;  %2038 = vmatprep.subr.bf16.mxu0 %v7447_v2 }
 0x220   :  { %2175 = vmatprep.subr.bf16.mxu1 %v7447_v2 }
 0x222   :  { %2101 = vmatmul.mubr.bf16.vlgmr.msra.gmra.mrb[56].mxu1 %v5779_v58  ;;  %2039 = vmatpush1.bf16.msra.mxu0 %v8146_v35 }
 0x223   :  { %2176 = vmatpush1.bf16.msra.mxu1 %v8087_v18  ;;  %2040 = vmatprep.subr.bf16.mxu0 %v7447_v2  ;;  %v5787_v18 = vcombine.high %v8490_v33, %v8490_v33 }
 0x224   :  { %2177 = vmatprep.subr.bf16.mxu1 %v7447_v2 }
 0x226   :  { %2041 = vmatpush1.bf16.msra.mxu0 %v8155_v38 }
 0x227   :  { %2178 = vmatpush1.bf16.msra.mxu1 %v8100_v13  ;;  %2042 = vmatprep.subr.bf16.mxu0 %v7447_v2  ;;  %v5782_v13 = vcombine.low %v2016_v36, %v2016_v36  ;;  %v7077_v36 = vld [vmem:[%s9768_s6 + $0x80] sm:$0xff]  }
 0x228   :  { %2179 = vmatprep.subr.bf16.mxu1 %v7447_v2 }
 0x229   :  { %v2022_v49 = vrot.slane %v5782_v13, 1  ;;  %v7083_v13 = vld [vmem:[%s9768_s6 + $0x98] sm:$0xff]  }
 0x22a   :  { %2043 = vmatpush1.bf16.msra.mxu0 %v8165_v39 }
 0x22b   :  { %2180 = vmatpush1.bf16.msra.mxu1 %v8110_v20  ;;  %2044 = vmatprep.subr.bf16.mxu0 %v7447_v2  ;;  %v8500_v20 = vrot.slane %v5787_v18, 2 }
 0x22c   :  { %2181 = vmatprep.subr.bf16.mxu1 %v7447_v2 }
 0x22e   :  { %2045 = vmatpush1.bf16.msra.mxu0 %v8174_v40 }
 0x22f   :  { %2182 = vmatpush1.bf16.msra.mxu1 %v8119_v21  ;;  %2046 = vmatprep.subr.bf16.mxu0 %v7447_v2 }
 0x230   :  { %2183 = vmatprep.subr.bf16.mxu1 %v7447_v2 }
 0x232   :  { %2047 = vmatpush1.bf16.msra.mxu0 %v8183_v46 }
 0x233   :  { %2184 = vmatpush1.bf16.msra.mxu1 %v8136_v28  ;;  %2120 = vmatprep.subr.bf16.mxu0 %v7447_v2 }
 0x234   :  { %2185 = vmatprep.subr.bf16.mxu1 %v7447_v2 }
 0x235   :  { %2061 = vmatmul.mubr.bf16.vlgmr.msra.gmra.mrb[64].mxu0 %v2022_v49  ;;  %v7084_v49 = vld [vmem:[%s9768_s6 + $0xe0] sm:$0xff]  }
 0x236   :  { %2121 = vmatpush1.bf16.msra.mxu0 %v8302_v63  ;;  %5788 = vmatprep.mubr.msk.bf16.mxu0 %vm1597_vm9, %v8500_v20 }
 0x237   :  { %2186 = vmatpush1.bf16.msra.mxu1 %v8146_v35  ;;  %2122 = vmatprep.subr.bf16.mxu0 %v7447_v2 }
 0x238   :  { %v1306_v21 = vpop.permute.xlu0 %1305  ;;  %2187 = vmatprep.subr.bf16.mxu1 %v7447_v2 }
 0x239   :  { %v1307_v51 = vrot.slane %v1306_v21, 4 }
 0x23a   :  { %2123 = vmatpush1.bf16.msra.mxu0 %v8314_v5 }
 0x23b   :  { %v1308_v28 = vsel %vm9791_vm7, %v1307_v51, %v1306_v21  ;;  %2188 = vmatpush1.bf16.msra.mxu1 %v8155_v38  ;;  %2124 = vmatprep.subr.bf16.mxu0 %v7447_v2  ;;  %v7085_v51 = vld [vmem:[%s9768_s6 + $0xa0] sm:$0xff]  }
 0x23c   :  { %1310 = vst.msk [vmem:[#allocation2 + $0x8] sm:$0x88] %vm8318_vm15, %v1308_v28  ;;  %2189 = vmatprep.subr.bf16.mxu1 %v7447_v2  ;;  %v7086_v28 = vld [vmem:[%s9768_s6 + $0xe8] sm:$0xff]   ;;  %vm3288_vm15 = vcmask 1040640  }
 0x23d   :  { %vm8966_vm11 = vmor %vm9789_vm2, %vm3288_vm15  ;;  %vm3260_vm15 = vcmask 256002   ;;  %vm3276_vm2 = vcmask 1043715  }
 0x23e   :  { %2125 = vmatpush1.bf16.msra.mxu0 %v8326_v26  ;;  %vm8991_vm6 = vmor %vm3277_vm5, %vm3276_vm2 }
 0x23f   :  { %2190 = vmatpush1.bf16.msra.mxu1 %v8165_v39  ;;  %2126 = vmatprep.subr.bf16.mxu0 %v7447_v2  ;;  %v8528_v39 = vld [vmem:[#allocation3] sm:$0xff] }
 0x240   :  { %2191 = vmatprep.subr.bf16.mxu1 %v7447_v2  ;;  %78 = vst.msk [vmem:[#allocation3 + $0x14] sm:$0xf] %vm75_vm12, %v8528_v39  ;;  %76 = vst.msk [vmem:[#allocation3 + $0x8] sm:$0xf] %vm75_vm12, %v8528_v39  ;;  %vm3247_vm12 = vcmask 254977  }
 0x241   :  { %81 = vst.msk [vmem:[#allocation3 + $0x20] sm:$0x3] %vm9786_vm14, %v8528_v39  ;;  %vm3256_vm14 = vcmask 1042690  }
 0x242   :  { %2127 = vmatpush1.bf16.msra.mxu0 %v8337_v31 }
 0x243   :  { %2192 = vmatpush1.bf16.msra.mxu1 %v8174_v40  ;;  %2128 = vmatprep.subr.bf16.mxu0 %v7447_v2  ;;  %v2163_v35 = vld [vmem:[#allocation2 + $0x8] sm:$0x88] }
 0x244   :  { %2193 = vmatprep.subr.bf16.mxu1 %v7447_v2  ;;  %v5790_v38 = vcombine.high %v2163_v35, %v2163_v35  ;;  %v5789_v23 = vcombine.low %v2163_v35, %v2163_v35  ;;  %v7087_v35 = vld [vmem:[%s9768_s6 + $0xa8] sm:$0xff]  }
 0x246   :  { %2129 = vmatpush1.bf16.msra.mxu0 %v8344_v32  ;;  %v2170_v52 = vrot.slane %v5790_v38, 3  ;;  %v2169_v53 = vrot.slane %v5789_v23, 3  ;;  %v7088_v38 = vld [vmem:[%s9768_s6 + $0xf0] sm:$0xff]  }
 0x247   :  { %2194 = vmatpush1.bf16.msra.mxu1 %v8183_v46  ;;  %2130 = vmatprep.subr.bf16.mxu0 %v8528_v39  ;;  %v7089_v23 = vld [vmem:[%s9768_s6 + $0xb0] sm:$0xff]  }
 0x248   :  { %5791 = vmatprep.mubr.msk.bf16.mxu1 %vm1597_vm9, %v2170_v52  ;;  %2265 = vmatprep.subr.bf16.mxu1 %v8528_v39  ;;  %v7090_v52 = vld [vmem:[%s9768_s6 + $0xf8] sm:$0xff]  }
 0x24a   :  { %2131 = vmatpush1.bf16.msra.mxu0 %v8351_v45  ;;  %2208 = vmatmul.mubr.bf16.vlgmr.msra.gmra.mrb[60].mxu1 %v2169_v53  ;;  %v7091_v53 = vld [vmem:[%s9768_s6 + $0xb8] sm:$0xff]  }
 0x24b   :  { %2266 = vmatpush1.bf16.msra.mxu1 %v8302_v63  ;;  %2132 = vmatprep.subr.bf16.mxu0 %v8528_v39  ;;  %v5786_v63 = vcombine.low %v8490_v33, %v8490_v33 }
 0x24c   :  { %2267 = vmatprep.subr.bf16.mxu1 %v8528_v39 }
 0x24e   :  { %2133 = vmatpush1.bf16.msra.mxu0 %v8360_v54  ;;  %v1459_v2 = vpop.permute.xlu1 %1458 }
 0x24f   :  { %2268 = vmatpush1.bf16.msra.mxu1 %v8314_v5  ;;  %2134 = vmatprep.subr.bf16.mxu0 %v8528_v39  ;;  %v1460_v40 = vrot.slane %v1459_v2, 4 }
 0x250   :  { %2269 = vmatprep.subr.bf16.mxu1 %v8528_v39 }
 0x251   :  { %v1461_v46 = vsel %vm9791_vm7, %v1460_v40, %v1459_v2  ;;  %v5774_v2 = vld [vmem:[%s9767_s5] ss:$0 sm:$0xff] }
 0x252   :  { %2135 = vmatpush1.bf16.msra.mxu0 %v8375_v11  ;;  %1463 = vst.msk [vmem:[#allocation2 + $0x10] sm:$0x11] %vm8366_vm3, %v1461_v46  ;;  %vm3292_vm3 = vcmask 253952  }
 0x253   :  { %2270 = vmatpush1.bf16.msra.mxu1 %v8326_v26  ;;  %2136 = vmatprep.subr.bf16.mxu0 %v8528_v39  ;;  %v2114_v26 = vrot.slane %v5786_v63, 2 }
 0x254   :  { %2271 = vmatprep.subr.bf16.mxu1 %v8528_v39 }
 0x256   :  { %2137 = vmatpush1.bf16.msra.mxu0 %v8387_v15 }
 0x257   :  { %2272 = vmatpush1.bf16.msra.mxu1 %v8337_v31  ;;  %2138 = vmatprep.subr.bf16.mxu0 %v8528_v39 }
 0x258   :  { %2273 = vmatprep.subr.bf16.mxu1 %v8528_v39 }
 0x259   :  { %v2255_v5 = vld [vmem:[#allocation2 + $0x10] sm:$0x11] }
 0x25a   :  { %2139 = vmatpush1.bf16.msra.mxu0 %v8397_v16  ;;  %v5794_v55 = vcombine.high %v2255_v5, %v2255_v5 }
 0x25b   :  { %2274 = vmatpush1.bf16.msra.mxu1 %v8344_v32  ;;  %2215 = vmatprep.subr.bf16.mxu0 %v8528_v39 }
 0x25c   :  { %2275 = vmatprep.subr.bf16.mxu1 %v8528_v39  ;;  %5795 = vmatprep.mubr.msk.bf16.mxu1 %vm1597_vm9, %v5794_v55 }
 0x25d   :  { %2153 = vmatmul.mubr.bf16.vlgmr.msra.gmra.mrb[68].mxu0 %v2114_v26 }
 0x25e   :  { %2216 = vmatpush1.bf16.msra.mxu0 %v8213_v10  ;;  %5792 = vmatprep.mubr.msk.bf16.mxu0 %vm1597_vm9, %v8500_v20 }
 0x25f   :  { %2276 = vmatpush1.bf16.msra.mxu1 %v8351_v45  ;;  %2217 = vmatprep.subr.bf16.mxu0 %v8528_v39  ;;  %v7067_v45 = vld [vmem:[%s9768_s6 + $0x18] sm:$0xff]  }
 0x260   :  { %2277 = vmatprep.subr.bf16.mxu1 %v8528_v39 }
 0x262   :  { %2218 = vmatpush1.bf16.msra.mxu0 %v8222_v19 }
 0x263   :  { %2278 = vmatpush1.bf16.msra.mxu1 %v8360_v54  ;;  %2219 = vmatprep.subr.bf16.mxu0 %v8528_v39  ;;  %v7068_v54 = vld [vmem:[%s9768_s6 + $0x60] sm:$0xff]  }
 0x264   :  { %2279 = vmatprep.subr.bf16.mxu1 %v8528_v39 }
 0x266   :  { %2220 = vmatpush1.bf16.msra.mxu0 %v8231_v30  ;;  %v5793_v30 = vcombine.low %v2255_v5, %v2255_v5 }
 0x267   :  { %2280 = vmatpush1.bf16.msra.mxu1 %v8375_v11  ;;  %2221 = vmatprep.subr.bf16.mxu0 %v8528_v39  ;;  %v7072_v11 = vld [vmem:[%s9768_s6 + $0x70] sm:$0xff]  }
 0x268   :  { %v1635_v10 = vpop.f32.mrb[48].mxu0  ;;  %2281 = vmatprep.subr.bf16.mxu1 %v8528_v39 }
 0x269   :  { %v1637_v31 = vpop.f32.mrb[49].mxu0 }
 0x26a   :  { %2222 = vmatpush1.bf16.msra.mxu0 %v8244_v41  ;;  %v1638_v32 = vpop.f32.mrb[50].mxu0  ;;  %v7060_v41 = vld [vmem:[%s9768_s6 + $0x40] sm:$0xff]  }
 0x26b   :  { %2282 = vmatpush1.bf16.msra.mxu1 %v8387_v15  ;;  %v1639_v19 = vpop.f32.mrb[51].mxu0  ;;  %2223 = vmatprep.subr.bf16.mxu0 %v8528_v39 }
 0x26c   :  { %2283 = vmatprep.subr.bf16.mxu1 %v8528_v39 }
 0x26e   :  { %2224 = vmatpush1.bf16.msra.mxu0 %v8254_v43  ;;  %v7061_v43 = vld [vmem:[%s9768_s6] sm:$0xff]  }
 0x26f   :  { %2284 = vmatpush1.bf16.msra.mxu1 %v8397_v16  ;;  %2225 = vmatprep.subr.bf16.mxu0 %v8528_v39 }
 0x270   :  { %6431 = vmatprep.subr.bf16.mxu1 %v7076_v34 }
 0x272   :  { %2298 = vmatmul.mubr.bf16.vlgmr.msra.gmra.mrb[64].mxu1 %v5793_v30  ;;  %2226 = vmatpush1.bf16.msra.mxu0 %v8261_v44  ;;  %v7062_v44 = vld [vmem:[%s9768_s6 + $0x48] sm:$0xff]  }
 0x273   :  { %2227 = vmatprep.subr.bf16.mxu0 %v8528_v39  ;;  %6432 = vmatpush3.bf16.msra.mxu1 %v7077_v36 }
 0x274   :  { %6433 = vmatprep.subr.bf16.mxu1 %v7078_v61 }
 0x276   :  { %2228 = vmatpush1.bf16.msra.mxu0 %v8268_v50  ;;  %v7063_v50 = vld [vmem:[%s9768_s6 + $0x8] sm:$0xff]  }
 0x277   :  { %2229 = vmatprep.subr.bf16.mxu0 %v8528_v39  ;;  %6434 = vmatpush3.bf16.msra.mxu1 %v7079_v37 }
 0x278   :  { %6435 = vmatprep.subr.bf16.mxu1 %v7080_v42 }
 0x27a   :  { %2230 = vmatpush1.bf16.msra.mxu0 %v8275_v56  ;;  %v7064_v56 = vld [vmem:[%s9768_s6 + $0x50] sm:$0xff]  }
 0x27b   :  { %2231 = vmatprep.subr.bf16.mxu0 %v8528_v39  ;;  %6436 = vmatpush3.bf16.msra.mxu1 %v7081_v47 }
 0x27c   :  { %6437 = vmatprep.subr.bf16.mxu1 %v7082_v48 }
 0x27e   :  { %2232 = vmatpush1.bf16.msra.mxu0 %v8282_v57  ;;  %v7065_v57 = vld [vmem:[%s9768_s6 + $0x10] sm:$0xff]  }
 0x27f   :  { %2233 = vmatprep.subr.bf16.mxu0 %v8528_v39  ;;  %6438 = vmatpush3.bf16.msra.mxu1 %v7083_v13 }
 0x280   :  { %6439 = vmatprep.subr.bf16.mxu1 %v7084_v49 }
 0x282   :  { %2234 = vmatpush1.bf16.msra.mxu0 %v8291_v59  ;;  %v7066_v59 = vld [vmem:[%s9768_s6 + $0x58] sm:$0xff]  }
 0x283   :  { %6409 = vmatprep.subr.bf16.mxu0 %v7060_v41  ;;  %6440 = vmatpush3.bf16.msra.mxu1 %v7085_v51 }
 0x284   :  { %6441 = vmatprep.subr.bf16.mxu1 %v7086_v28  ;;  %v5796_v28 = vld [vmem:[%s9769_s7] ss:$0 sm:$0xff] }
 0x285   :  { %2248 = vmatmul.mubr.bf16.vlgmr.msra.gmra.mrb[72].mxu0 %v2114_v26 }
 0x286   :  { %6410 = vmatpush3.bf16.msra.mxu0 %v7061_v43 }
 0x287   :  { %6411 = vmatprep.subr.bf16.mxu0 %v7062_v44  ;;  %6442 = vmatpush3.bf16.msra.mxu1 %v7087_v35 }
 0x288   :  { %6443 = vmatprep.subr.bf16.mxu1 %v7088_v38 }
 0x28a   :  { %6412 = vmatpush3.bf16.msra.mxu0 %v7063_v50 }
 0x28b   :  { %6413 = vmatprep.subr.bf16.mxu0 %v7064_v56  ;;  %6444 = vmatpush3.bf16.msra.mxu1 %v7089_v23 }
 0x28c   :  { %6445 = vmatprep.subr.bf16.mxu1 %v7090_v52 }
 0x28e   :  { %6414 = vmatpush3.bf16.msra.mxu0 %v7065_v57 }
 0x28f   :  { %6415 = vmatprep.subr.bf16.mxu0 %v7066_v59  ;;  %6446 = vmatpush3.bf16.msra.mxu1 %v7091_v53 }
 0x290   :  { %v1744_v60 = vpop.f32.mrb[52].mxu0  ;;  %6904 = vmatprep.subr.bf16.mxu1 %v7445_v1 }
 0x291   :  { %v1745_v62 = vadd.f32 %v1744_v60, %v1635_v10  ;;  %v1746_v3 = vpop.f32.mrb[53].mxu0 }
 0x292   :  { %v1747_v4 = vpop.f32.mrb[54].mxu0  ;;  %6416 = vmatpush3.bf16.msra.mxu0 %v7067_v45 }
 0x293   :  { %v1748_v7 = vpop.f32.mrb[55].mxu0  ;;  %6417 = vmatprep.subr.bf16.mxu0 %v7068_v54 }
 0x296   :  { %6418 = vmatpush3.bf16.msra.mxu0 %v7069_v6 }
 0x297   :  { %6419 = vmatprep.subr.bf16.mxu0 %v7070_v8 }
 0x29a   :  { %6420 = vmatpush3.bf16.msra.mxu0 %v7071_v9 }
 0x29b   :  { %6421 = vmatprep.subr.bf16.mxu0 %v7072_v11 }
 0x29e   :  { %6422 = vmatpush3.bf16.msra.mxu0 %v7073_v12 }
 0x29f   :  { %6423 = vmatprep.subr.bf16.mxu0 %v7074_v22  ;;  %v7092_v22 = vld [vmem:[%s9770_s8] sm:$0xff]  }
 0x2a2   :  { %6424 = vmatpush3.bf16.msra.mxu0 %v7075_v14 }
 0x2a3   :  { %6892 = vmatprep.subr.bf16.mxu0 %v7445_v1 }
 0x2a4   :  { %v1917_v15 = vpop.f32.mrb[48].mxu1 }
 0x2a5   :  { %v1919_v16 = vpop.f32.mrb[49].mxu1 }
 0x2a6   :  { %v1920_v17 = vpop.f32.mrb[50].mxu1 }
 0x2a7   :  { %v1921_v24 = vpop.f32.mrb[51].mxu1 }
 0x2b8   :  { %v1856_v25 = vpop.f32.mrb[56].mxu0 }
 0x2b9   :  { %v1862_v27 = vadd.f32 %v1856_v25, %v1745_v62  ;;  %v1858_v58 = vpop.f32.mrb[57].mxu0 }
 0x2ba   :  { %v1859_v0 = vpop.f32.mrb[58].mxu0 }
 0x2bb   :  { %v1860_v29 = vpop.f32.mrb[59].mxu0  ;;  %v1869_v5 = vadd.f32 %v5774_v2, %v1862_v27 }
 0x2bd   :  { %v1870_v32 = vmax.f32 %v1869_v5, 0.0  ;;  %v5829_v5 = vld [vmem:[%s9771_s9] ss:$0 sm:$0xff] }
 0x2bf   :  { %v2308_v41 = vpack.c.bf16 %v1870_v32, %v1870_v32 }
 0x2cd   :  { %v2007_v33 = vpop.f32.mrb[52].mxu1 }
 0x2ce   :  { %v2009_v18 = vpop.f32.mrb[53].mxu1 }
 0x2cf   :  { %v2010_v20 = vpop.f32.mrb[54].mxu1  ;;  %v7095_v18 = vld [vmem:[%s9770_s8 + $0x18] sm:$0xff]  }
 0x2d0   :  { %v2011_v21 = vpop.f32.mrb[55].mxu1 }
 0x2e0   :  { %v1957_v40 = vpop.f32.mrb[60].mxu0 }
 0x2e1   :  { %v1958_v46 = vadd.f32 %v1957_v40, %v1917_v15  ;;  %v1959_v63 = vpop.f32.mrb[61].mxu0  ;;  %v7093_v15 = vld [vmem:[%s9770_s8 + $0x8] sm:$0xff]  }
 0x2e2   :  { %v1960_v55 = vpop.f32.mrb[62].mxu0  ;;  %v7096_v63 = vld [vmem:[%s9772_s10] sm:$0xff]  }
 0x2e3   :  { %v2013_v26 = vadd.f32 %v2007_v33, %v1958_v46  ;;  %v1961_v10 = vpop.f32.mrb[63].mxu0  ;;  %v7094_v33 = vld [vmem:[%s9770_s8 + $0x10] sm:$0xff]   ;;  %s7449_s8 = smov 112  }
 0x2e5   :  { %v2014_v31 = vadd.f32 %v5774_v2, %v2013_v26 }
 0x2e7   :  { %v2015_v19 = vmax.f32 %v2014_v31, 0.0 }
 0x2e9   :  { %v2309_v30 = vpack.c.bf16 %v2015_v19, %v2015_v19 }
 0x2eb   :  { %2607 = vmatprep.mubr.bf16.mxu0 %v2309_v30  ;;  %v2819_v30 = vld [vmem:[%s9774_s12] sm:$0xff] }
 0x2ec   :  { %2608 = vmatmul.mubr.bf16.vlgmr.msra.gmra.mrb[76].mxu0 %v2308_v41  ;;  %v2823_v41 = vld [vmem:[%s9774_s12 + $0x20] sm:$0xff] }
 0x2ed   :  { %6900 = vmatprep.mubr.msk.bf16.mxu0 %vm7446_vm0, %v7445_v1  ;;  %6893 = vmatpush3.bf16.msra.mxu0 %v7092_v22 }
 0x2ee   :  { %6894 = vmatprep.subr.bf16.mxu0 %v7445_v1 }
 0x2f1   :  { %6895 = vmatpush3.bf16.msra.mxu0 %v7093_v15  ;;  %v2831_v15 = vld [vmem:[%s9774_s12 + $0x60] sm:$0xff] }
 0x2f2   :  { %6896 = vmatprep.subr.bf16.mxu0 %v7445_v1 }
 0x2f5   :  { %v2102_v43 = vpop.f32.mrb[56].mxu1  ;;  %6897 = vmatpush3.bf16.msra.mxu0 %v7094_v33 }
 0x2f6   :  { %v2104_v44 = vpop.f32.mrb[57].mxu1  ;;  %6898 = vmatprep.subr.bf16.mxu0 %v7445_v1 }
 0x2f7   :  { %v2105_v50 = vpop.f32.mrb[58].mxu1  ;;  %v5838_v44 = vcombine.low %v2819_v30, %v2823_v41 }
 0x2f8   :  { %v2106_v56 = vpop.f32.mrb[59].mxu1  ;;  %v5839_v50 = vcombine.high %v2819_v30, %v2823_v41  ;;  %v2841_v30 = vld [vmem:[%s9774_s12 + $0xb0] sm:$0xff]  ;;  %v2838_v41 = vld [vmem:[%s9774_s12 + $0x98] sm:$0xff] }
 0x2f9   :  { %6899 = vmatpush3.bf16.msra.mxu0 %v7095_v18  ;;  %v2824_v56 = vld [vmem:[%s9774_s12 + $0x28] sm:$0xff]  ;;  %v2821_v18 = vld [vmem:[%s9774_s12 + $0x10] sm:$0xff] }
 0x308   :  { %v2062_v57 = vpop.f32.mrb[64].mxu0 }
 0x309   :  { %v2103_v59 = vadd.f32 %v2102_v43, %v2062_v57  ;;  %v2064_v45 = vpop.f32.mrb[65].mxu0  ;;  %v2820_v43 = vld [vmem:[%s9774_s12 + $0x8] sm:$0xff] }
 0x30a   :  { %v2065_v54 = vpop.f32.mrb[66].mxu0  ;;  %v5840_v57 = vcombine.low %v2820_v43, %v2824_v56  ;;  %v2828_v45 = vld [vmem:[%s9774_s12 + $0x48] sm:$0xff] }
 0x30b   :  { %v2066_v60 = vpop.f32.mrb[67].mxu0  ;;  %v2832_v54 = vld [vmem:[%s9774_s12 + $0x68] sm:$0xff] }
 0x30c   :  { %v5849_v60 = vcombine.high %v2828_v45, %v2832_v54 }
 0x31d   :  { %v2209_v62 = vpop.f32.mrb[60].mxu1 }
 0x31e   :  { %v2211_v3 = vpop.f32.mrb[61].mxu1 }
 0x31f   :  { %v2212_v4 = vpop.f32.mrb[62].mxu1 }
 0x320   :  { %v2213_v6 = vpop.f32.mrb[63].mxu1  ;;  %v5848_v4 = vcombine.low %v2828_v45, %v2832_v54  ;;  %v2849_v45 = vld [vmem:[%s9774_s12 + $0xf0] sm:$0xff]  ;;  %v2846_v54 = vld [vmem:[%s9774_s12 + $0xd8] sm:$0xff] }
 0x321   :  { %v2836_v6 = vld [vmem:[%s9774_s12 + $0x88] sm:$0xff] }
 0x330   :  { %v2154_v7 = vpop.f32.mrb[68].mxu0 }
 0x331   :  { %v2160_v8 = vadd.f32 %v2154_v7, %v2103_v59  ;;  %v2156_v9 = vpop.f32.mrb[69].mxu0  ;;  %v5841_v59 = vcombine.high %v2820_v43, %v2824_v56  ;;  %v2840_v7 = vld [vmem:[%s9774_s12 + $0xa8] sm:$0xff]  ;;  %v2842_v43 = vld [vmem:[%s9774_s12 + $0xb8] sm:$0xff] }
 0x332   :  { %v2157_v11 = vpop.f32.mrb[70].mxu0  ;;  %v5856_v9 = vcombine.low %v2836_v6, %v2840_v7 }
 0x333   :  { %v2158_v12 = vpop.f32.mrb[71].mxu0  ;;  %v2161_v0 = vadd.f32 %v5774_v2, %v2160_v8  ;;  %3097 = vmatprep.subr.bf16.mxu0 %v5841_v59  ;;  %v5857_v8 = vcombine.high %v2836_v6, %v2840_v7  ;;  %v2747_v11 = vld [vmem:[%s9810_s30] sm:$0x3]  ;;  %v2845_v59 = vld [vmem:[%s9774_s12 + $0xd0] sm:$0xff] }
 0x334   :  { %v5866_v7 = vcombine.low %v2845_v59, %v2849_v45 }
 0x335   :  { %v2162_v37 = vmax.f32 %v2161_v0, 0.0 }
 0x337   :  { %v2310_v48 = vpack.c.bf16 %v2162_v37, %v2162_v37 }
 0x345   :  { %v2299_v14 = vpop.f32.mrb[64].mxu1 }
 0x346   :  { %v2301_v16 = vpop.f32.mrb[65].mxu1 }
 0x347   :  { %v2302_v17 = vpop.f32.mrb[66].mxu1 }
 0x348   :  { %v2303_v24 = vpop.f32.mrb[67].mxu1 }
 0x358   :  { %v2249_v25 = vpop.f32.mrb[72].mxu0 }
 0x359   :  { %v2250_v27 = vadd.f32 %v2249_v25, %v2209_v62  ;;  %v2251_v58 = vpop.f32.mrb[73].mxu0  ;;  %v2835_v25 = vld [vmem:[%s9774_s12 + $0x80] sm:$0xff] }
 0x35a   :  { %v2252_v29 = vpop.f32.mrb[74].mxu0 }
 0x35b   :  { %v2305_v34 = vadd.f32 %v2299_v14, %v2250_v27  ;;  %v2253_v36 = vpop.f32.mrb[75].mxu0  ;;  %v2827_v14 = vld [vmem:[%s9774_s12 + $0x40] sm:$0xff] }
 0x35c   :  { %v5847_v24 = vcombine.high %v2827_v14, %v2831_v15  ;;  %v2839_v27 = vld [vmem:[%s9774_s12 + $0xa0] sm:$0xff]  ;;  %v5846_v58 = vcombine.low %v2827_v14, %v2831_v15 }
 0x35d   :  { %v2306_v61 = vadd.f32 %v5774_v2, %v2305_v34  ;;  %v5855_v0 = vcombine.high %v2835_v25, %v2839_v27  ;;  %v5854_v29 = vcombine.low %v2835_v25, %v2839_v27  ;;  %v2843_v34 = vld [vmem:[%s9774_s12 + $0xc0] sm:$0xff]  ;;  %v7114_v27 = vld [vmem:[%s9776_s14 + $0x194] ss:$8 sps:$4 sm:$0xff]  }
 0x35e   :  { %v2847_v36 = vld [vmem:[%s9774_s12 + $0xe0] sm:$0xff] }
 0x35f   :  { %v2307_v42 = vmax.f32 %v2306_v61, 0.0  ;;  %v2844_v61 = vld [vmem:[%s9774_s12 + $0xc8] sm:$0xff]  ;;  %v5863_v37 = vcombine.high %v2843_v34, %v2847_v36 }
 0x360   :  { %v7105_v14 = vld [vmem:[%s9776_s14 + $0x164] ss:$8 sps:$4 sm:$0xff]   ;;  %v7103_v15 = vld [vmem:[%s9776_s14 + $0x160] ss:$8 sps:$4 sm:$0xff]  }
 0x361   :  { %v2311_v47 = vpack.c.bf16 %v2307_v42, %v2307_v42  ;;  %v2848_v42 = vld [vmem:[%s9774_s12 + $0xe8] sm:$0xff] }
 0x362   :  { %v5865_v33 = vcombine.high %v2844_v61, %v2848_v42  ;;  %v7109_v25 = vld [vmem:[%s9776_s14 + $0x180] ss:$8 sps:$4 sm:$0xff]  }
 0x363   :  { %2647 = vmatprep.mubr.bf16.mxu1 %v2311_v47  ;;  %v5862_v47 = vcombine.low %v2843_v34, %v2847_v36  ;;  %v2853_v34 = vlaneseq }
 0x364   :  { %2648 = vmatmul.mubr.bf16.vlgmr.msra.gmra.mrb[68].mxu1 %v2310_v48  ;;  %v5864_v48 = vcombine.low %v2844_v61, %v2848_v42  ;;  %v2851_v42 = vld [vmem:[%s9775_s13] sm:$0xff] }
 0x365   :  { %6906 = vmatprep.mubr.msk.bf16.mxu1 %vm7446_vm0, %v7445_v1  ;;  %vm2696_vm0 = vcmask 523264   ;;  %6905 = vmatpush3.bf16.msra.mxu1 %v7096_v63  ;;  %v2834_v63 = vld [vmem:[%s9774_s12 + $0x78] sm:$0xff]  ;;  %v8881_v36 = vshrl.u32 %v2853_v34, 7 }
 0x366   :  { %3056 = vmatprep.subr.bf16.mxu1 %v5839_v50 }
 0x367   :  { %v2855_v61 = vsub.s32 0, %v8881_v36 }
 0x3bf   :  { %v6425_v13 = vpop.f32.mrb[76].mxu0 }
 0x3c0   :  { %v6426_v20 = vpop.f32.mrb[77].mxu0 }
 0x3c1   :  { %v6427_v49 = vadd.f32 %v6426_v20, %v6425_v13  ;;  %v6428_v21 = vpop.f32.mrb[78].mxu0  ;;  %v2825_v13 = vld [vmem:[%s9774_s12 + $0x30] sm:$0xff]  ;;  %v2822_v20 = vld [vmem:[%s9774_s12 + $0x18] sm:$0xff] }
 0x3c2   :  { %v6429_v51 = vpop.f32.mrb[79].mxu0  ;;  %v5843_v21 = vcombine.high %v2821_v18, %v2825_v13 }
 0x3c3   :  { %v2610_v23 = vadd.f32 %v6427_v49, %v5796_v28  ;;  %v5842_v49 = vcombine.low %v2821_v18, %v2825_v13  ;;  %v2826_v51 = vld [vmem:[%s9774_s12 + $0x38] sm:$0xff]  ;;  %v2856_v13 = vrot.slane %v2851_v42, %v2855_v61 }
 0x3c4   :  { %v5844_v28 = vcombine.low %v2822_v20, %v2826_v51  ;;  %v7118_v18 = vld [vmem:[%s9776_s14 + $0x1b0] ss:$8 sps:$4 sm:$0xff]  }
 0x437   :  { %v6447_v35 = vpop.f32.mrb[68].mxu1 }
 0x438   :  { %v6448_v38 = vpop.f32.mrb[69].mxu1 }
 0x439   :  { %v6449_v52 = vadd.f32 %v6448_v38, %v6447_v35  ;;  %v6450_v53 = vpop.f32.mrb[70].mxu1  ;;  %v5845_v35 = vcombine.high %v2822_v20, %v2826_v51  ;;  %v5835_v38 = vld [vmem:[%s9773_s11] ss:$0 sm:$0xff]  ;;  %v7123_v51 = vld [vmem:[%s9776_s14 + $0x1c4] ss:$8 sps:$4 sm:$0xff]  }
 0x43a   :  { %v6451_v1 = vpop.f32.mrb[71].mxu1 }
 0x43b   :  { %v2650_v2 = vadd.f32 %v6449_v52, %v2610_v23  ;;  %v2829_v1 = vld [vmem:[%s9774_s12 + $0x50] sm:$0xff] }
 0x43d   :  { %v2655_v40 = vmax.f32 %v2650_v2, 0.0 }
 0x43f   :  { %v2656_v46 = vpack.c.bf16 %v2655_v40, %v2655_v40  ;;  %v2833_v40 = vld [vmem:[%s9774_s12 + $0x70] sm:$0xff] }
 0x441   :  { %6901 = vmatmul.mubr.msk.bf16.vlgmr.msra.gmra.mrb[80].mxu0 %vm2696_vm0, %v2656_v46  ;;  %v2830_v46 = vld [vmem:[%s9774_s12 + $0x58] sm:$0xff] }
 0x442   :  { %3129 = vmatprep.mubr.bf16.mxu0 %v8528_v39  ;;  %3098 = vmatpush1.bf16.msra.mxu0 %v5840_v57  ;;  %v5852_v50 = vcombine.low %v2830_v46, %v2834_v63  ;;  %v5861_v57 = vcombine.high %v2838_v41, %v2842_v43 }
 0x443   :  { %3099 = vmatprep.subr.bf16.mxu0 %v5849_v60  ;;  %v2850_v60 = vld [vmem:[%s9774_s12 + $0xf8] sm:$0xff] }
 0x444   :  { %v5869_v6 = vcombine.high %v2846_v54, %v2850_v60 }
 0x446   :  { %3100 = vmatpush1.bf16.msra.mxu0 %v5848_v4  ;;  %v5867_v4 = vcombine.high %v2845_v59, %v2849_v45  ;;  %v2871_v59 = vsub.s32 4, %v8881_v36  ;;  %v2879_v45 = vsub.s32 6, %v8881_v36 }
 0x447   :  { %3101 = vmatprep.subr.bf16.mxu0 %v5857_v8  ;;  %v5868_v8 = vcombine.low %v2846_v54, %v2850_v60  ;;  %v2875_v60 = vsub.s32 5, %v8881_v36 }
 0x44a   :  { %3102 = vmatpush1.bf16.msra.mxu0 %v5856_v9  ;;  %v7097_v9 = vld [vmem:[%s9776_s14 + $0x140] ss:$8 sps:$4 sm:$0xff]  }
 0x44b   :  { %3103 = vmatprep.subr.bf16.mxu0 %v5865_v33  ;;  %v7120_v33 = vld [vmem:[%s9776_s14 + $0x1b4] ss:$8 sps:$4 sm:$0xff]  }
 0x44e   :  { %3104 = vmatpush1.bf16.msra.mxu0 %v5864_v48  ;;  %v2867_v48 = vsub.s32 3, %v8881_v36 }
 0x44f   :  { %3179 = vmatprep.subr.bf16.mxu0 %v5845_v35 }
 0x514   :  { %v2734_v55 = vpop.f32.mrb[80].mxu0 }
 0x515   :  { %v8720_v26 = vadd.f32 %v5829_v5, %v2734_v55  ;;  %v6902_v10 = vpop.f32.mrb[81].mxu0 }
 0x516   :  { %v2737_v31 = vpop.f32.mrb[82].mxu0 }
 0x517   :  { %v6903_v32 = vpop.f32.mrb[83].mxu0  ;;  %v2748_v19 = vmul.f32 1.442695, %v8720_v26  ;;  %2741 = vst.msk [vmem:[#allocation5] sm:$0x3] %vm9787_vm8, %v8720_v26  ;;  %v5851_v31 = vcombine.high %v2829_v1, %v2833_v40  ;;  %vm3257_vm8 = vcmask 1046534  }
 0x518   :  { %v5853_v32 = vcombine.high %v2830_v46, %v2834_v63  ;;  %vm9399_vm2 = vmor %vm3257_vm8, %vm532_vm10  ;;  %vm9824_vm10 = vcmask 1041537  }
 0x519   :  { %7365 = vpow2.f32 %v2748_v19  ;;  %v2837_v19 = vld [vmem:[%s9774_s12 + $0x90] sm:$0xff]  ;;  %s5589_s12 = sshll.u32 %s7453_s25, 4  ;;  %s5590_s12 = int_to_ptr.vmem [resolvable:$true] %s5589_s12 }
 0x51a   :  { %v5859_v56 = vcombine.high %v2837_v19, %v2841_v30  ;;  %p7402_p1 = scmp.lt.s32.totalorder %s5590_s12, %s5590_s12 }
 0x523   :  { %v7366_v62 = vpop.eup %7365 }
 0x524   :  { %v2750_v3 = vmul.f32 0.5, %v7366_v62  ;;  %v5858_v62 = vcombine.low %v2837_v19, %v2841_v30  ;;  %v7124_v30 = vld [vmem:[%s9776_s14 + $0x1d0] ss:$8 sps:$4 sm:$0xff]  }
 0x526   :  { %2752 = vrot.lane.b32.xlu0 %v2750_v3, %s7449_s8  ;;  %v5860_v3 = vcombine.low %v2838_v41, %v2842_v43  ;;  %v7126_v41 = vld [vmem:[%s9776_s14 + $0x1d4] ss:$8 sps:$4 sm:$0xff]   ;;  %v7129_v43 = vld [vmem:[%s9776_s14 + $0x1e4] ss:$8 sps:$4 sm:$0xff]  }
 0x598   :  { %v2753_v12 = vpop.permute.xlu0 %2752 }
 0x599   :  { %v2755_v22 = vmul.f32 %v2753_v12, %v2747_v11  ;;  %v7099_v11 = vld [vmem:[%s9776_s14 + $0x144] ss:$8 sps:$4 sm:$0xff]   ;;  %v7102_v12 = vld [vmem:[%s9776_s14 + $0x154] ss:$8 sps:$4 sm:$0xff]  }
 0x59b   :  { %v2756_v16 = vadd.f32 %v2755_v22, %v8720_v26  ;;  %v7100_v22 = vld [vmem:[%s9776_s14 + $0x150] ss:$8 sps:$4 sm:$0xff]  }
 0x59d   :  { %v2757_v17 = vpack.c.bf16 %v2756_v16, %v2756_v16  ;;  %v7108_v16 = vld [vmem:[%s9776_s14 + $0x174] ss:$8 sps:$4 sm:$0xff]  }
 0x59f   :  { %6907 = vmatmul.mubr.msk.bf16.vlgmr.msra.gmra.mrb[72].mxu1 %vm9791_vm7, %v2757_v17  ;;  %v7106_v17 = vld [vmem:[%s9776_s14 + $0x170] ss:$8 sps:$4 sm:$0xff]   ;;  %vm8982_vm7 = vmor %vm3257_vm8, %vm3256_vm14  ;;  %vm83_vm14 = vcmask 257024   ;;  %vm9825_vm8 = vcmask 1045509  }
 0x5a0   :  { %3057 = vmatpush1.bf16.msra.mxu1 %v5838_v44  ;;  %3088 = vmatprep.mubr.bf16.mxu1 %v8528_v39  ;;  %v5850_v44 = vcombine.low %v2829_v1, %v2833_v40  ;;  %v7121_v1 = vld [vmem:[%s9776_s14 + $0x1c0] ss:$8 sps:$4 sm:$0xff]  }
 0x5a1   :  { %3058 = vmatprep.subr.bf16.mxu1 %v5847_v24  ;;  %v7111_v24 = vld [vmem:[%s9776_s14 + $0x184] ss:$8 sps:$4 sm:$0xff]  }
 0x5a4   :  { %3059 = vmatpush1.bf16.msra.mxu1 %v5846_v58  ;;  %v7112_v58 = vld [vmem:[%s9776_s14 + $0x190] ss:$8 sps:$4 sm:$0xff]  }
 0x5a5   :  { %3060 = vmatprep.subr.bf16.mxu1 %v5855_v0  ;;  %v7117_v0 = vld [vmem:[%s9776_s14 + $0x1a4] ss:$8 sps:$4 sm:$0xff]  }
 0x5a8   :  { %3061 = vmatpush1.bf16.msra.mxu1 %v5854_v29  ;;  %v7115_v29 = vld [vmem:[%s9776_s14 + $0x1a0] ss:$8 sps:$4 sm:$0xff]  }
 0x5a9   :  { %3062 = vmatprep.subr.bf16.mxu1 %v5863_v37  ;;  %v2863_v37 = vsub.s32 2, %v8881_v36 }
 0x5ab   :  { %v2864_v20 = vrot.slane %v2851_v42, %v2863_v37 }
 0x5ac   :  { %3063 = vmatpush1.bf16.msra.mxu1 %v5862_v47  ;;  %v2859_v47 = vsub.s32 1, %v8881_v36 }
 0x5ad   :  { %3138 = vmatprep.subr.bf16.mxu1 %v5843_v21  ;;  %v2868_v21 = vrot.slane %v2851_v42, %v2867_v48 }
 0x672   :  { %v2811_v23 = vpop.f32.mrb[72].mxu1 }
 0x673   :  { %v2812_v52 = vadd.f32 %v5835_v38, %v2811_v23  ;;  %v6908_v53 = vpop.f32.mrb[73].mxu1 }
 0x674   :  { %v2814_v2 = vpop.f32.mrb[74].mxu1 }
 0x675   :  { %v2817_v5 = vmax.f32 %v2812_v52, 0.0  ;;  %v6909_v55 = vpop.f32.mrb[75].mxu1 }
 0x677   :  { %v2818_v10 = vpack.c.bf16 %v2817_v5, %v2817_v5 }
 0x679   :  { %5870 = vmatmul.mubr.msk.bf16.vlgmr.msra.gmra.mrb[76].mxu1 %vm2696_vm0, %v2818_v10  ;;  %5871 = vmatmul.mubr.msk.bf16.vlgmr.msra.gmra.mrb[84].mxu0 %vm2696_vm0, %v2818_v10 }
 0x67a   :  { %3139 = vmatpush1.bf16.msra.mxu1 %v5842_v49  ;;  %3180 = vmatpush1.bf16.msra.mxu0 %v5844_v28  ;;  %v2860_v49 = vrot.slane %v2851_v42, %v2859_v47 }
 0x67b   :  { %3140 = vmatprep.subr.bf16.mxu1 %v5851_v31  ;;  %3181 = vmatprep.subr.bf16.mxu0 %v5853_v32 }
 0x67c   :  { %3170 = vmatprep.mubr.bf16.mxu1 %v8528_v39  ;;  %3211 = vmatprep.mubr.bf16.mxu0 %v8528_v39  ;;  %v7136_v39 = vld [vmem:[%s9776_s14 + $0x210] ss:$8 sps:$4 sm:$0xff]  }
 0x67e   :  { %3141 = vmatpush1.bf16.msra.mxu1 %v5850_v44  ;;  %3182 = vmatpush1.bf16.msra.mxu0 %v5852_v50 }
 0x67f   :  { %3142 = vmatprep.subr.bf16.mxu1 %v5859_v56  ;;  %3183 = vmatprep.subr.bf16.mxu0 %v5861_v57  ;;  %v7127_v56 = vld [vmem:[%s9776_s14 + $0x1e0] ss:$8 sps:$4 sm:$0xff]  }
 0x682   :  { %3143 = vmatpush1.bf16.msra.mxu1 %v5858_v62  ;;  %3184 = vmatpush1.bf16.msra.mxu0 %v5860_v3  ;;  %v2883_v62 = vsub.s32 7, %v8881_v36  ;;  %v7132_v3 = vld [vmem:[%s9776_s14 + $0x1f4] ss:$8 sps:$4 sm:$0xff]  }
 0x683   :  { %3144 = vmatprep.subr.bf16.mxu1 %v5867_v4  ;;  %3185 = vmatprep.subr.bf16.mxu0 %v5869_v6  ;;  %v7130_v6 = vld [vmem:[%s9776_s14 + $0x1f0] ss:$8 sps:$4 sm:$0xff]  }
 0x686   :  { %3145 = vmatpush1.bf16.msra.mxu1 %v5866_v7  ;;  %3186 = vmatpush1.bf16.msra.mxu0 %v5868_v8  ;;  %v2872_v7 = vrot.slane %v2851_v42, %v2871_v59  ;;  %v2880_v8 = vrot.slane %v2851_v42, %v2879_v45 }
 0x687   :  { %3668 = vmatprep.subr.bf16.mxu1 %v7099_v11  ;;  %v2884_v11 = vrot.slane %v2851_v42, %v2883_v62 }
 0x689   :  { %5872 = vmatmul.mubr.msk.bf16.vlgmr.msra.gmra.mrb[80].mxu1 %vm2696_vm0, %v2818_v10  ;;  %5873 = vmatmul.mubr.msk.bf16.vlgmr.msra.gmra.mrb[88].mxu0 %vm2696_vm0, %v2818_v10 }
 0x68a   :  { %3669 = vmatpush1.bf16.msra.mxu1 %v7097_v9  ;;  %v2876_v9 = vrot.slane %v2851_v42, %v2875_v60 }
 0x68b   :  { %3670 = vmatprep.subr.bf16.mxu1 %v7102_v12  ;;  %v7135_v12 = vld [vmem:[%s9776_s14 + $0x204] ss:$8 sps:$4 sm:$0xff]  }
 0x68e   :  { %3671 = vmatpush1.bf16.msra.mxu1 %v7100_v22 }
 0x68f   :  { %3672 = vmatprep.subr.bf16.mxu1 %v7105_v14 }
 0x692   :  { %3673 = vmatpush1.bf16.msra.mxu1 %v7103_v15  ;;  %v7133_v15 = vld [vmem:[%s9776_s14 + $0x200] ss:$8 sps:$4 sm:$0xff]  }
 0x693   :  { %3674 = vmatprep.subr.bf16.mxu1 %v7108_v16 }
 0x696   :  { %3675 = vmatpush1.bf16.msra.mxu1 %v7106_v17 }
 0x697   :  { %3676 = vmatprep.subr.bf16.mxu1 %v7111_v24 }
 0x69a   :  { %3677 = vmatpush1.bf16.msra.mxu1 %v7109_v25 }
 0x69b   :  { %3678 = vmatprep.subr.bf16.mxu1 %v7114_v27 }
 0x69e   :  { %3679 = vmatpush1.bf16.msra.mxu1 %v7112_v58 }
 0x69f   :  { %3680 = vmatprep.subr.bf16.mxu1 %v7117_v0 }
 0x6a2   :  { %3681 = vmatpush1.bf16.msra.mxu1 %v7115_v29 }
 0x6a3   :  { %3682 = vmatprep.subr.bf16.mxu1 %v7120_v33  ;;  %v7138_v33 = vld [vmem:[%s9776_s14 + $0x214] ss:$8 sps:$4 sm:$0xff]  }
 0x6a6   :  { %3683 = vmatpush1.bf16.msra.mxu1 %v7118_v18 }
 0x6a7   :  { %3684 = vmatprep.subr.bf16.mxu1 %v7123_v51  ;;  %v7139_v51 = vld [vmem:[%s9776_s14 + $0x220] ss:$8 sps:$4 sm:$0xff]  }
 0x6aa   :  { %3685 = vmatpush1.bf16.msra.mxu1 %v7121_v1 }
 0x6ab   :  { %3686 = vmatprep.subr.bf16.mxu1 %v7126_v41 }
 0x6ae   :  { %3687 = vmatpush1.bf16.msra.mxu1 %v7124_v30 }
 0x6af   :  { %3688 = vmatprep.subr.bf16.mxu1 %v7129_v43  ;;  %v7186_v43 = vld [vmem:[%s9776_s14 + $0x70] ss:$8 sps:$4 sm:$0xff]  }
 0x6b2   :  { %3689 = vmatpush1.bf16.msra.mxu1 %v7127_v56 }
 0x6b3   :  { %3690 = vmatprep.subr.bf16.mxu1 %v7132_v3 }
 0x6b6   :  { %3691 = vmatpush1.bf16.msra.mxu1 %v7130_v6 }
 0x6b7   :  { %3692 = vmatprep.subr.bf16.mxu1 %v7135_v12 }
 0x6ba   :  { %3693 = vmatpush1.bf16.msra.mxu1 %v7133_v15 }
 0x6bb   :  { %3694 = vmatprep.subr.bf16.mxu1 %v7138_v33 }
 0x6be   :  { %3695 = vmatpush1.bf16.msra.mxu1 %v7136_v39 }
 0x74c   :  { %v3090_v28 = vpop.f32.mrb[76].mxu1  ;;  %v3131_v35 = vpop.f32.mrb[84].mxu0 }
 0x74d   :  { %v3091_v38 = vadd.f32 %v3090_v28, %v2856_v13  ;;  %v3132_v23 = vadd.f32 %v3131_v35, %v2864_v20  ;;  %v3092_v52 = vpop.f32.mrb[77].mxu1  ;;  %v3133_v53 = vpop.f32.mrb[85].mxu0  ;;  %v7141_v20 = vld [vmem:[%s9776_s14 + $0x224] ss:$8 sps:$4 sm:$0xff]  }
 0x74e   :  { %v3093_v2 = vadd.f32 %v3092_v52, %v2860_v49  ;;  %v3134_v40 = vadd.f32 %v3133_v53, %v2868_v21  ;;  %v3094_v46 = vpop.f32.mrb[78].mxu1  ;;  %v3135_v63 = vpop.f32.mrb[86].mxu0  ;;  %3696 = vmatprep.subr.bf16.mxu1 %v7141_v20  ;;  %v7149_v53 = vld [vmem:[%s9776_s14 + $0x244] ss:$8 sps:$4 sm:$0xff]  }
 0x74f   :  { %v3220_v5 = vmax.f32 %v3091_v38, 0.0  ;;  %v3222_v55 = vmax.f32 %v3132_v23, 0.0  ;;  %v3095_v10 = vpop.f32.mrb[79].mxu1  ;;  %v3136_v31 = vpop.f32.mrb[87].mxu0  ;;  %v7144_v38 = vld [vmem:[%s9776_s14 + $0x234] ss:$8 sps:$4 sm:$0xff]   ;;  %3697 = vmatpush1.bf16.msra.mxu1 %v7139_v51 }
 0x750   :  { %v3221_v32 = vmax.f32 %v3093_v2, 0.0  ;;  %v3223_v19 = vmax.f32 %v3134_v40, 0.0  ;;  %v7142_v23 = vld [vmem:[%s9776_s14 + $0x230] ss:$8 sps:$4 sm:$0xff]   ;;  %3698 = vmatprep.subr.bf16.mxu1 %v7144_v38  ;;  %v7165_v51 = vld [vmem:[%s9776_s14 + $0x4] ss:$8 sps:$4 sm:$0xff]  }
 0x751   :  { %v7163_v38 = vld [vmem:[%s9776_s14] ss:$8 sps:$4 sm:$0xff]   ;;  %v7168_v2 = vld [vmem:[%s9776_s14 + $0x10] ss:$8 sps:$4 sm:$0xff]  }
 0x752   :  { %v6259_v44 = vpack.c.bf16 %v3221_v32, %v3220_v5  ;;  %v6260_v50 = vpack.c.bf16 %v3223_v19, %v3222_v55  ;;  %v7174_v5 = vld [vmem:[%s9776_s14 + $0x30] ss:$8 sps:$4 sm:$0xff]  }
 0x753   :  { %3699 = vmatpush1.bf16.msra.mxu1 %v7142_v23  ;;  %v7180_v32 = vld [vmem:[%s9776_s14 + $0x50] ss:$8 sps:$4 sm:$0xff]  }
 0x754   :  { %3282 = vrot.lane.b32.xlu0 %v6260_v50, %s7450_s27  ;;  %v3235_v57 = vrot.slane %v6259_v44, 7  ;;  %v3249_v54 = vrot.slane %v6259_v44, 6  ;;  %v3269_v4 = vrot.slane %v6260_v50, 5  ;;  %3711 = vmatprep.subr.bf16.mxu1 %v7149_v53 }
 0x756   :  { %3236 = vrot.lane.b32.xlu1 %v3235_v57, %s7450_s27 }
 0x758   :  { %3250 = vrot.lane.b32.xlu0 %v3249_v54, %s7450_s27 }
 0x75a   :  { %3270 = vrot.lane.b32.xlu1 %v3269_v4, %s7450_s27 }
 0x75c   :  { %v3172_v22 = vpop.f32.mrb[80].mxu1  ;;  %v3213_v14 = vpop.f32.mrb[88].mxu0 }
 0x75d   :  { %v3173_v16 = vadd.f32 %v3172_v22, %v2872_v7  ;;  %v3214_v17 = vadd.f32 %v3213_v14, %v2880_v8  ;;  %v3174_v24 = vpop.f32.mrb[81].mxu1  ;;  %v3215_v25 = vpop.f32.mrb[89].mxu0 }
 0x75e   :  { %v3175_v27 = vadd.f32 %v3174_v24, %v2876_v9  ;;  %v3216_v58 = vadd.f32 %v3215_v25, %v2884_v11  ;;  %v3176_v0 = vpop.f32.mrb[82].mxu1  ;;  %v3217_v29 = vpop.f32.mrb[90].mxu0 }
 0x75f   :  { %v3224_v34 = vmax.f32 %v3173_v16, 0.0  ;;  %v3226_v37 = vmax.f32 %v3214_v17, 0.0  ;;  %v3177_v42 = vpop.f32.mrb[83].mxu1  ;;  %v3218_v48 = vpop.f32.mrb[91].mxu0 }
 0x760   :  { %v3225_v18 = vmax.f32 %v3175_v27, 0.0  ;;  %v3227_v13 = vmax.f32 %v3216_v58, 0.0  ;;  %v7147_v58 = vld [vmem:[%s9776_s14 + $0x240] ss:$8 sps:$4 sm:$0xff]   ;;  %v7157_v48 = vld [vmem:[%s9776_s14 + $0x264] ss:$8 sps:$4 sm:$0xff]  }
 0x761   :  { %v9032_v42 = vld [vmem:[#allocation4] sm:$0xff] }
 0x762   :  { %v6261_v49 = vpack.c.bf16 %v3225_v18, %v3224_v34  ;;  %v6262_v21 = vpack.c.bf16 %v3227_v13, %v3226_v37  ;;  %v7154_v34 = vld [vmem:[%s9776_s14 + $0x254] ss:$8 sps:$4 sm:$0xff]   ;;  %v7152_v37 = vld [vmem:[%s9776_s14 + $0x250] ss:$8 sps:$4 sm:$0xff]   ;;  %v7155_v18 = vld [vmem:[%s9776_s14 + $0x260] ss:$8 sps:$4 sm:$0xff]  }
 0x763   :  { %v7160_v13 = vld [vmem:[%s9776_s14 + $0x274] ss:$8 sps:$4 sm:$0xff]   ;;  %86 = vst.msk [vmem:[#allocation4 + $0x14] sm:$0xf] %vm83_vm14, %v9032_v42  ;;  %84 = vst.msk [vmem:[#allocation4 + $0x8] sm:$0xf] %vm83_vm14, %v9032_v42 }
 0x764   :  { %v3310_v28 = vrot.slane %v6261_v49, 6  ;;  %v3301_v35 = vrot.slane %v6261_v49, 7  ;;  %v3326_v52 = vrot.slane %v6262_v21, 5  ;;  %88 = vst.msk [vmem:[#allocation4 + $0x20] sm:$0xf] %vm83_vm14, %v9032_v42 }
 0x765   :  { %90 = vst.msk [vmem:[#allocation4 + $0x2c] sm:$0xf] %vm83_vm14, %v9032_v42 }
 0x766   :  { %3311 = vrot.lane.b32.xlu0 %v3310_v28, %s7450_s27  ;;  %3302 = vrot.lane.b32.xlu1 %v3301_v35, %s7450_s27 }
 0x76a   :  { %3335 = vrot.lane.b32.xlu0 %v6262_v21, %s7450_s27  ;;  %3327 = vrot.lane.b32.xlu1 %v3326_v52, %s7450_s27  ;;  %v7158_v21 = vld [vmem:[%s9776_s14 + $0x270] ss:$8 sps:$4 sm:$0xff]   ;;  %v7170_v52 = vld [vmem:[%s9776_s14 + $0x14] ss:$8 sps:$4 sm:$0xff]   ;;  %s7397_s27 = scalar_lea.vmem %s5590_s12, 32 }
 0x76b   :  { %p7398_p0 = scmp.ne.s32.totalorder %s5590_s12, %s7397_s27  ;;  %p7403_p2 = scmp.lt.s32.totalorder %s7397_s27, %s7397_s27 }
 0x76d   :  { %p7404_p3 = por %p7403_p2, %p7402_p1 }
 0x76f   :  { %p7405_p4 = pnand %p7404_p3, %p7398_p0 }
 0x7c6   :  { %v3283_v1 = vpop.permute.xlu0 %3282 }
 0x7c7   :  { %v3284_v40 = vrot.slane %v3283_v1, 4 }
 0x7c8   :  { %v3237_v46 = vpop.permute.xlu1 %3236 }
 0x7c9   :  { %v3285_v63 = vsel %vm1597_vm9, %v3284_v40, %v3283_v1  ;;  %3293 = vst.msk [vmem:[#allocation3 + $0x14] sm:$0x1] %vm3292_vm3, %v3284_v40  ;;  %v3238_v55 = vrot.slane %v3237_v46, 4  ;;  %v7173_v40 = vld [vmem:[%s9776_s14 + $0x24] ss:$8 sps:$4 sm:$0xff]  }
 0x7ca   :  { %3291 = vst.msk [vmem:[#allocation3 + $0xc] sm:$0x11] %vm8966_vm11, %v3285_v63  ;;  %v3251_v10 = vpop.permute.xlu0 %3250  ;;  %v7176_v63 = vld [vmem:[%s9776_s14 + $0x34] ss:$8 sps:$4 sm:$0xff]  }
 0x7cb   :  { %v3240_v31 = vsel %vm1597_vm9, %v3238_v55, %v3237_v46  ;;  %3248 = vst.msk [vmem:[#allocation3 + $0x8] sm:$0x2] %vm3247_vm12, %v3238_v55  ;;  %v3252_v19 = vrot.slane %v3251_v10, 4  ;;  %v7171_v46 = vld [vmem:[%s9776_s14 + $0x20] ss:$8 sps:$4 sm:$0xff]  }
 0x7cc   :  { %3246 = vst.msk [vmem:[#allocation3] sm:$0x22] %vm8973_vm1, %v3240_v31  ;;  %v3271_v30 = vpop.permute.xlu1 %3270  ;;  %v7179_v55 = vld [vmem:[%s9776_s14 + $0x44] ss:$8 sps:$4 sm:$0xff]   ;;  %v7182_v31 = vld [vmem:[%s9776_s14 + $0x54] ss:$8 sps:$4 sm:$0xff]  }
 0x7cd   :  { %v3253_v41 = vsel %vm1597_vm9, %v3252_v19, %v3251_v10  ;;  %3261 = vst.msk [vmem:[#allocation3 + $0x8] sm:$0x4] %vm3260_vm15, %v3252_v19  ;;  %v3272_v44 = vrot.slane %v3271_v30, 4  ;;  %v7177_v10 = vld [vmem:[%s9776_s14 + $0x40] ss:$8 sps:$4 sm:$0xff]  }
 0x7ce   :  { %3259 = vst.msk [vmem:[#allocation3] sm:$0x44] %vm8982_vm7, %v3253_v41  ;;  %v7185_v19 = vld [vmem:[%s9776_s14 + $0x64] ss:$8 sps:$4 sm:$0xff]   ;;  %v7188_v41 = vld [vmem:[%s9776_s14 + $0x74] ss:$8 sps:$4 sm:$0xff]  }
 0x7cf   :  { %v3273_v50 = vsel %vm1597_vm9, %v3272_v44, %v3271_v30  ;;  %3281 = vst.msk [vmem:[#allocation3 + $0x8] sm:$0x8] %vm3280_vm4, %v3272_v44  ;;  %v7183_v30 = vld [vmem:[%s9776_s14 + $0x60] ss:$8 sps:$4 sm:$0xff]   ;;  %v7191_v44 = vld [vmem:[%s9776_s14 + $0x84] ss:$8 sps:$4 sm:$0xff]  }
 0x7d0   :  { %3279 = vst.msk [vmem:[#allocation3] sm:$0x88] %vm8991_vm6, %v3273_v50  ;;  %v7189_v50 = vld [vmem:[%s9776_s14 + $0x80] ss:$8 sps:$4 sm:$0xff]  }
 0x7d6   :  { %v3388_v39 = vld [vmem:[#allocation3 + $0x8] sm:$0xe] }
 0x7d7   :  { %v3387_v11 = vld [vmem:[#allocation3] sm:$0xee] }
 0x7d8   :  { %v3312_v56 = vpop.permute.xlu0 %3311  ;;  %v3303_v57 = vpop.permute.xlu1 %3302  ;;  %v9056_v23 = vld [vmem:[#allocation3] sm:$0xff] }
 0x7d9   :  { %v3313_v59 = vrot.slane %v3312_v56, 4  ;;  %v3304_v45 = vrot.slane %v3303_v57, 4 }
 0x7db   :  { %v3314_v54 = vsel %vm1597_vm9, %v3313_v59, %v3312_v56  ;;  %3318 = vst.msk [vmem:[#allocation3 + $0x14] sm:$0x4] %vm3260_vm15, %v3313_v59  ;;  %v3305_v60 = vsel %vm1597_vm9, %v3304_v45, %v3303_v57  ;;  %v7194_v56 = vld [vmem:[%s9776_s14 + $0x94] ss:$8 sps:$4 sm:$0xff]   ;;  %v7192_v57 = vld [vmem:[%s9776_s14 + $0x90] ss:$8 sps:$4 sm:$0xff]  }
 0x7dc   :  { %3309 = vst.msk [vmem:[#allocation3 + $0x14] sm:$0x2] %vm3247_vm12, %v3304_v45  ;;  %v3336_v62 = vpop.permute.xlu0 %3335  ;;  %v3328_v3 = vpop.permute.xlu1 %3327  ;;  %v7197_v59 = vld [vmem:[%s9776_s14 + $0xa4] ss:$8 sps:$4 sm:$0xff]   ;;  %v7195_v45 = vld [vmem:[%s9776_s14 + $0xa0] ss:$8 sps:$4 sm:$0xff]  }
 0x7dd   :  { %3317 = vst.msk [vmem:[#allocation3 + $0xc] sm:$0x44] %vm8982_vm7, %v3314_v54  ;;  %v3337_v4 = vrot.slane %v3336_v62, 4  ;;  %v3329_v6 = vrot.slane %v3328_v3, 4  ;;  %vm3453_vm7 = vcmask 1046528   ;;  %vm4455_vm12 = vcmask 123905  }
 0x7de   :  { %3308 = vst.msk [vmem:[#allocation3 + $0xc] sm:$0x22] %vm8973_vm1, %v3305_v60  ;;  %v7200_v54 = vld [vmem:[%s9776_s14 + $0xb4] ss:$8 sps:$4 sm:$0xff]   ;;  %v7198_v60 = vld [vmem:[%s9776_s14 + $0xb0] ss:$8 sps:$4 sm:$0xff]  }
 0x7df   :  { %v3338_v7 = vsel %vm1597_vm9, %v3337_v4, %v3336_v62  ;;  %3342 = vst.msk [vmem:[#allocation3 + $0x20] sm:$0x1] %vm3292_vm3, %v3337_v4  ;;  %v3330_v8 = vsel %vm1597_vm9, %v3329_v6, %v3328_v3  ;;  %v7203_v62 = vld [vmem:[%s9776_s14 + $0xc4] ss:$8 sps:$4 sm:$0xff]   ;;  %v7201_v3 = vld [vmem:[%s9776_s14 + $0xc0] ss:$8 sps:$4 sm:$0xff]  }
 0x7e0   :  { %3334 = vst.msk [vmem:[#allocation3 + $0x14] sm:$0x8] %vm3280_vm4, %v3329_v6  ;;  %v7206_v4 = vld [vmem:[%s9776_s14 + $0xd4] ss:$8 sps:$4 sm:$0xff]   ;;  %v7204_v6 = vld [vmem:[%s9776_s14 + $0xd0] ss:$8 sps:$4 sm:$0xff]   ;;  %vm9414_vm4 = vmor %vm9825_vm8, %vm9824_vm10 }
 0x7e1   :  { %3341 = vst.msk [vmem:[#allocation3 + $0x18] sm:$0x11] %vm8966_vm11, %v3338_v7  ;;  %v7209_v7 = vld [vmem:[%s9776_s14 + $0xe4] ss:$8 sps:$4 sm:$0xff]   ;;  %vm4114_vm1 = vcmask 1045504   ;;  %vm4466_vm3 = vcmask 124930   ;;  %vm9405_vm11 = vmor %vm3277_vm5, %vm689_vm13 }
 0x7e2   :  { %3333 = vst.msk [vmem:[#allocation3 + $0xc] sm:$0x88] %vm8991_vm6, %v3330_v8  ;;  %v7207_v8 = vld [vmem:[%s9776_s14 + $0xe0] ss:$8 sps:$4 sm:$0xff]   ;;  %vm4470_vm6 = vcmask 125955   ;;  %vm9823_vm15 = vcmask 130048  }
 0x7e3   :  { %vm9828_vm5 = vmmov %vm9823_vm15  ;;  %vm4482_vm13 = vcmask 122880  }
 0x7e4   :  { %vm9829_vm14 = vmmov %vm9828_vm5 }
 0x7e5   :  { %vm9834_vm8 = vmmov %vm9828_vm5 }
 0x7e6   :  { %v7162_v49 = vld [vmem:[#allocation3 + $0x20] ss:$0 sps:$4 sm:$0x11]  }
 0x7e7   :  { %v9038_v33 = vld [vmem:[#allocation3 + $0x14] sm:$0xf]  ;;  %v3461_v35 = vrot.slane %v7162_v49, 1 }
 0x7e8   :  { %v3389_v12 = vld [vmem:[#allocation3 + $0x18] sm:$0x11]  ;;  %v5920_v20 = vcombine.low %v3388_v39, %v9038_v33  ;;  %v3344_v39 = vld [vmem:[#allocation3 + $0x8] sm:$0xf] }
 0x7e9   :  { %v9017_v9 = vld [vmem:[#allocation3 + $0xc] sm:$0xff]  ;;  %v5922_v14 = vcombine.high %v3389_v12, %v3389_v12  ;;  %v5921_v16 = vcombine.low %v3389_v12, %v3389_v12  ;;  %v7210_v12 = vld [vmem:[%s9776_s14 + $0xf0] ss:$8 sps:$4 sm:$0xff]   ;;  %v5967_v49 = vcombine.low %v3344_v39, %v9038_v33 }
 0x7ea   :  { %v5919_v22 = vcombine.high %v3387_v11, %v9017_v9  ;;  %v5918_v15 = vcombine.low %v3387_v11, %v9017_v9  ;;  %v3460_v28 = vrot.slane %v5920_v20, 1  ;;  %v5966_v1 = vcombine.high %v9056_v23, %v9017_v9  ;;  %v7212_v11 = vld [vmem:[%s9776_s14 + $0xf4] ss:$8 sps:$4 sm:$0xff]   ;;  %v7226_v20 = vld [vmem:[%s9776_s14 + $0x280] ss:$8 sps:$4 sm:$0xff]  }
 0x7eb   :  { %v3458_v24 = vrot.slane %v5922_v14, 1  ;;  %v3455_v27 = vrot.slane %v5921_v16, 1  ;;  %v7213_v14 = vld [vmem:[%s9776_s14 + $0x100] ss:$8 sps:$4 sm:$0xff]   ;;  %v7218_v16 = vld [vmem:[%s9776_s14 + $0x114] ss:$8 sps:$4 sm:$0xff]  }
 0x7ec   :  { %v3457_v17 = vrot.slane %v5919_v22, 1  ;;  %v3454_v25 = vrot.slane %v5918_v15, 1  ;;  %v3462_v53 = vsel %vm3453_vm7, %v3460_v28, %v3461_v35  ;;  %v7215_v22 = vld [vmem:[%s9776_s14 + $0x104] ss:$8 sps:$4 sm:$0xff]   ;;  %v5965_v15 = vcombine.low %v9056_v23, %v9017_v9  ;;  %v7231_v28 = vld [vmem:[%s9776_s14 + $0x290] ss:$8 sps:$4 sm:$0xff]  }
 0x7ed   :  { %v7236_v35 = vld [vmem:[%s9776_s14 + $0x2a4] ss:$8 sps:$4 sm:$0xff]   ;;  %v7239_v23 = vld [vmem:[%s9776_s14 + $0x2b4] ss:$8 sps:$4 sm:$0xff]  }
 0x7ee   :  { %v3459_v0 = vsel %vm3453_vm7, %v3457_v17, %v3458_v24  ;;  %v3456_v29 = vsel %vm3453_vm7, %v3454_v25, %v3455_v27  ;;  %v7216_v17 = vld [vmem:[%s9776_s14 + $0x110] ss:$8 sps:$4 sm:$0xff]   ;;  %v7221_v24 = vld [vmem:[%s9776_s14 + $0x124] ss:$8 sps:$4 sm:$0xff]   ;;  %v7219_v25 = vld [vmem:[%s9776_s14 + $0x120] ss:$8 sps:$4 sm:$0xff]  }
 0x7ef   :  { %3700 = vmatprep.mubr.bf16.mxu1 %v3459_v0  ;;  %v9173_v27 = vld [vmem:[#allocation3 + $0x18] sm:$0x33]  ;;  %v9178_v0 = vld [vmem:[#allocation3] sm:$0xcc] }
 0x7f0   :  { %3701 = vmatmul.mubr.bf16.vlgmr.msra.gmra.mrb[84].mxu1 %v3456_v29  ;;  %v6050_v29 = vcombine.high %v9178_v0, %v9017_v9 }
 0x7f1   :  { %3712 = vmatpush1.bf16.msra.mxu1 %v7147_v58  ;;  %3743 = vmatprep.mubr.bf16.mxu1 %v9032_v42  ;;  %v7224_v58 = vld [vmem:[%s9776_s14 + $0x134] ss:$8 sps:$4 sm:$0xff]  }
 0x7f2   :  { %3713 = vmatprep.subr.bf16.mxu1 %v7154_v34  ;;  %v6053_v34 = vcombine.high %v9173_v27, %v9173_v27 }
 0x7f5   :  { %3714 = vmatpush1.bf16.msra.mxu1 %v7152_v37  ;;  %v7222_v37 = vld [vmem:[%s9776_s14 + $0x130] ss:$8 sps:$4 sm:$0xff]  }
 0x7f6   :  { %3715 = vmatprep.subr.bf16.mxu1 %v7157_v48  ;;  %v7228_v48 = vld [vmem:[%s9776_s14 + $0x284] ss:$8 sps:$4 sm:$0xff]  }
 0x7f9   :  { %3716 = vmatpush1.bf16.msra.mxu1 %v7155_v18  ;;  %v4118_v18 = vrot.slane %v6050_v29, 2 }
 0x7fa   :  { %3717 = vmatprep.subr.bf16.mxu1 %v7160_v13  ;;  %v4119_v13 = vrot.slane %v6053_v34, 2 }
 0x7fd   :  { %3718 = vmatpush1.bf16.msra.mxu1 %v7158_v21  ;;  %v7233_v21 = vld [vmem:[%s9776_s14 + $0x294] ss:$8 sps:$4 sm:$0xff]  }
 0x7fe   :  { %3967 = vmatprep.subr.bf16.mxu1 %v7165_v51  ;;  %v4120_v51 = vsel %vm4114_vm1, %v4118_v18, %v4119_v13  ;;  %v7293_v13 = vld [vmem:[%s9778_s16 + $0x90] sm:$0xff]  }
 0x800   :  { %5964 = vmatmul.mubr.msk.bf16.vlgmr.msra.gmra.mrb[84].mxu1 %vm2696_vm0, %v3462_v53  ;;  %v7242_v53 = vld [vmem:[%s9776_s14 + $0x2c4] ss:$8 sps:$4 sm:$0xff]  }
 0x801   :  { %3968 = vmatpush1.bf16.msra.mxu1 %v7163_v38  ;;  %3999 = vmatprep.mubr.bf16.mxu1 %v5966_v1  ;;  %v7234_v38 = vld [vmem:[%s9776_s14 + $0x2a0] ss:$8 sps:$4 sm:$0xff]  }
 0x802   :  { %3969 = vmatprep.subr.bf16.mxu1 %v7170_v52  ;;  %v7237_v52 = vld [vmem:[%s9776_s14 + $0x2b0] ss:$8 sps:$4 sm:$0xff]   ;;  %v7240_v1 = vld [vmem:[%s9776_s14 + $0x2c0] ss:$8 sps:$4 sm:$0xff]  }
 0x805   :  { %3970 = vmatpush1.bf16.msra.mxu1 %v7168_v2  ;;  %v7245_v2 = vld [vmem:[%s9776_s14 + $0x2d4] ss:$8 sps:$4 sm:$0xff]  }
 0x806   :  { %3971 = vmatprep.subr.bf16.mxu1 %v7173_v40  ;;  %v7243_v40 = vld [vmem:[%s9776_s14 + $0x2d0] ss:$8 sps:$4 sm:$0xff]  }
 0x809   :  { %3972 = vmatpush1.bf16.msra.mxu1 %v7171_v46  ;;  %v7248_v46 = vld [vmem:[%s9776_s14 + $0x2e4] ss:$8 sps:$4 sm:$0xff]  }
 0x80a   :  { %3973 = vmatprep.subr.bf16.mxu1 %v7176_v63  ;;  %v7246_v63 = vld [vmem:[%s9776_s14 + $0x2e0] ss:$8 sps:$4 sm:$0xff]  }
 0x80d   :  { %3974 = vmatpush1.bf16.msra.mxu1 %v7174_v5  ;;  %v7251_v5 = vld [vmem:[%s9776_s14 + $0x2f4] ss:$8 sps:$4 sm:$0xff]  }
 0x80e   :  { %3975 = vmatprep.subr.bf16.mxu1 %v7179_v55  ;;  %v7249_v55 = vld [vmem:[%s9776_s14 + $0x2f0] ss:$8 sps:$4 sm:$0xff]  }
 0x811   :  { %3976 = vmatpush1.bf16.msra.mxu1 %v7177_v10  ;;  %v7254_v10 = vld [vmem:[%s9776_s14 + $0x304] ss:$8 sps:$4 sm:$0xff]  }
 0x812   :  { %3977 = vmatprep.subr.bf16.mxu1 %v7182_v31  ;;  %v7252_v31 = vld [vmem:[%s9776_s14 + $0x300] ss:$8 sps:$4 sm:$0xff]  }
 0x815   :  { %3978 = vmatpush1.bf16.msra.mxu1 %v7180_v32  ;;  %v7257_v32 = vld [vmem:[%s9776_s14 + $0x314] ss:$8 sps:$4 sm:$0xff]  }
 0x816   :  { %3979 = vmatprep.subr.bf16.mxu1 %v7185_v19  ;;  %v7255_v19 = vld [vmem:[%s9776_s14 + $0x310] ss:$8 sps:$4 sm:$0xff]  }
 0x819   :  { %3980 = vmatpush1.bf16.msra.mxu1 %v7183_v30  ;;  %v7260_v30 = vld [vmem:[%s9776_s14 + $0x324] ss:$8 sps:$4 sm:$0xff]  }
 0x81a   :  { %3981 = vmatprep.subr.bf16.mxu1 %v7188_v41  ;;  %v7258_v41 = vld [vmem:[%s9776_s14 + $0x320] ss:$8 sps:$4 sm:$0xff]  }
 0x81d   :  { %3982 = vmatpush1.bf16.msra.mxu1 %v7186_v43  ;;  %v7263_v43 = vld [vmem:[%s9776_s14 + $0x334] ss:$8 sps:$4 sm:$0xff]  }
 0x81e   :  { %3983 = vmatprep.subr.bf16.mxu1 %v7191_v44  ;;  %v7261_v44 = vld [vmem:[%s9776_s14 + $0x330] ss:$8 sps:$4 sm:$0xff]  }
 0x821   :  { %3984 = vmatpush1.bf16.msra.mxu1 %v7189_v50  ;;  %v7266_v50 = vld [vmem:[%s9776_s14 + $0x344] ss:$8 sps:$4 sm:$0xff]  }
 0x822   :  { %3985 = vmatprep.subr.bf16.mxu1 %v7194_v56  ;;  %v7264_v56 = vld [vmem:[%s9776_s14 + $0x340] ss:$8 sps:$4 sm:$0xff]  }
 0x825   :  { %3986 = vmatpush1.bf16.msra.mxu1 %v7192_v57  ;;  %v7269_v57 = vld [vmem:[%s9776_s14 + $0x354] ss:$8 sps:$4 sm:$0xff]  }
 0x826   :  { %3987 = vmatprep.subr.bf16.mxu1 %v7197_v59  ;;  %v7267_v59 = vld [vmem:[%s9776_s14 + $0x350] ss:$8 sps:$4 sm:$0xff]  }
 0x829   :  { %3988 = vmatpush1.bf16.msra.mxu1 %v7195_v45  ;;  %v7272_v45 = vld [vmem:[%s9776_s14 + $0x364] ss:$8 sps:$4 sm:$0xff]  }
 0x82a   :  { %3989 = vmatprep.subr.bf16.mxu1 %v7200_v54  ;;  %v7270_v54 = vld [vmem:[%s9776_s14 + $0x360] ss:$8 sps:$4 sm:$0xff]  }
 0x82d   :  { %3990 = vmatpush1.bf16.msra.mxu1 %v7198_v60  ;;  %v7275_v60 = vld [vmem:[%s9776_s14 + $0x374] ss:$8 sps:$4 sm:$0xff]  }
 0x82e   :  { %3991 = vmatprep.subr.bf16.mxu1 %v7203_v62  ;;  %v6049_v62 = vcombine.low %v9178_v0, %v9017_v9  ;;  %v7278_v9 = vld [vmem:[%s9776_s14 + $0x380] ss:$8 sps:$4 sm:$0xff]  }
 0x831   :  { %3992 = vmatpush1.bf16.msra.mxu1 %v7201_v3  ;;  %v6052_v3 = vcombine.low %v9173_v27, %v9173_v27  ;;  %v7287_v27 = vld [vmem:[%s9776_s14 + $0x3b0] ss:$8 sps:$4 sm:$0xff]  }
 0x832   :  { %3993 = vmatprep.subr.bf16.mxu1 %v7206_v4  ;;  %v7273_v4 = vld [vmem:[%s9776_s14 + $0x370] ss:$8 sps:$4 sm:$0xff]  }
 0x835   :  { %3994 = vmatpush1.bf16.msra.mxu1 %v7204_v6  ;;  %v7280_v6 = vld [vmem:[%s9776_s14 + $0x384] ss:$8 sps:$4 sm:$0xff]  }
 0x836   :  { %3995 = vmatprep.subr.bf16.mxu1 %v7209_v7  ;;  %v4115_v7 = vrot.slane %v6049_v62, 2 }
 0x839   :  { %3996 = vmatpush1.bf16.msra.mxu1 %v7207_v8  ;;  %v4116_v8 = vrot.slane %v6052_v3, 2 }
 0x83a   :  { %3997 = vmatprep.subr.bf16.mxu1 %v7212_v11  ;;  %v7283_v11 = vld [vmem:[%s9776_s14 + $0x394] ss:$8 sps:$4 sm:$0xff]  }
 0x83d   :  { %3998 = vmatpush1.bf16.msra.mxu1 %v7210_v12  ;;  %v4117_v12 = vsel %vm4114_vm1, %v4115_v7, %v4116_v8 }
 0x83e   :  { %4010 = vmatprep.subr.bf16.mxu1 %v7215_v22  ;;  %v7281_v22 = vld [vmem:[%s9776_s14 + $0x390] ss:$8 sps:$4 sm:$0xff]  }
 0x840   :  { %4000 = vmatmul.mubr.bf16.vlgmr.msra.gmra.mrb[84].mxu1 %v5965_v15  ;;  %v7284_v15 = vld [vmem:[%s9776_s14 + $0x3a0] ss:$8 sps:$4 sm:$0xff]  }
 0x841   :  { %4011 = vmatpush1.bf16.msra.mxu1 %v7213_v14  ;;  %4042 = vmatprep.mubr.bf16.mxu1 %v9032_v42  ;;  %v7286_v14 = vld [vmem:[%s9776_s14 + $0x3a4] ss:$8 sps:$4 sm:$0xff]  }
 0x842   :  { %4012 = vmatprep.subr.bf16.mxu1 %v7218_v16  ;;  %v7289_v16 = vld [vmem:[%s9776_s14 + $0x3b4] ss:$8 sps:$4 sm:$0xff]  }
 0x845   :  { %4013 = vmatpush1.bf16.msra.mxu1 %v7216_v17  ;;  %v4054_v17 = vld [vmem:[#allocation3 + $0x8] sm:$0xc] }
 0x846   :  { %4014 = vmatprep.subr.bf16.mxu1 %v7221_v24  ;;  %v6051_v24 = vcombine.low %v4054_v17, %v9038_v33  ;;  %v4419_v33 = vld [vmem:[%s9777_s15] sm:$0x3] }
 0x847   :  { %v4424_v34 = vrot.slane %v4419_v33, %v2855_v61 }
 0x849   :  { %4015 = vmatpush1.bf16.msra.mxu1 %v7219_v25  ;;  %v7291_v25 = vld [vmem:[#allocation3 + $0x20] ss:$0 sps:$4 sm:$0x33]  }
 0x84a   :  { %4016 = vmatprep.subr.bf16.mxu1 %v7224_v58  ;;  %v4121_v58 = vrot.slane %v6051_v24, 2  ;;  %v4122_v0 = vrot.slane %v7291_v25, 2 }
 0x84c   :  { %v4123_v29 = vsel %vm4114_vm1, %v4121_v58, %v4122_v0 }
 0x84d   :  { %4017 = vmatpush1.bf16.msra.mxu1 %v7222_v37  ;;  %v4428_v37 = vrot.slane %v4419_v33, %v2859_v47  ;;  %v7294_v47 = vld [vmem:[%s9778_s16 + $0xd8] sm:$0xff]  }
 0x84e   :  { %4329 = vmatprep.subr.bf16.mxu1 %v7228_v48  ;;  %v7292_v48 = vld [vmem:[%s9778_s16 + $0xd0] sm:$0xff]  }
 0x84f   :  { %6460 = vmatprep.subr.bf16.mxu0 %v7292_v48 }
 0x850   :  { %6008 = vmatmul.mubr.msk.bf16.vlgmr.msra.gmra.mrb[84].mxu1 %vm2696_vm0, %v5967_v49  ;;  %6461 = vmatpush3.bf16.msra.mxu0 %v7293_v13 }
 0x851   :  { %4330 = vmatpush1.bf16.msra.mxu1 %v7226_v20  ;;  %4361 = vmatprep.mubr.bf16.mxu1 %v4120_v51 }
 0x852   :  { %4331 = vmatprep.subr.bf16.mxu1 %v7233_v21  ;;  %6462 = vmatprep.subr.bf16.mxu0 %v7294_v47 }
 0x855   :  { %4332 = vmatpush1.bf16.msra.mxu1 %v7231_v28 }
 0x856   :  { %4333 = vmatprep.subr.bf16.mxu1 %v7236_v35 }
 0x859   :  { %4334 = vmatpush1.bf16.msra.mxu1 %v7234_v38 }
 0x85a   :  { %4335 = vmatprep.subr.bf16.mxu1 %v7239_v23  ;;  %v7295_v23 = vld [vmem:[%s9778_s16 + $0x98] sm:$0xff]  }
 0x85b   :  { %6463 = vmatpush3.bf16.msra.mxu0 %v7295_v23 }
 0x85d   :  { %4336 = vmatpush1.bf16.msra.mxu1 %v7237_v52 }
 0x85e   :  { %4337 = vmatprep.subr.bf16.mxu1 %v7242_v53 }
 0x861   :  { %4338 = vmatpush1.bf16.msra.mxu1 %v7240_v1 }
 0x862   :  { %4339 = vmatprep.subr.bf16.mxu1 %v7245_v2  ;;  %v7296_v2 = vld [vmem:[%s9778_s16 + $0xe0] sm:$0xff]  }
 0x863   :  { %6464 = vmatprep.subr.bf16.mxu0 %v7296_v2 }
 0x865   :  { %4340 = vmatpush1.bf16.msra.mxu1 %v7243_v40 }
 0x866   :  { %4341 = vmatprep.subr.bf16.mxu1 %v7248_v46 }
 0x869   :  { %4342 = vmatpush1.bf16.msra.mxu1 %v7246_v63  ;;  %v7297_v63 = vld [vmem:[%s9778_s16 + $0xa0] sm:$0xff]  }
 0x86a   :  { %4343 = vmatprep.subr.bf16.mxu1 %v7251_v5  ;;  %6465 = vmatpush3.bf16.msra.mxu0 %v7297_v63 }
 0x86d   :  { %4344 = vmatpush1.bf16.msra.mxu1 %v7249_v55  ;;  %v7298_v55 = vld [vmem:[%s9778_s16 + $0xe8] sm:$0xff]  }
 0x86e   :  { %4345 = vmatprep.subr.bf16.mxu1 %v7254_v10  ;;  %6466 = vmatprep.subr.bf16.mxu0 %v7298_v55 }
 0x871   :  { %4346 = vmatpush1.bf16.msra.mxu1 %v7252_v31  ;;  %v7299_v31 = vld [vmem:[%s9778_s16 + $0xa8] sm:$0xff]  }
 0x872   :  { %4347 = vmatprep.subr.bf16.mxu1 %v7257_v32  ;;  %6467 = vmatpush3.bf16.msra.mxu0 %v7299_v31 }
 0x875   :  { %4348 = vmatpush1.bf16.msra.mxu1 %v7255_v19  ;;  %v7300_v19 = vld [vmem:[%s9778_s16 + $0xf0] sm:$0xff]  }
 0x876   :  { %4349 = vmatprep.subr.bf16.mxu1 %v7260_v30  ;;  %6468 = vmatprep.subr.bf16.mxu0 %v7300_v19 }
 0x879   :  { %4350 = vmatpush1.bf16.msra.mxu1 %v7258_v41  ;;  %v7301_v41 = vld [vmem:[%s9778_s16 + $0xb0] sm:$0xff]  }
 0x87a   :  { %4351 = vmatprep.subr.bf16.mxu1 %v7263_v43  ;;  %6469 = vmatpush3.bf16.msra.mxu0 %v7301_v41 }
 0x87d   :  { %4352 = vmatpush1.bf16.msra.mxu1 %v7261_v44  ;;  %v7303_v44 = vld [vmem:[%s9778_s16 + $0xb8] sm:$0xff]  }
 0x87e   :  { %4353 = vmatprep.subr.bf16.mxu1 %v7266_v50  ;;  %v7304_v50 = vld [vmem:[%s9778_s16 + $0x100] sm:$0xff]  }
 0x881   :  { %4354 = vmatpush1.bf16.msra.mxu1 %v7264_v56 }
 0x882   :  { %4355 = vmatprep.subr.bf16.mxu1 %v7269_v57 }
 0x885   :  { %4356 = vmatpush1.bf16.msra.mxu1 %v7267_v59  ;;  %v7305_v59 = vld [vmem:[%s9778_s16 + $0xc0] sm:$0xff]  }
 0x886   :  { %4357 = vmatprep.subr.bf16.mxu1 %v7272_v45  ;;  %v7306_v45 = vld [vmem:[%s9778_s16 + $0x108] sm:$0xff]  }
 0x889   :  { %4358 = vmatpush1.bf16.msra.mxu1 %v7270_v54  ;;  %v7307_v54 = vld [vmem:[%s9778_s16 + $0xc8] sm:$0xff]  }
 0x88a   :  { %4359 = vmatprep.subr.bf16.mxu1 %v7275_v60  ;;  %v9392_v60 = vld [vmem:[%s9778_s16 + $0x110] sm:$0xff]  }
 0x88d   :  { %4360 = vmatpush1.bf16.msra.mxu1 %v7273_v4 }
 0x88e   :  { %4372 = vmatprep.subr.bf16.mxu1 %v7280_v6 }
 0x890   :  { %4362 = vmatmul.mubr.bf16.vlgmr.msra.gmra.mrb[84].mxu1 %v4117_v12 }
 0x891   :  { %4373 = vmatpush1.bf16.msra.mxu1 %v7278_v9  ;;  %4404 = vmatprep.mubr.bf16.mxu1 %v9032_v42 }
 0x892   :  { %4374 = vmatprep.subr.bf16.mxu1 %v7283_v11 }
 0x895   :  { %4375 = vmatpush1.bf16.msra.mxu1 %v7281_v22 }
 0x896   :  { %4376 = vmatprep.subr.bf16.mxu1 %v7286_v14 }
 0x899   :  { %4377 = vmatpush1.bf16.msra.mxu1 %v7284_v15 }
 0x89a   :  { %4378 = vmatprep.subr.bf16.mxu1 %v7289_v16  ;;  %v7324_v16 = vld [vmem:[%s9778_s16 + $0x48] sm:$0xff]  }
 0x89d   :  { %4379 = vmatpush1.bf16.msra.mxu1 %v7287_v27 }
 0x8a0   :  { %6095 = vmatmul.mubr.msk.bf16.vlgmr.msra.gmra.mrb[84].mxu1 %vm2696_vm0, %v4123_v29  ;;  %vm92_vm0 = vcmask 254976  }
 0x8a1   :  { %93 = vst.msk [vmem:[#allocation4 + $0x38] sm:$0x3] %vm92_vm0, %v9032_v42  ;;  %v7302_v42 = vld [vmem:[%s9778_s16 + $0xf8] sm:$0xff]   ;;  %vm9830_vm0 = vcmask 1040512  }
 0x8a2   :  { %6470 = vmatprep.subr.bf16.mxu0 %v7302_v42 }
 0x8a3   :  { %6471 = vmatpush3.bf16.msra.mxu0 %v7303_v44 }
 0x8a4   :  { %6472 = vmatprep.subr.bf16.mxu0 %v7304_v50 }
 0x8a7   :  { %6473 = vmatpush3.bf16.msra.mxu0 %v7305_v59 }
 0x8a8   :  { %6474 = vmatprep.subr.bf16.mxu0 %v7306_v45 }
 0x8ab   :  { %6475 = vmatpush3.bf16.msra.mxu0 %v7307_v54 }
 0x8ac   :  { %6910 = vmatprep.subr.bf16.mxu0 %v9392_v60 }
 0x973   :  { %v4406_v18 = vpop.f32.mrb[84].mxu1 }
 0x974   :  { %v4431_v39 = vadd.f32 %v4424_v34, %v4406_v18  ;;  %v4408_v20 = vpop.f32.mrb[85].mxu1 }
 0x975   :  { %v4432_v49 = vadd.f32 %v4428_v37, %v4408_v20  ;;  %v4410_v21 = vpop.f32.mrb[86].mxu1 }
 0x976   :  { %v4435_v51 = vmax.f32 %v4431_v39, 0.0  ;;  %v4433_v61 = vadd.f32 %v4424_v34, %v4410_v21  ;;  %v4412_v28 = vpop.f32.mrb[87].mxu1 }
 0x977   :  { %v4436_v35 = vmax.f32 %v4432_v49, 0.0  ;;  %v4434_v38 = vadd.f32 %v4428_v37, %v4412_v28 }
 0x978   :  { %v4437_v52 = vmax.f32 %v4433_v61, 0.0 }
 0x979   :  { %v6263_v53 = vpack.c.bf16 %v4436_v35, %v4435_v51  ;;  %v4438_v1 = vmax.f32 %v4434_v38, 0.0 }
 0x97b   :  { %v6264_v40 = vpack.c.bf16 %v4438_v1, %v4437_v52  ;;  %4486 = vrot.lane.b32.xlu0 %v6263_v53, %s7448_s21  ;;  %v4446_v46 = vrot.slane %v6263_v53, 7  ;;  %v4457_v5 = vrot.slane %v6263_v53, 6  ;;  %v6097_v10 = vrot.slane %v6263_v53, 9 }
 0x97d   :  { %4447 = vrot.lane.b32.xlu1 %v4446_v46, %s7448_s21  ;;  %v4512_v32 = vrot.slane %v6264_v40, 7  ;;  %v4496_v30 = vrot.slane %v4446_v46, 4  ;;  %v6099_v43 = vrot.slane %v6264_v40, 9  ;;  %v4521_v56 = vrot.slane %v6264_v40, 6 }
 0x97f   :  { %4458 = vrot.lane.b32.xlu0 %v4457_v5, %s7448_s21  ;;  %v4554_v57 = vrot.slane %v4512_v32, 4 }
 0x981   :  { %4474 = vrot.lane.b32.xlu1 %v6097_v10, %s7448_s21 }
 0x983   :  { %4513 = vrot.lane.b32.xlu0 %v4512_v32, %s7448_s21 }
 0x985   :  { %4497 = vrot.lane.b32.xlu1 %v4496_v30, %s7448_s21 }
 0x987   :  { %4534 = vrot.lane.b32.xlu0 %v6099_v43, %s7448_s21 }
 0x989   :  { %4522 = vrot.lane.b32.xlu1 %v4521_v56, %s7448_s21  ;;  %v7316_v56 = vld [vmem:[%s9778_s16 + $0x118] sm:$0xff]  }
 0x98b   :  { %4555 = vrot.lane.b32.xlu0 %v4554_v57, %s7448_s21 }
 0x98d   :  { %4544 = vrot.lane.b32.xlu1 %v6264_v40, %s7448_s21 }
 0x991   :  { %2743 = vrot.lane.b32.xlu1 %v8720_v26, %s7449_s8 }
 0x9ed   :  { %v4487_v3 = vpop.permute.xlu0 %4486 }
 0x9ee   :  { %v4488_v6 = vrot.slane %v4487_v3, 4 }
 0x9ef   :  { %v4448_v26 = vpop.permute.xlu1 %4447 }
 0x9f0   :  { %v4489_v7 = vsel %vm9823_vm15, %v4488_v6, %v4487_v3  ;;  %4493 = vst.msk [vmem:[#allocation4 + $0x14] sm:$0x4] %vm4466_vm3, %v4488_v6  ;;  %v4449_v9 = vrot.slane %v4448_v26, 4  ;;  %vm9831_vm15 = vcmask 1044484  }
 0x9f1   :  { %4495 = vst.msk [vmem:[#allocation4 + $0x14] sm:$0x8] %vm4470_vm6, %v4488_v6  ;;  %v4459_v11 = vpop.permute.xlu0 %4458  ;;  %vm9431_vm10 = vmor %vm9831_vm15, %vm9830_vm0 }
 0x9f2   :  { %4492 = vst.msk [vmem:[#allocation4 + $0xc] sm:$0x44] %vm9399_vm2, %v4489_v7  ;;  %v4450_v12 = vsel %vm9828_vm5, %v4449_v9, %v4448_v26  ;;  %v4460_v22 = vrot.slane %v4459_v11, 4  ;;  %vm9836_vm0 = vmmov %vm9828_vm5  ;;  %v7319_v26 = vld [vmem:[%s9778_s16 + $0x40] sm:$0xff]  }
 0x9f3   :  { %4494 = vst.msk [vmem:[#allocation4 + $0xc] sm:$0x88] %vm9405_vm11, %v4489_v7  ;;  %v4475_v14 = vpop.permute.xlu1 %4474  ;;  %vm9837_vm15 = vmmov %vm9836_vm0 }
 0x9f4   :  { %4456 = vst.msk [vmem:[#allocation4 + $0x8] sm:$0x2] %vm4455_vm12, %v4449_v9  ;;  %v4461_v15 = vsel %vm9829_vm14, %v4460_v22, %v4459_v11  ;;  %v4476_v17 = vrot.slane %v4475_v14, 4  ;;  %vm9835_vm14 = vmmov %vm9828_vm5 }
 0x9f5   :  { %4454 = vst.msk [vmem:[#allocation4] sm:$0x22] %vm9414_vm4, %v4450_v12  ;;  %v4514_v24 = vpop.permute.xlu0 %4513 }
 0x9f6   :  { %4467 = vst.msk [vmem:[#allocation4 + $0x8] sm:$0x4] %vm4466_vm3, %v4460_v22  ;;  %v4477_v25 = vsel %vm9834_vm8, %v4476_v17, %v4475_v14  ;;  %v4515_v27 = vrot.slane %v4514_v24, 4  ;;  %vm9840_vm8 = vcmask 123904   ;;  %v7321_v14 = vld [vmem:[%s9778_s16] sm:$0xff]  }
 0x9f7   :  { %4471 = vst.msk [vmem:[#allocation4 + $0x8] sm:$0x8] %vm4470_vm6, %v4460_v22  ;;  %v4498_v58 = vpop.permute.xlu1 %4497 }
 0x9f8   :  { %4465 = vst.msk [vmem:[#allocation4] sm:$0x44] %vm9399_vm2, %v4461_v15  ;;  %v4516_v0 = vsel %vm9828_vm5, %v4515_v27, %v4514_v24  ;;  %v4499_v29 = vrot.slane %v4498_v58, 4 }
 0x9f9   :  { %4469 = vst.msk [vmem:[#allocation4] sm:$0x88] %vm9405_vm11, %v4461_v15  ;;  %v4535_v33 = vpop.permute.xlu0 %4534 }
 0x9fa   :  { %4483 = vst.msk [vmem:[#allocation4 + $0x14] sm:$0x1] %vm4482_vm13, %v4476_v17  ;;  %v4500_v34 = vsel %vm9835_vm14, %v4499_v29, %v4498_v58  ;;  %4504 = vst.msk [vmem:[#allocation4 + $0x20] sm:$0x1] %vm4482_vm13, %v4499_v29  ;;  %v4536_v37 = vrot.slane %v4535_v33, 4  ;;  %v7327_v58 = vld [vmem:[%s9778_s16 + $0x10] sm:$0xff]  }
 0x9fb   :  { %4485 = vst.msk [vmem:[#allocation4 + $0x14] sm:$0x2] %vm4455_vm12, %v4476_v17  ;;  %4520 = vst.msk [vmem:[#allocation4 + $0x20] sm:$0x2] %vm4455_vm12, %v4515_v27  ;;  %v4523_v48 = vpop.permute.xlu1 %4522  ;;  %v7326_v27 = vld [vmem:[%s9778_s16 + $0x50] sm:$0xff]   ;;  %v7329_v29 = vld [vmem:[%s9778_s16 + $0x18] sm:$0xff]  }
 0x9fc   :  { %4481 = vst.msk [vmem:[#allocation4 + $0xc] sm:$0x11] %vm9431_vm10, %v4477_v25  ;;  %4503 = vst.msk [vmem:[#allocation4 + $0x18] sm:$0x11] %vm9431_vm10, %v4500_v34  ;;  %v4537_v18 = vsel %vm9836_vm0, %v4536_v37, %v4535_v33  ;;  %v4524_v13 = vrot.slane %v4523_v48, 4  ;;  %v7330_v33 = vld [vmem:[%s9778_s16 + $0x60] sm:$0xff]  }
 0x9fd   :  { %4484 = vst.msk [vmem:[#allocation4 + $0xc] sm:$0x22] %vm9414_vm4, %v4477_v25  ;;  %4519 = vst.msk [vmem:[#allocation4 + $0x18] sm:$0x22] %vm9414_vm4, %v4516_v0  ;;  %v4556_v39 = vpop.permute.xlu0 %4555  ;;  %v7325_v25 = vld [vmem:[%s9778_s16 + $0x8] sm:$0xff]   ;;  %v7328_v0 = vld [vmem:[%s9778_s16 + $0x58] sm:$0xff]  }
 0x9fe   :  { %4541 = vst.msk [vmem:[#allocation4 + $0x2c] sm:$0x1] %vm4482_vm13, %v4536_v37  ;;  %v4525_v20 = vsel %vm9837_vm15, %v4524_v13, %v4523_v48  ;;  %v4557_v49 = vrot.slane %v4556_v39, 4  ;;  %v4608_v4 = vld [vmem:[#allocation4 + $0x8] sm:$0xe]  ;;  %v7333_v48 = vld [vmem:[%s9778_s16 + $0x28] sm:$0xff]  }
 0x9ff   :  { %4543 = vst.msk [vmem:[#allocation4 + $0x2c] sm:$0x2] %vm4455_vm12, %v4536_v37  ;;  %v4545_v21 = vpop.permute.xlu1 %4544  ;;  %vm9838_vm12 = vmmov %vm9836_vm0  ;;  %v7331_v34 = vld [vmem:[%s9778_s16 + $0x20] sm:$0xff]   ;;  %v7332_v37 = vld [vmem:[%s9778_s16 + $0x68] sm:$0xff]  }
 0xa00   :  { %4540 = vst.msk [vmem:[#allocation4 + $0x24] sm:$0x11] %vm9431_vm10, %v4537_v18  ;;  %v4558_v51 = vsel %vm9838_vm12, %v4557_v49, %v4556_v39  ;;  %v4546_v61 = vrot.slane %v4545_v21, 4  ;;  %v4607_v38 = vld [vmem:[#allocation4] sm:$0xee] }
 0xa01   :  { %4542 = vst.msk [vmem:[#allocation4 + $0x24] sm:$0x22] %vm9414_vm4, %v4537_v18  ;;  %vm9839_vm4 = vmmov %vm9836_vm0  ;;  %v5137_v1 = vld [vmem:[#allocation4] sm:$0xcc]  ;;  %v7334_v18 = vld [vmem:[%s9778_s16 + $0x70] sm:$0xff]  }
 0xa02   :  { %4529 = vst.msk [vmem:[#allocation4 + $0x20] sm:$0x4] %vm4466_vm3, %v4524_v13  ;;  %v4547_v28 = vsel %vm9839_vm4, %v4546_v61, %v4545_v21  ;;  %4551 = vst.msk [vmem:[#allocation4 + $0x2c] sm:$0x4] %vm4466_vm3, %v4546_v61  ;;  %v9499_v59 = vld [vmem:[#allocation4 + $0x14] sm:$0xf] }
 0xa03   :  { %4531 = vst.msk [vmem:[#allocation4 + $0x20] sm:$0x8] %vm4470_vm6, %v4524_v13  ;;  %4553 = vst.msk [vmem:[#allocation4 + $0x2c] sm:$0x8] %vm4470_vm6, %v4546_v61  ;;  %v2744_v47 = vpop.permute.xlu1 %2743  ;;  %v6138_v6 = vcombine.low %v4608_v4, %v9499_v59  ;;  %v4563_v15 = vld [vmem:[#allocation4] sm:$0xff]  ;;  %v7335_v13 = vld [vmem:[%s9778_s16 + $0x30] sm:$0xff]  }
 0xa04   :  { %4528 = vst.msk [vmem:[#allocation4 + $0x18] sm:$0x44] %vm9399_vm2, %v4525_v20  ;;  %4550 = vst.msk [vmem:[#allocation4 + $0x24] sm:$0x44] %vm9399_vm2, %v4547_v28  ;;  %v9480_v35 = vld [vmem:[#allocation4 + $0xc] sm:$0xff]  ;;  %v7336_v39 = vld [vmem:[%s9778_s16 + $0x78] sm:$0xff]  }
 0xa05   :  { %4530 = vst.msk [vmem:[#allocation4 + $0x18] sm:$0x88] %vm9405_vm11, %v4525_v20  ;;  %4552 = vst.msk [vmem:[#allocation4 + $0x24] sm:$0x88] %vm9405_vm11, %v4547_v28  ;;  %v6137_v23 = vcombine.high %v4607_v38, %v9480_v35  ;;  %v6136_v52 = vcombine.low %v4607_v38, %v9480_v35  ;;  %v6225_v40 = vcombine.high %v5137_v1, %v9480_v35  ;;  %v4688_v9 = vrot.slane %v6138_v6, 1  ;;  %v7337_v20 = vld [vmem:[%s9778_s16 + $0x38] sm:$0xff]  }
 0xa06   :  { %4562 = vst.msk [vmem:[#allocation4 + $0x38] sm:$0x1] %vm4482_vm13, %v4557_v49  ;;  %v6224_v46 = vcombine.low %v5137_v1, %v9480_v35  ;;  %v6166_v24 = vcombine.high %v4563_v15, %v9480_v35  ;;  %v7338_v49 = vld [vmem:[%s9778_s16 + $0x80] sm:$0xff]   ;;  %v6165_v21 = vcombine.low %v4563_v15, %v9480_v35  ;;  %v7344_v38 = vld [vmem:[%s9778_s16 + $0x168] sm:$0xff]   ;;  %v7348_v1 = vld [vmem:[%s9778_s16 + $0x178] sm:$0xff]  }
 0xa07   :  { %4561 = vst.msk [vmem:[#allocation4 + $0x30] sm:$0x11] %vm9431_vm10, %v4558_v51  ;;  %v4685_v55 = vrot.slane %v6137_v23, 1  ;;  %v4682_v10 = vrot.slane %v6136_v52, 1  ;;  %v5197_v42 = vrot.slane %v6225_v40, 2  ;;  %v7339_v51 = vld [vmem:[%s9778_s16 + $0x88] sm:$0xff]  }
 0xa08   :  { %2746 = vst.msk [vmem:[#allocation7] sm:$0x3] %vm9840_vm8, %v2744_v47  ;;  %v5194_v43 = vrot.slane %v6224_v46, 2  ;;  %v7341_v61 = vld [vmem:[%s9778_s16 + $0x160] sm:$0xff]   ;;  %v7345_v23 = vld [vmem:[%s9778_s16 + $0x128] sm:$0xff]   ;;  %v7346_v52 = vld [vmem:[%s9778_s16 + $0x170] sm:$0xff]  }
 0xa09   :  { %v4564_v28 = vld [vmem:[#allocation4 + $0x8] sm:$0xf] }
 0xa0a   :  { %v9512_v3 = vld [vmem:[#allocation4 + $0x20] ss:$12 sps:$4 sm:$0xff]   ;;  %v6167_v47 = vcombine.low %v4564_v28, %v9499_v59  ;;  %v7342_v35 = vld [vmem:[%s9778_s16 + $0x120] sm:$0xff]  }
 0xa0b   :  { %v4689_v8 = vrot.slane %v9512_v3, 1  ;;  %v7350_v40 = vld [vmem:[%s9778_s16 + $0x180] sm:$0xff]  }
 0xa0c   :  { %v9486_v63 = vld [vmem:[#allocation4 + $0x1c] ss:$12 sps:$4 sm:$0xff]   ;;  %v9488_v5 = vld [vmem:[#allocation4 + $0x18] ss:$12 sps:$4 sm:$0xff]  }
 0xa0d   :  { %v4686_v32 = vrot.slane %v9486_v63, 1  ;;  %v4683_v19 = vrot.slane %v9488_v5, 1  ;;  %v5198_v30 = vrot.slane %v9486_v63, 2  ;;  %v5195_v41 = vrot.slane %v9488_v5, 2  ;;  %v7351_v46 = vld [vmem:[%s9778_s16 + $0x140] sm:$0xff]  }
 0xa0e   :  { %v4609_v53 = vld [vmem:[#allocation4 + $0x30] sm:$0x11]  ;;  %v4690_v12 = vsel %vm3453_vm7, %v4688_v9, %v4689_v8  ;;  %v5138_v4 = vld [vmem:[#allocation4 + $0x8] sm:$0xc] }
 0xa0f   :  { %v6143_v2 = vcombine.high %v4609_v53, %v4609_v53  ;;  %v4687_v44 = vsel %vm3453_vm7, %v4685_v55, %v4686_v32  ;;  %v4684_v50 = vsel %vm3453_vm7, %v4682_v10, %v4683_v19  ;;  %v6142_v57 = vcombine.low %v4609_v53, %v4609_v53  ;;  %v7347_v53 = vld [vmem:[%s9778_s16 + $0x130] sm:$0xff]   ;;  %v7352_v55 = vld [vmem:[%s9778_s16 + $0x188] sm:$0xff]  }
 0xa10   :  { %4847 = vmatprep.mubr.bf16.mxu0 %v4687_v44  ;;  %v9504_v45 = vsel %vm4114_vm1, %v5197_v42, %v5198_v30  ;;  %v9509_v54 = vsel %vm4114_vm1, %v5194_v43, %v5195_v41  ;;  %v7353_v10 = vld [vmem:[%s9778_s16 + $0x148] sm:$0xff]   ;;  %v7356_v42 = vld [vmem:[%s9778_s16 + $0x198] sm:$0xff]   ;;  %v6226_v6 = vcombine.low %v5138_v4, %v9499_v59 }
 0xa11   :  { %v4693_v31 = vrot.slane %v6143_v2, 1  ;;  %4848 = vmatmul.mubr.bf16.vlgmr.msra.gmra.mrb[92].mxu0 %v4684_v50  ;;  %v4691_v7 = vrot.slane %v6142_v57, 1  ;;  %v7349_v2 = vld [vmem:[%s9778_s16 + $0x138] sm:$0xff]   ;;  %v7359_v50 = vld [vmem:[%s9778_s16 + $0x1a0] sm:$0xff]   ;;  %v7362_v57 = vld [vmem:[%s9778_s16 + $0x1a8] sm:$0xff]  }
 0xa12   :  { %6911 = vmatpush3.bf16.msra.mxu0 %v9392_v60  ;;  %v7320_v60 = vld [vmem:[#allocation4 + $0x38] ss:$0 sps:$4 sm:$0x11]   ;;  %v7357_v44 = vld [vmem:[%s9778_s16 + $0x158] sm:$0xff]  }
 0xa13   :  { %v4694_v62 = vsel %vm3453_vm7, %v4686_v32, %v4693_v31  ;;  %6912 = vmatprep.subr.bf16.mxu0 %v7316_v56  ;;  %v4692_v11 = vsel %vm3453_vm7, %v4683_v19, %v4691_v7  ;;  %v4695_v22 = vrot.slane %v7320_v60, 1  ;;  %v7354_v31 = vld [vmem:[%s9778_s16 + $0x190] sm:$0xff]   ;;  %v5201_v7 = vrot.slane %v9512_v3, 2 }
 0xa14   :  { %4855 = vmatprep.mubr.bf16.mxu0 %v4694_v62  ;;  %v7355_v32 = vld [vmem:[%s9778_s16 + $0x150] sm:$0xff]  }
 0xa15   :  { %v4696_v17 = vsel %vm3453_vm7, %v4689_v8, %v4695_v22  ;;  %v5139_v19 = vld [vmem:[#allocation4 + $0x30] sm:$0x33]  ;;  %v5200_v8 = vrot.slane %v6226_v6, 2 }
 0xa16   :  { %6913 = vmatpush3.bf16.msra.mxu0 %v7316_v56  ;;  %v6228_v43 = vcombine.high %v5139_v19, %v5139_v19 }
 0xa17   :  { %6492 = vmatprep.subr.bf16.mxu0 %v7319_v26 }
 0xa18   :  { %v5205_v56 = vrot.slane %v6228_v43, 2 }
 0xa19   :  { %4856 = vmatmul.mubr.bf16.gmra.mrb[96].mxu0 %v4692_v11 }
 0xa1a   :  { %6914 = vmatprep.mubr.msk.bf16.mxu0 %vm1597_vm9, %v4690_v12  ;;  %v5206_v62 = vsel %vm4114_vm1, %v5198_v30, %v5205_v56  ;;  %v7364_v30 = vld [vmem:[#allocation4 + $0x38] ss:$0 sps:$4 sm:$0x33]  }
 0xa21   :  { %6915 = vmatmul.mubr.msk.bf16.vlgmr.msra.gmra.mrb[100].mxu0 %vm1597_vm9, %v4696_v17 }
 0xa22   :  { %6493 = vmatpush3.bf16.msra.mxu0 %v7321_v14  ;;  %5071 = vmatprep.mubr.bf16.mxu0 %v6166_v24 }
 0xa23   :  { %6494 = vmatprep.subr.bf16.mxu0 %v7324_v16 }
 0xa26   :  { %6495 = vmatpush3.bf16.msra.mxu0 %v7325_v25 }
 0xa27   :  { %6496 = vmatprep.subr.bf16.mxu0 %v7326_v27 }
 0xa2a   :  { %6497 = vmatpush3.bf16.msra.mxu0 %v7327_v58 }
 0xa2b   :  { %6498 = vmatprep.subr.bf16.mxu0 %v7328_v0 }
 0xa2e   :  { %6499 = vmatpush3.bf16.msra.mxu0 %v7329_v29 }
 0xa2f   :  { %6500 = vmatprep.subr.bf16.mxu0 %v7330_v33 }
 0xa32   :  { %6501 = vmatpush3.bf16.msra.mxu0 %v7331_v34 }
 0xa33   :  { %6502 = vmatprep.subr.bf16.mxu0 %v7332_v37 }
 0xa36   :  { %6503 = vmatpush3.bf16.msra.mxu0 %v7333_v48 }
 0xa37   :  { %6504 = vmatprep.subr.bf16.mxu0 %v7334_v18 }
 0xa3a   :  { %6505 = vmatpush3.bf16.msra.mxu0 %v7335_v13 }
 0xa3b   :  { %6506 = vmatprep.subr.bf16.mxu0 %v7336_v39 }
 0xa3e   :  { %6507 = vmatpush3.bf16.msra.mxu0 %v7337_v20 }
 0xa3f   :  { %6918 = vmatprep.subr.bf16.mxu0 %v7338_v49 }
 0xa41   :  { %5072 = vmatmul.mubr.bf16.vlgmr.msra.gmra.mrb[104].mxu0 %v6165_v21 }
 0xa42   :  { %5079 = vmatprep.mubr.bf16.mxu0 %v9486_v63  ;;  %6919 = vmatpush3.bf16.msra.mxu0 %v7338_v49  ;;  %v5202_v63 = vsel %vm4114_vm1, %v5200_v8, %v5201_v7 }
 0xa43   :  { %6920 = vmatprep.subr.bf16.mxu0 %v7339_v51 }
 0xa46   :  { %6921 = vmatpush3.bf16.msra.mxu0 %v7339_v51 }
 0xa47   :  { %6524 = vmatprep.subr.bf16.mxu0 %v7341_v61 }
 0xa49   :  { %5080 = vmatmul.mubr.bf16.gmra.mrb[108].mxu0 %v9488_v5 }
 0xa4a   :  { %6922 = vmatprep.mubr.msk.bf16.mxu0 %vm1597_vm9, %v6167_v47 }
 0xa51   :  { %6923 = vmatmul.mubr.msk.bf16.vlgmr.msra.gmra.mrb[100].mxu0 %vm1597_vm9, %v9512_v3 }
 0xa52   :  { %6525 = vmatpush3.bf16.msra.mxu0 %v7342_v35  ;;  %5359 = vmatprep.mubr.bf16.mxu0 %v9504_v45  ;;  %v6227_v45 = vcombine.low %v5139_v19, %v5139_v19 }
 0xa53   :  { %6526 = vmatprep.subr.bf16.mxu0 %v7344_v38 }
 0xa54   :  { %v5203_v26 = vrot.slane %v6227_v45, 2 }
 0xa56   :  { %6527 = vmatpush3.bf16.msra.mxu0 %v7345_v23  ;;  %v5204_v9 = vsel %vm4114_vm1, %v5195_v41, %v5203_v26 }
 0xa57   :  { %6528 = vmatprep.subr.bf16.mxu0 %v7346_v52 }
 0xa5a   :  { %6529 = vmatpush3.bf16.msra.mxu0 %v7347_v53 }
 0xa5b   :  { %6530 = vmatprep.subr.bf16.mxu0 %v7348_v1 }
 0xa5e   :  { %6531 = vmatpush3.bf16.msra.mxu0 %v7349_v2 }
 0xa5f   :  { %6532 = vmatprep.subr.bf16.mxu0 %v7350_v40 }
 0xa62   :  { %6533 = vmatpush3.bf16.msra.mxu0 %v7351_v46 }
 0xa63   :  { %6534 = vmatprep.subr.bf16.mxu0 %v7352_v55 }
 0xa66   :  { %6535 = vmatpush3.bf16.msra.mxu0 %v7353_v10 }
 0xa67   :  { %6536 = vmatprep.subr.bf16.mxu0 %v7354_v31 }
 0xa6a   :  { %6537 = vmatpush3.bf16.msra.mxu0 %v7355_v32 }
 0xa6b   :  { %6538 = vmatprep.subr.bf16.mxu0 %v7356_v42  ;;  %v6250_v42 = vld [vmem:[%s9779_s17] ss:$0 sm:$0xff] }
 0xa6e   :  { %6539 = vmatpush3.bf16.msra.mxu0 %v7357_v44 }
 0xa6f   :  { %6926 = vmatprep.subr.bf16.mxu0 %v7359_v50 }
 0xa71   :  { %5360 = vmatmul.mubr.bf16.vlgmr.msra.gmra.mrb[112].mxu0 %v9509_v54  ;;  %v5207_v54 = vrot.slane %v7364_v30, 2 }
 0xa72   :  { %5367 = vmatprep.mubr.bf16.mxu0 %v5206_v62  ;;  %6927 = vmatpush3.bf16.msra.mxu0 %v7359_v50 }
 0xa73   :  { %6928 = vmatprep.subr.bf16.mxu0 %v7362_v57  ;;  %v5208_v11 = vsel %vm4114_vm1, %v5201_v7, %v5207_v54 }
 0xa76   :  { %6929 = vmatpush3.bf16.msra.mxu0 %v7362_v57 }
 0xa79   :  { %5368 = vmatmul.mubr.bf16.gmra.mrb[116].mxu0 %v5204_v9 }
 0xa7a   :  { %6930 = vmatprep.mubr.msk.bf16.mxu0 %vm1597_vm9, %v5202_v63 }
 0xa81   :  { %6931 = vmatmul.mubr.msk.bf16.vlgmr.msra.gmra.mrb[100].mxu0 %vm1597_vm9, %v5208_v11  ;;  %vm9841_vm9 = vcmask 517120  }
 0xa82   :  { %vm9842_vm7 = vmmov %vm9841_vm9 }
 0xa83   :  { %vm9843_vm1 = vmmov %vm9842_vm7 }
 0xa84   :  { %vm9844_vm2 = vmmov %vm9843_vm1 }
 0xa85   :  { %vm9845_vm3 = vmmov %vm9843_vm1 }
 0xa86   :  { %vm9846_vm6 = vmmov %vm9843_vm1 }
 0xa87   :  { %vm9847_vm11 = vmmov %vm9843_vm1 }
 0xa88   :  { %vm9848_vm13 = vmmov %vm9843_vm1 }
 0xae4   :  { %v6476_v59 = vpop.f32.mrb[92].mxu0 }
 0xae5   :  { %v6477_v12 = vpop.f32.mrb[93].mxu0 }
 0xae6   :  { %v6478_v3 = vadd.f32 %v6477_v12, %v6476_v59  ;;  %v6479_v60 = vpop.f32.mrb[94].mxu0 }
 0xae7   :  { %v6480_v22 = vpop.f32.mrb[95].mxu0 }
 0xae8   :  { %v6481_v14 = vadd.f32 %v6480_v22, %v6479_v60 }
 0xaec   :  { %v6482_v5 = vpop.f32.mrb[96].mxu0 }
 0xaed   :  { %v6483_v15 = vpop.f32.mrb[97].mxu0 }
 0xaee   :  { %v6484_v41 = vadd.f32 %v6483_v15, %v6482_v5  ;;  %v6485_v16 = vpop.f32.mrb[98].mxu0  ;;  %v7451_v15 = vmov 1983009808  }
 0xaef   :  { %v6486_v17 = vpop.f32.mrb[99].mxu0 }
 0xaf0   :  { %v6487_v24 = vadd.f32 %v6486_v17, %v6485_v16 }
 0xb14   :  { %v6508_v25 = vpop.f32.mrb[104].mxu0 }
 0xb15   :  { %v6509_v27 = vpop.f32.mrb[105].mxu0 }
 0xb16   :  { %v6510_v58 = vadd.f32 %v6509_v27, %v6508_v25  ;;  %v6511_v0 = vpop.f32.mrb[106].mxu0 }
 0xb17   :  { %v6512_v29 = vpop.f32.mrb[107].mxu0 }
 0xb18   :  { %v6937_v33 = vadd.f32 %v6510_v58, %v6478_v3  ;;  %v6513_v34 = vadd.f32 %v6512_v29, %v6511_v0 }
 0xb1a   :  { %v6943_v37 = vadd.f32 %v6513_v34, %v6481_v14 }
 0xb1c   :  { %v6514_v48 = vpop.f32.mrb[108].mxu0 }
 0xb1d   :  { %v6515_v18 = vpop.f32.mrb[109].mxu0 }
 0xb1e   :  { %v6516_v13 = vadd.f32 %v6515_v18, %v6514_v48  ;;  %v6517_v39 = vpop.f32.mrb[110].mxu0 }
 0xb1f   :  { %v6518_v20 = vpop.f32.mrb[111].mxu0 }
 0xb20   :  { %v6934_v49 = vadd.f32 %v6516_v13, %v6484_v41  ;;  %v6519_v21 = vadd.f32 %v6518_v20, %v6517_v39  ;;  %v5467_v41 = vunpack.c.l.s4 %v7451_v15 }
 0xb22   :  { %v6940_v51 = vadd.f32 %v6519_v21, %v6487_v24  ;;  %v5468_v25 = vunpack.c.0.s8 %v5467_v41 }
 0xb24   :  { %v9656_v27 = vsub.s32 %v5468_v25, %v8881_v36 }
 0xb44   :  { %v6540_v61 = vpop.f32.mrb[112].mxu0 }
 0xb45   :  { %v6541_v28 = vpop.f32.mrb[113].mxu0 }
 0xb46   :  { %v6542_v47 = vadd.f32 %v6541_v28, %v6540_v61  ;;  %v6543_v35 = vpop.f32.mrb[114].mxu0 }
 0xb47   :  { %v6544_v38 = vpop.f32.mrb[115].mxu0 }
 0xb48   :  { %v6545_v23 = vadd.f32 %v6544_v38, %v6543_v35  ;;  %v6938_v52 = vadd.f32 %v6937_v33, %v6542_v47 }
 0xb4a   :  { %v6944_v53 = vadd.f32 %v6943_v37, %v6545_v23 }
 0xb4c   :  { %v6546_v1 = vpop.f32.mrb[116].mxu0 }
 0xb4d   :  { %v6547_v2 = vpop.f32.mrb[117].mxu0 }
 0xb4e   :  { %v6548_v40 = vadd.f32 %v6547_v2, %v6546_v1  ;;  %v6549_v46 = vpop.f32.mrb[118].mxu0 }
 0xb4f   :  { %v6550_v55 = vpop.f32.mrb[119].mxu0 }
 0xb50   :  { %v6551_v10 = vadd.f32 %v6550_v55, %v6549_v46  ;;  %v6935_v31 = vadd.f32 %v6934_v49, %v6548_v40 }
 0xb52   :  { %v6941_v32 = vadd.f32 %v6940_v51, %v6551_v10 }
 0xb54   :  { %v6932_v19 = vpop.f32.mrb[100].mxu0 }
 0xb55   :  { %v6936_v43 = vadd.f32 %v6935_v31, %v6932_v19  ;;  %v5410_v44 = vpop.f32.mrb[101].mxu0 }
 0xb56   :  { %v6939_v50 = vadd.f32 %v6938_v52, %v5410_v44  ;;  %v6933_v56 = vpop.f32.mrb[102].mxu0 }
 0xb57   :  { %v5438_v57 = vadd.f32 %v6936_v43, %v6250_v42  ;;  %v6942_v45 = vadd.f32 %v6941_v32, %v6933_v56  ;;  %v5413_v62 = vpop.f32.mrb[103].mxu0 }
 0xb58   :  { %v5436_v4 = vadd.f32 %v6939_v50, %v6250_v42  ;;  %v6945_v6 = vadd.f32 %v6944_v53, %v5413_v62 }
 0xb59   :  { %v5442_v26 = vsub.f32 0.0, %v5438_v57  ;;  %v5439_v7 = vadd.f32 %v6942_v45, %v6250_v42 }
 0xb5a   :  { %v5440_v8 = vsub.f32 0.0, %v5436_v4  ;;  %v5437_v9 = vadd.f32 %v6945_v6, %v6250_v42 }
 0xb5b   :  { %v5448_v63 = vmul.f32 1.442695, %v5442_v26  ;;  %v5443_v30 = vsub.f32 0.0, %v5439_v7 }
 0xb5c   :  { %v5444_v54 = vmul.f32 1.442695, %v5440_v8  ;;  %v5441_v11 = vsub.f32 0.0, %v5437_v9 }
 0xb5d   :  { %7367 = vpow2.f32 %v5448_v63  ;;  %v5450_v59 = vmul.f32 1.442695, %v5443_v30 }
 0xb5e   :  { %7369 = vpow2.f32 %v5444_v54  ;;  %v5446_v12 = vmul.f32 1.442695, %v5441_v11 }
 0xb5f   :  { %7371 = vpow2.f32 %v5450_v59 }
 0xb60   :  { %7373 = vpow2.f32 %v5446_v12 }
 0xb67   :  { %v7368_v3 = vpop.eup %7367 }
 0xb68   :  { %v7370_v60 = vpop.eup %7369  ;;  %v5454_v22 = vadd.f32 1.0, %v7368_v3 }
 0xb69   :  { %v7372_v14 = vpop.eup %7371  ;;  %v5452_v5 = vadd.f32 1.0, %v7370_v60 }
 0xb6a   :  { %v7374_v16 = vpop.eup %7373  ;;  %7375 = vrcp.f32 %v5454_v22  ;;  %v5455_v17 = vadd.f32 1.0, %v7372_v14 }
 0xb6b   :  { %7377 = vrcp.f32 %v5452_v5  ;;  %v5453_v24 = vadd.f32 1.0, %v7374_v16 }
 0xb6c   :  { %7379 = vrcp.f32 %v5455_v17 }
 0xb6d   :  { %7381 = vrcp.f32 %v5453_v24 }
 0xb74   :  { %v7376_v58 = vpop.eup %7375 }
 0xb75   :  { %v7378_v0 = vpop.eup %7377  ;;  %5523 = vst.msk [vmem:[%s9780_s18 + $0x8] sm:$0x3] %vm9841_vm9, %v7376_v58  ;;  %v5531_v29 = vrot.slane %v7376_v58, %v9656_v27  ;;  %v5537_v33 = vcombine.high %v7376_v58, %v7376_v58 }
 0xb76   :  { %v7380_v34 = vpop.eup %7379  ;;  %5464 = vst.msk [vmem:[%s9780_s18] sm:$0x3] %vm9842_vm7, %v7378_v0  ;;  %v5479_v37 = vcombine.high %v7378_v0, %v7378_v0  ;;  %v5472_v13 = vrot.slane %v7378_v0, %v9656_v27 }
 0xb77   :  { %v7382_v48 = vpop.eup %7381  ;;  %5552 = vst.msk [vmem:[%s9780_s18 + $0xc] sm:$0x3] %vm9843_vm1, %v7380_v34  ;;  %v5532_v36 = vcombine.high %v5531_v29, %v5531_v29  ;;  %v5544_v18 = vrot.slane %v5537_v33, %v9656_v27  ;;  %v5566_v39 = vcombine.high %v7380_v34, %v7380_v34 }
 0xb78   :  { %5494 = vst.msk [vmem:[%s9780_s18 + $0x4] sm:$0x3] %vm9844_vm2, %v7382_v48  ;;  %v5486_v20 = vrot.slane %v5479_v37, %v9656_v27  ;;  %v5508_v49 = vcombine.high %v7382_v48, %v7382_v48  ;;  %v5473_v28 = vcombine.high %v5472_v13, %v5472_v13  ;;  %v5502_v47 = vrot.slane %v7382_v48, %v9656_v27 }
 0xb79   :  { %5533 = vrot.lane.b32.xlu0 %v5532_v36, %s7452_s1  ;;  %v5547_v21 = vcombine.high %v5544_v18, %v5544_v18  ;;  %5546 = vst.msk [vmem:[%s9780_s18 + $0xa] sm:$0x3] %vm9845_vm3, %v5544_v18  ;;  %v5573_v51 = vrot.slane %v5566_v39, %v9656_v27 }
 0xb7a   :  { %5488 = vst.msk [vmem:[%s9780_s18 + $0x2] sm:$0x3] %vm9846_vm6, %v5486_v20  ;;  %v5515_v61 = vrot.slane %v5508_v49, %v9656_v27  ;;  %v5489_v35 = vcombine.high %v5486_v20, %v5486_v20 }
 0xb7b   :  { %5548 = vrot.lane.b32.xlu1 %v5547_v21, %s7452_s1  ;;  %5575 = vst.msk [vmem:[%s9780_s18 + $0xe] sm:$0x3] %vm9847_vm11, %v5573_v51 }
 0xb7c   :  { %5517 = vst.msk [vmem:[%s9780_s18 + $0x6] sm:$0x3] %vm9848_vm13, %v5515_v61 }
 0xb7d   :  { %5474 = vrot.lane.b32.xlu0 %v5473_v28, %s7452_s1 }
 0xb7e   :  { %7408 = shalt.err (!%p7405_p4)
}
 0xb7f   :  { %s7409_s15 = scalar_lea.hbm %s9781_s19, 32 }
 0xb80   :  { %p7410_p5 = scmp.ne.s32.totalorder %s9781_s19, %s7409_s15  ;;  %p7413_p6 = scmp.lt.u32.totalorder %s7409_s15, %s9781_s19 }
 0xb82   :  { %p7415_p7 = pnand %p7413_p6, %p7410_p5 }
 0xb84   :  { %7418 = shalt.err (!%p7415_p7)
}
 0xb85   :  { %5592 = dma.vmem_to_hbm [thread:$0]  %s5590_s12, 32, %s9781_s19, [#allocation6]  }
 0xb86   :  { %s7419_s10 = scalar_lea.vmem %s5600_s4, 32  ;;  %p7424_p9 = scmp.lt.s32.totalorder %s5600_s4, %s5600_s4 }
 0xb87   :  { %p7420_p8 = scmp.ne.s32.totalorder %s5600_s4, %s7419_s10  ;;  %p7425_p10 = scmp.lt.s32.totalorder %s7419_s10, %s7419_s10 }
 0xb89   :  { %p7426_p11 = por %p7425_p10, %p7424_p9 }
 0xb8b   :  { %p7427_p12 = pnand %p7426_p11, %p7420_p8 }
 0xb8d   :  { %7430 = shalt.err (!%p7427_p12)
}
 0xb8e   :  { %s7431_s26 = scalar_lea.hbm %s9782_s20, 32 }
 0xb8f   :  { %p7432_p13 = scmp.ne.s32.totalorder %s9782_s20, %s7431_s26  ;;  %p7435_p0 = scmp.lt.u32.totalorder %s7431_s26, %s9782_s20 }
 0xb91   :  { %p7437_p1 = pnand %p7435_p0, %p7432_p13 }
 0xb93   :  { %7440 = shalt.err (!%p7437_p1)
}
 0xb94   :  { %5602 = dma.vmem_to_hbm [thread:$0]  %s5600_s4, 32, %s9782_s20, [#allocation8]   ;;  %5490 = vrot.lane.b32.xlu1 %v5489_v35, %s7452_s1  ;;  %v5503_v38 = vcombine.high %v5502_v47, %v5502_v47  ;;  %v5560_v23 = vrot.slane %v7380_v34, %v9656_v27  ;;  %v5518_v52 = vcombine.high %v5515_v61, %v5515_v61  ;;  %v5576_v1 = vcombine.high %v5573_v51, %v5573_v51 }
 0xb95   :  { %vm5477_vm10 = vcmask 1041920  }
 0xb96   :  { %5504 = vrot.lane.b32.xlu0 %v5503_v38, %s7452_s1  ;;  %v5561_v53 = vcombine.high %v5560_v23, %v5560_v23 }
 0xb98   :  { %5519 = vrot.lane.b32.xlu1 %v5518_v52, %s7452_s1 }
 0xb9a   :  { %5562 = vrot.lane.b32.xlu0 %v5561_v53, %s7452_s1 }
 0xb9c   :  { %5577 = vrot.lane.b32.xlu1 %v5576_v1, %s7452_s1 }
 0xbeb   :  { %v5534_v2 = vpop.permute.xlu0 %5533 }
 0xbec   :  { %5536 = vst.msk [vmem:[%s9780_s18 + $0x8] sm:$0x3] %vm5477_vm10, %v5534_v2 }
 0xbed   :  { %v5549_v40 = vpop.permute.xlu1 %5548 }
 0xbee   :  { %5551 = vst.msk [vmem:[%s9780_s18 + $0xa] sm:$0x3] %vm5477_vm10, %v5549_v40 }
 0xbef   :  { %v5475_v46 = vpop.permute.xlu0 %5474 }
 0xbf0   :  { %5478 = vst.msk [vmem:[%s9780_s18] sm:$0x3] %vm5477_vm10, %v5475_v46 }
 0xc06   :  { %v5491_v55 = vpop.permute.xlu1 %5490 }
 0xc07   :  { %5493 = vst.msk [vmem:[%s9780_s18 + $0x2] sm:$0x3] %vm5477_vm10, %v5491_v55 }
 0xc08   :  { %v5505_v10 = vpop.permute.xlu0 %5504 }
 0xc09   :  { %5507 = vst.msk [vmem:[%s9780_s18 + $0x4] sm:$0x3] %vm5477_vm10, %v5505_v10 }
 0xc0a   :  { %v5520_v31 = vpop.permute.xlu1 %5519 }
 0xc0b   :  { %5522 = vst.msk [vmem:[%s9780_s18 + $0x6] sm:$0x3] %vm5477_vm10, %v5520_v31 }
 0xc0c   :  { %v5563_v32 = vpop.permute.xlu0 %5562 }
 0xc0d   :  { %5565 = vst.msk [vmem:[%s9780_s18 + $0xc] sm:$0x3] %vm5477_vm10, %v5563_v32 }
 0xc0e   :  { %v5578_v19 = vpop.permute.xlu1 %5577 }
 0xc0f   :  { %5580 = vst.msk [vmem:[%s9780_s18 + $0xe] sm:$0x3] %vm5477_vm10, %v5578_v19 }
 0xc10   :  { %7441 = dma.done.wait [#allocation6], 32  }
 0xc11   :  { %7442 = vsyncadd [#allocation6], 4294967264 }
 0xc12   :  { %7443 = dma.done.wait [#allocation8], 32  }
 0xc13   :  { %7444 = vsyncadd [#allocation8], 4294967264 }
 0xc14   :  { %5611 = vsyncpa [#allocation6], 1 }
 0xc15   :  { %5612 = vsyncpa [#allocation8], 1 }

</bundles_post_ra>
